<compile_context>
chip_gen: v5e
topology: v5e:2x2
jax: 0.10.0
libtpu: 0.0.40
codegen_flags: <defaults>
</compile_context>

<pallas_src>
import numpy as np
import jax
import jax.numpy as jnp
from jax import lax
from jax.experimental import pallas as pl
from jax.experimental.pallas import tpu as pltpu


# --------------------------------------------------------------------------------------
# Kernel
# --------------------------------------------------------------------------------------
def lenet_kernel(a_ref, w1_ref, b1_ref, w2_ref, b2_ref,
                 wf1_ref, bf1_ref, wf2_ref, bf2_ref, wf3_ref, bf3_ref,
                 out_ref):
    f32, bf16 = jnp.float32, jnp.bfloat16
    TB = a_ref.shape[0]

    # ---- conv1: ONE MXU matmul, 5 row-taps folded into K (K = 5*32 = 160) ----------
    # a_ref[b, r*8 + j, ki*32 + col] = x[b, 4j + r + ki, col]   (r<4, j<7; j=7 zero-pad)
    a = a_ref[...].reshape(TB * 32, 160)                        # layout no-op (32 rows)
    m1 = jnp.dot(a, w1_ref[...], preferred_element_type=f32)    # (TB*32, 256)
    # lane layout: even output col j1=2v -> lane v*6+oc ; odd j1=2v+1 -> 128 + v*6+oc
    m1 = m1.reshape(TB, 4, 8, 256)                              # group r = conv row mod 4

    b1 = b1_ref[...]                                            # (1, 128), b1[oc] at v*6+oc

    def pool1(g):                                               # g: (TB, 8, 256) row-pair max
        g = jnp.maximum(g[:, :, :128], g[:, :, 128:])           # column pool (aligned halves)
        return jnp.maximum(g + b1, 0.0)                         # bias + ReLU -> (TB, 8, 128)

    p1_ev = pool1(jnp.maximum(m1[:, 0], m1[:, 1]))              # pooled rows u = 2j
    p1_od = pool1(jnp.maximum(m1[:, 2], m1[:, 3]))              # pooled rows u = 2j+1

    zpad = jnp.zeros((TB, 8, 128), f32)
    p1 = (jnp.concatenate([p1_ev, zpad], axis=1),               # (TB, 16, 128) each
          jnp.concatenate([p1_od, zpad], axis=1))

    # ---- conv2: 2 MXU matmuls (one per output-row parity), taps folded into K ------
    def lhs2(dt):                                               # conv2 rows t = 2s + dt
        parts = []
        for ki in range(5):                                     # pooled row 2s + dt + ki
            e, q = (dt + ki) & 1, (dt + ki) >> 1
            parts.append(p1[e][:, q:q + 8, :])                  # = rows 2(s+q)+e
        return jnp.concatenate(parts, axis=-1).reshape(TB * 8, 640).astype(bf16)

    w2 = w2_ref[...]
    m2 = jnp.maximum(jnp.dot(lhs2(0), w2, preferred_element_type=f32),
                     jnp.dot(lhs2(1), w2, preferred_element_type=f32))   # row pool
    m2 = jnp.maximum(m2[:, :128], m2[:, 128:])                  # column pool (aligned)
    feats = jnp.maximum(m2 + b2_ref[...], 0.0).reshape(TB, 8, 128)
    # feats[b, s, r*16+oc] = pooled conv2 output (s<5, r<5, oc<16); rows 5..7 garbage.

    # ---- fc1 as ONE (TB, 640) x (640, 128) matmul, then fc2, fc3 -------------------
    fvec = jnp.concatenate([feats[:, s, :] for s in range(5)], axis=-1).astype(bf16)
    h = jnp.maximum(jnp.dot(fvec, wf1_ref[...], preferred_element_type=f32)
                    + bf1_ref[...], 0.0).astype(bf16)
    h = jnp.maximum(jnp.dot(h, wf2_ref[...], preferred_element_type=f32)
                    + bf2_ref[...], 0.0).astype(bf16)
    o = jnp.dot(h, wf3_ref[...], preferred_element_type=f32) + bf3_ref[...]
    out_ref[...] = o.astype(out_ref.dtype)                      # (TB, 128) lane-dense store


# --------------------------------------------------------------------------------------
# Weight re-layout (host-side, done once)
# --------------------------------------------------------------------------------------
def _prepare_weights(p):
    w1 = np.asarray(p["w1"], np.float32)      # (6, 1, 5, 5)  (oc, ic, ki, kj)
    w2 = np.asarray(p["w2"], np.float32)      # (16, 6, 5, 5) (oc, c, ki, kj)
    wf1 = np.asarray(p["wf1"], np.float32)    # (120, 400)
    wf2 = np.asarray(p["wf2"], np.float32)    # (84, 120)
    wf3 = np.asarray(p["wf3"], np.float32)    # (4, 84)

    # conv1 banded RHS, taps folded into K: W1b[ki*32+col, par*128 + v*6+oc]
    #   = w1[oc, 0, ki, col - (2v+par)]  for 0 <= col-(2v+par) < 5, else 0
    W1b = np.zeros((160, 256), np.float32)
    col, v = np.arange(32), np.arange(14)
    for ki in range(5):
        for par in range(2):
            d = col[:, None] - (2 * v[None, :] + par)                    # (32, 14)
            msk = (d >= 0) & (d < 5)
            vals = np.transpose(w1[:, 0, ki, np.clip(d, 0, 4)], (1, 2, 0))  # (32,14,6)
            W1b[ki * 32:(ki + 1) * 32, par * 128:par * 128 + 84] = \
                (vals * msk[:, :, None]).reshape(32, 84)

    # conv2 banded RHS on the pooled wide layout: W2b[ki*128 + v*6+c, par*128 + r*16+oc]
    #   = w2[oc, c, ki, v - (2r+par)]  for 0 <= v-(2r+par) < 5, else 0
    W2b = np.zeros((640, 256), np.float32)
    vv, rr = np.arange(14), np.arange(5)
    for ki in range(5):
        for par in range(2):
            d = vv[:, None] - (2 * rr[None, :] + par)                    # (14, 5)
            msk = (d >= 0) & (d < 5)
            vals = np.transpose(w2[:, :, ki, np.clip(d, 0, 4)], (2, 1, 3, 0))  # (14,6,5,16)
            W2b[ki * 128:ki * 128 + 84, par * 128:par * 128 + 80] = \
                (vals * msk[:, None, :, None]).reshape(84, 80)

    # fc1 on the pooled conv2 wide layout: Wf1w[s*128 + r*16+oc, n] = wf1[n, oc*25+s*5+r]
    Wf1w = np.zeros((640, 128), np.float32)
    oc = np.arange(16)
    for s in range(5):
        cols = (25 * oc[None, :] + 5 * s + rr[:, None]).reshape(-1)      # index r*16+oc
        Wf1w[s * 128:s * 128 + 80, :120] = wf1[:, cols].T

    Wf2w = np.zeros((128, 128), np.float32); Wf2w[:120, :84] = wf2.T
    Wf3w = np.zeros((128, 128), np.float32); Wf3w[:84, :4] = wf3.T

    b1 = np.zeros((1, 128), np.float32); b1[0, :84] = np.tile(np.asarray(p["b1"]), 14)
    b2 = np.zeros((1, 128), np.float32); b2[0, :80] = np.tile(np.asarray(p["b2"]), 5)
    bf1 = np.zeros((1, 128), np.float32); bf1[0, :120] = np.asarray(p["bf1"])
    bf2 = np.zeros((1, 128), np.float32); bf2[0, :84] = np.asarray(p["bf2"])
    bf3 = np.zeros((1, 128), np.float32); bf3[0, :4] = np.asarray(p["bf3"])

    bf16 = jnp.bfloat16
    return (jnp.asarray(W1b, bf16), jnp.asarray(b1),
            jnp.asarray(W2b, bf16), jnp.asarray(b2),
            jnp.asarray(Wf1w, bf16), jnp.asarray(bf1),
            jnp.asarray(Wf2w, bf16), jnp.asarray(bf2),
            jnp.asarray(Wf3w, bf16), jnp.asarray(bf3))


def _conv1_im2row(xs):
    """xs: (Bp, 32, 32) f32 -> (Bp, 32, 160) bf16 im2row LHS with taps folded into K.

    Row r*8 + j holds input rows (4j+r)..(4j+r+4) concatenated (j<7; j=7 zero-pad),
    so conv1 output row i = 4j + r and pooled row u = 2j (r in {0,1}) / 2j+1 (r in {2,3}).
    """
    Bp = xs.shape[0]
    r, j, ki = np.arange(4), np.arange(7), np.arange(5)
    rows = 4 * j[None, :, None] + r[:, None, None] + ki[None, None, :]   # (4, 7, 5)
    a = xs[:, rows, :].reshape(Bp, 4, 7, 160)                            # (Bp, 4, 7, 160)
    a = jnp.pad(a, ((0, 0), (0, 0), (0, 1), (0, 0)))                     # pad j: 7 -> 8
    return a.reshape(Bp, 32, 160).astype(jnp.bfloat16)


# --------------------------------------------------------------------------------------
# Wrapper
# --------------------------------------------------------------------------------------
def lenet_forward(x, params, *, max_tile=256):
    """x: (B, 1, 32, 32) float32 (NCHW).  Returns (B, 4)."""
    B = x.shape[0]
    assert x.shape[1:] == (1, 32, 32), x.shape

    # Batch tile: multiple of 8, >= 2 grid steps once B >= 16 (v7x 2-core sharding).
    TB = min(max_tile, max(8, ((B + 15) // 16) * 8))
    assert TB % 8 == 0
    B_pad = ((B + TB - 1) // TB) * TB

    xs = x[:, 0].astype(jnp.float32)
    xs = jnp.pad(xs, ((0, B_pad - B), (0, 0), (0, 0)))
    a = _conv1_im2row(xs)                                   # (B_pad, 32, 160) bf16
    ops = _prepare_weights(params)

    def full_spec(arr):
        nd = arr.ndim
        return pl.BlockSpec(arr.shape, lambda b, _nd=nd: (0,) * _nd)

    grid_spec = pltpu.PrefetchScalarGridSpec(
        num_scalar_prefetch=0,
        grid=(B_pad // TB,),
        in_specs=[pl.BlockSpec((TB, 32, 160), lambda b: (b, 0, 0))]
                 + [full_spec(w) for w in ops],
        out_specs=pl.BlockSpec((TB, 128), lambda b: (b, 0)),
    )
    out = pl.pallas_call(
        lenet_kernel,
        out_shape=jax.ShapeDtypeStruct((B_pad, 128), jnp.float32),
        grid_spec=grid_spec,
        compiler_params=pltpu.CompilerParams(
            dimension_semantics=("parallel",),
            vmem_limit_bytes=48 * 1024 * 1024),
    )(a, *ops)
    return out[:B, :4]


# --------------------------------------------------------------------------------------
# Params + plain-JAX reference (validation)
# --------------------------------------------------------------------------------------
def init_params(key):
    def uniform(k, shape, fan_in):
        bound = 1.0 / np.sqrt(fan_in)
        return jax.random.uniform(k, shape, jnp.float32, -bound, bound)
    ks = jax.random.split(key, 10)
    return {
        "w1": uniform(ks[0], (6, 1, 5, 5), 25),   "b1": uniform(ks[1], (6,), 25),
        "w2": uniform(ks[2], (16, 6, 5, 5), 150), "b2": uniform(ks[3], (16,), 150),
        "wf1": uniform(ks[4], (120, 400), 400),   "bf1": uniform(ks[5], (120,), 400),
        "wf2": uniform(ks[6], (84, 120), 120),    "bf2": uniform(ks[7], (84,), 120),
        "wf3": uniform(ks[8], (4, 84), 84),       "bf3": uniform(ks[9], (4,), 84),
    }


def reference_forward(x, p):
    dn = ("NCHW", "OIHW", "NCHW")
    hp = lax.Precision.HIGHEST
    y = lax.conv_general_dilated(x, p["w1"], (1, 1), "VALID",
                                 dimension_numbers=dn, precision=hp)
    y = jnp.maximum(y + p["b1"][None, :, None, None], 0.0)
    y = lax.reduce_window(y, -jnp.inf, lax.max, (1, 1, 2, 2), (1, 1, 2, 2), "VALID")
    y = lax.conv_general_dilated(y, p["w2"], (1, 1), "VALID",
                                 dimension_numbers=dn, precision=hp)
    y = jnp.maximum(y + p["b2"][None, :, None, None], 0.0)
    y = lax.reduce_window(y, -jnp.inf, lax.max, (1, 1, 2, 2), (1, 1, 2, 2), "VALID")
    y = y.reshape(y.shape[0], -1)                                      # (B, 400), (c,h,w)
    y = jnp.maximum(jnp.dot(y, p["wf1"].T, precision=hp) + p["bf1"], 0.0)
    y = jnp.maximum(jnp.dot(y, p["wf2"].T, precision=hp) + p["bf2"], 0.0)
    return jnp.dot(y, p["wf3"].T, precision=hp) + p["bf3"]


if __name__ == "__main__":
    key = jax.random.PRNGKey(0)
    pkey, xkey1, xkey2 = jax.random.split(key, 3)
    params = init_params(pkey)

    # LeNet geometry requires 32x32 spatial input (16*5*5 flat features).
    # B=2 exercises batch padding; B=20 exercises a multi-step ("parallel") grid.
    for xkey, B in ((xkey1, 2), (xkey2, 20)):
        x = jax.random.normal(xkey, (B, 1, 32, 32), jnp.float32)
        out = jax.block_until_ready(lenet_forward(x, params))
        ref = jax.block_until_ready(reference_forward(x, params))
        assert out.shape == (B, 4), out.shape
        o, r = np.asarray(out), np.asarray(ref)
        if not np.allclose(o, r, atol=2e-2, rtol=2e-2):   # bf16 MXU operands vs f32 ref
            raise AssertionError(
                f"B={B}: mismatch, max abs err = {np.max(np.abs(o - r))}")
    print("KERNEL_OK")
</pallas_src>

<mosaic_0001>
module attributes {stable_mosaic.version = 11 : i64} {
  func.func @lenet_kernel(%arg0: i32, %arg1: memref<8x32x160xbf16, #tpu.memory_space<vmem>>, %arg2: memref<160x256xbf16, #tpu.memory_space<vmem>>, %arg3: memref<1x128xf32, #tpu.memory_space<vmem>>, %arg4: memref<640x256xbf16, #tpu.memory_space<vmem>>, %arg5: memref<1x128xf32, #tpu.memory_space<vmem>>, %arg6: memref<640x128xbf16, #tpu.memory_space<vmem>>, %arg7: memref<1x128xf32, #tpu.memory_space<vmem>>, %arg8: memref<128x128xbf16, #tpu.memory_space<vmem>>, %arg9: memref<1x128xf32, #tpu.memory_space<vmem>>, %arg10: memref<128x128xbf16, #tpu.memory_space<vmem>>, %arg11: memref<1x128xf32, #tpu.memory_space<vmem>>, %arg12: memref<8x128xf32, #tpu.memory_space<vmem>>) attributes {dimension_semantics = [#tpu.dimension_semantics<parallel>], iteration_bounds = array<i64: 1>, scalar_prefetch = 0 : i64, scratch_operands = 0 : i64, tpu.core_type = #tpu.core_type<tc>, window_params = [{transform_indices = @transform_0, window_bounds = array<i64: 8, 32, 160>}, {pipeline_mode = #tpu.pipeline_mode<synchronous>, transform_indices = @transform_1, window_bounds = array<i64: 160, 256>}, {pipeline_mode = #tpu.pipeline_mode<synchronous>, transform_indices = @transform_2, window_bounds = array<i64: 1, 128>}, {pipeline_mode = #tpu.pipeline_mode<synchronous>, transform_indices = @transform_3, window_bounds = array<i64: 640, 256>}, {pipeline_mode = #tpu.pipeline_mode<synchronous>, transform_indices = @transform_4, window_bounds = array<i64: 1, 128>}, {pipeline_mode = #tpu.pipeline_mode<synchronous>, transform_indices = @transform_5, window_bounds = array<i64: 640, 128>}, {pipeline_mode = #tpu.pipeline_mode<synchronous>, transform_indices = @transform_6, window_bounds = array<i64: 1, 128>}, {pipeline_mode = #tpu.pipeline_mode<synchronous>, transform_indices = @transform_7, window_bounds = array<i64: 128, 128>}, {pipeline_mode = #tpu.pipeline_mode<synchronous>, transform_indices = @transform_8, window_bounds = array<i64: 1, 128>}, {pipeline_mode = #tpu.pipeline_mode<synchronous>, transform_indices = @transform_9, window_bounds = array<i64: 128, 128>}, {pipeline_mode = #tpu.pipeline_mode<synchronous>, transform_indices = @transform_10, window_bounds = array<i64: 1, 128>}, {transform_indices = @transform_11, window_bounds = array<i64: 8, 128>}]} {
    %c0 = arith.constant 0 : index
    %c0_0 = arith.constant 0 : index
    %c0_1 = arith.constant 0 : index
    %0 = vector.load %arg1[%c0, %c0_0, %c0_1] : memref<8x32x160xbf16, #tpu.memory_space<vmem>>, vector<8x32x160xbf16>
    %1 = vector.shape_cast %0 : vector<8x32x160xbf16> to vector<256x160xbf16>
    %c0_2 = arith.constant 0 : index
    %c0_3 = arith.constant 0 : index
    %2 = vector.load %arg2[%c0_2, %c0_3] : memref<160x256xbf16, #tpu.memory_space<vmem>>, vector<160x256xbf16>
    %cst = arith.constant dense<0.000000e+00> : vector<256x256xf32>
    %3 = tpu.matmul %1, %2, %cst {dimension_numbers = #tpu.dot_dimension_numbers<[1], [0], [0], [1], [0, 0, 1, 1], [], []>} : vector<256x160xbf16>, vector<160x256xbf16>, vector<256x256xf32> -> vector<256x256xf32>
    %4 = vector.shape_cast %3 : vector<256x256xf32> to vector<8x4x8x256xf32>
    %c0_4 = arith.constant 0 : index
    %c0_5 = arith.constant 0 : index
    %5 = vector.load %arg3[%c0_4, %c0_5] : memref<1x128xf32, #tpu.memory_space<vmem>>, vector<1x128xf32>
    %6 = vector.extract_strided_slice %4 {offsets = [0, 0, 0, 0], sizes = [8, 1, 8, 256], strides = [1, 1, 1, 1]} : vector<8x4x8x256xf32> to vector<8x1x8x256xf32>
    %7 = vector.shape_cast %6 : vector<8x1x8x256xf32> to vector<8x8x256xf32>
    %8 = vector.extract_strided_slice %4 {offsets = [0, 1, 0, 0], sizes = [8, 1, 8, 256], strides = [1, 1, 1, 1]} : vector<8x4x8x256xf32> to vector<8x1x8x256xf32>
    %9 = vector.shape_cast %8 : vector<8x1x8x256xf32> to vector<8x8x256xf32>
    %10 = arith.maximumf %7, %9 : vector<8x8x256xf32>
    %11 = vector.extract_strided_slice %10 {offsets = [0, 0, 0], sizes = [8, 8, 128], strides = [1, 1, 1]} : vector<8x8x256xf32> to vector<8x8x128xf32>
    %12 = vector.extract_strided_slice %10 {offsets = [0, 0, 128], sizes = [8, 8, 128], strides = [1, 1, 1]} : vector<8x8x256xf32> to vector<8x8x128xf32>
    %13 = arith.maximumf %11, %12 : vector<8x8x128xf32>
    %14 = vector.shape_cast %5 : vector<1x128xf32> to vector<1x1x128xf32>
    %15 = vector.broadcast %14 : vector<1x1x128xf32> to vector<8x8x128xf32>
    %16 = arith.addf %13, %15 : vector<8x8x128xf32>
    %cst_6 = arith.constant 0.000000e+00 : f32
    %17 = vector.broadcast %cst_6 : f32 to vector<8x8x128xf32>
    %18 = arith.maximumf %16, %17 : vector<8x8x128xf32>
    %19 = vector.extract_strided_slice %4 {offsets = [0, 2, 0, 0], sizes = [8, 1, 8, 256], strides = [1, 1, 1, 1]} : vector<8x4x8x256xf32> to vector<8x1x8x256xf32>
    %20 = vector.shape_cast %19 : vector<8x1x8x256xf32> to vector<8x8x256xf32>
    %21 = vector.extract_strided_slice %4 {offsets = [0, 3, 0, 0], sizes = [8, 1, 8, 256], strides = [1, 1, 1, 1]} : vector<8x4x8x256xf32> to vector<8x1x8x256xf32>
    %22 = vector.shape_cast %21 : vector<8x1x8x256xf32> to vector<8x8x256xf32>
    %23 = arith.maximumf %20, %22 : vector<8x8x256xf32>
    %24 = vector.extract_strided_slice %23 {offsets = [0, 0, 0], sizes = [8, 8, 128], strides = [1, 1, 1]} : vector<8x8x256xf32> to vector<8x8x128xf32>
    %25 = vector.extract_strided_slice %23 {offsets = [0, 0, 128], sizes = [8, 8, 128], strides = [1, 1, 1]} : vector<8x8x256xf32> to vector<8x8x128xf32>
    %26 = arith.maximumf %24, %25 : vector<8x8x128xf32>
    %27 = vector.shape_cast %5 : vector<1x128xf32> to vector<1x1x128xf32>
    %28 = vector.broadcast %27 : vector<1x1x128xf32> to vector<8x8x128xf32>
    %29 = arith.addf %26, %28 : vector<8x8x128xf32>
    %cst_7 = arith.constant 0.000000e+00 : f32
    %30 = vector.broadcast %cst_7 : f32 to vector<8x8x128xf32>
    %31 = arith.maximumf %29, %30 : vector<8x8x128xf32>
    %cst_8 = arith.constant 0.000000e+00 : f32
    %32 = vector.broadcast %cst_8 : f32 to vector<8x8x128xf32>
    %33 = tpu.concatenate %18, %32 in 1 : vector<8x8x128xf32>, vector<8x8x128xf32> -> vector<8x16x128xf32>
    %34 = tpu.concatenate %31, %32 in 1 : vector<8x8x128xf32>, vector<8x8x128xf32> -> vector<8x16x128xf32>
    %c0_9 = arith.constant 0 : index
    %c0_10 = arith.constant 0 : index
    %35 = vector.load %arg4[%c0_9, %c0_10] : memref<640x256xbf16, #tpu.memory_space<vmem>>, vector<640x256xbf16>
    %36 = vector.extract_strided_slice %33 {offsets = [0, 0, 0], sizes = [8, 8, 128], strides = [1, 1, 1]} : vector<8x16x128xf32> to vector<8x8x128xf32>
    %37 = vector.extract_strided_slice %34 {offsets = [0, 0, 0], sizes = [8, 8, 128], strides = [1, 1, 1]} : vector<8x16x128xf32> to vector<8x8x128xf32>
    %38 = vector.extract_strided_slice %33 {offsets = [0, 1, 0], sizes = [8, 8, 128], strides = [1, 1, 1]} : vector<8x16x128xf32> to vector<8x8x128xf32>
    %39 = vector.extract_strided_slice %34 {offsets = [0, 1, 0], sizes = [8, 8, 128], strides = [1, 1, 1]} : vector<8x16x128xf32> to vector<8x8x128xf32>
    %40 = vector.extract_strided_slice %33 {offsets = [0, 2, 0], sizes = [8, 8, 128], strides = [1, 1, 1]} : vector<8x16x128xf32> to vector<8x8x128xf32>
    %41 = tpu.concatenate %36, %37, %38, %39, %40 in 2 : vector<8x8x128xf32>, vector<8x8x128xf32>, vector<8x8x128xf32>, vector<8x8x128xf32>, vector<8x8x128xf32> -> vector<8x8x640xf32>
    %42 = vector.shape_cast %41 : vector<8x8x640xf32> to vector<64x640xf32>
    %43 = arith.truncf %42 : vector<64x640xf32> to vector<64x640xbf16>
    %cst_11 = arith.constant dense<0.000000e+00> : vector<64x256xf32>
    %44 = tpu.matmul %43, %35, %cst_11 {dimension_numbers = #tpu.dot_dimension_numbers<[1], [0], [0], [1], [0, 0, 1, 1], [], []>} : vector<64x640xbf16>, vector<640x256xbf16>, vector<64x256xf32> -> vector<64x256xf32>
    %45 = vector.extract_strided_slice %34 {offsets = [0, 0, 0], sizes = [8, 8, 128], strides = [1, 1, 1]} : vector<8x16x128xf32> to vector<8x8x128xf32>
    %46 = vector.extract_strided_slice %33 {offsets = [0, 1, 0], sizes = [8, 8, 128], strides = [1, 1, 1]} : vector<8x16x128xf32> to vector<8x8x128xf32>
    %47 = vector.extract_strided_slice %34 {offsets = [0, 1, 0], sizes = [8, 8, 128], strides = [1, 1, 1]} : vector<8x16x128xf32> to vector<8x8x128xf32>
    %48 = vector.extract_strided_slice %33 {offsets = [0, 2, 0], sizes = [8, 8, 128], strides = [1, 1, 1]} : vector<8x16x128xf32> to vector<8x8x128xf32>
    %49 = vector.extract_strided_slice %34 {offsets = [0, 2, 0], sizes = [8, 8, 128], strides = [1, 1, 1]} : vector<8x16x128xf32> to vector<8x8x128xf32>
    %50 = tpu.concatenate %45, %46, %47, %48, %49 in 2 : vector<8x8x128xf32>, vector<8x8x128xf32>, vector<8x8x128xf32>, vector<8x8x128xf32>, vector<8x8x128xf32> -> vector<8x8x640xf32>
    %51 = vector.shape_cast %50 : vector<8x8x640xf32> to vector<64x640xf32>
    %52 = arith.truncf %51 : vector<64x640xf32> to vector<64x640xbf16>
    %cst_12 = arith.constant dense<0.000000e+00> : vector<64x256xf32>
    %53 = tpu.matmul %52, %35, %cst_12 {dimension_numbers = #tpu.dot_dimension_numbers<[1], [0], [0], [1], [0, 0, 1, 1], [], []>} : vector<64x640xbf16>, vector<640x256xbf16>, vector<64x256xf32> -> vector<64x256xf32>
    %54 = arith.maximumf %44, %53 : vector<64x256xf32>
    %55 = vector.extract_strided_slice %54 {offsets = [0, 0], sizes = [64, 128], strides = [1, 1]} : vector<64x256xf32> to vector<64x128xf32>
    %56 = vector.extract_strided_slice %54 {offsets = [0, 128], sizes = [64, 128], strides = [1, 1]} : vector<64x256xf32> to vector<64x128xf32>
    %57 = arith.maximumf %55, %56 : vector<64x128xf32>
    %c0_13 = arith.constant 0 : index
    %c0_14 = arith.constant 0 : index
    %58 = vector.load %arg5[%c0_13, %c0_14] : memref<1x128xf32, #tpu.memory_space<vmem>>, vector<1x128xf32>
    %59 = vector.broadcast %58 : vector<1x128xf32> to vector<64x128xf32>
    %60 = arith.addf %57, %59 : vector<64x128xf32>
    %cst_15 = arith.constant 0.000000e+00 : f32
    %61 = vector.broadcast %cst_15 : f32 to vector<64x128xf32>
    %62 = arith.maximumf %60, %61 : vector<64x128xf32>
    %63 = vector.shape_cast %62 : vector<64x128xf32> to vector<8x8x128xf32>
    %64 = vector.extract_strided_slice %63 {offsets = [0, 0, 0], sizes = [8, 1, 128], strides = [1, 1, 1]} : vector<8x8x128xf32> to vector<8x1x128xf32>
    %65 = vector.shape_cast %64 : vector<8x1x128xf32> to vector<8x128xf32>
    %66 = vector.extract_strided_slice %63 {offsets = [0, 1, 0], sizes = [8, 1, 128], strides = [1, 1, 1]} : vector<8x8x128xf32> to vector<8x1x128xf32>
    %67 = vector.shape_cast %66 : vector<8x1x128xf32> to vector<8x128xf32>
    %68 = vector.extract_strided_slice %63 {offsets = [0, 2, 0], sizes = [8, 1, 128], strides = [1, 1, 1]} : vector<8x8x128xf32> to vector<8x1x128xf32>
    %69 = vector.shape_cast %68 : vector<8x1x128xf32> to vector<8x128xf32>
    %70 = vector.extract_strided_slice %63 {offsets = [0, 3, 0], sizes = [8, 1, 128], strides = [1, 1, 1]} : vector<8x8x128xf32> to vector<8x1x128xf32>
    %71 = vector.shape_cast %70 : vector<8x1x128xf32> to vector<8x128xf32>
    %72 = vector.extract_strided_slice %63 {offsets = [0, 4, 0], sizes = [8, 1, 128], strides = [1, 1, 1]} : vector<8x8x128xf32> to vector<8x1x128xf32>
    %73 = vector.shape_cast %72 : vector<8x1x128xf32> to vector<8x128xf32>
    %74 = tpu.concatenate %65, %67, %69, %71, %73 in 1 : vector<8x128xf32>, vector<8x128xf32>, vector<8x128xf32>, vector<8x128xf32>, vector<8x128xf32> -> vector<8x640xf32>
    %75 = arith.truncf %74 : vector<8x640xf32> to vector<8x640xbf16>
    %c0_16 = arith.constant 0 : index
    %c0_17 = arith.constant 0 : index
    %76 = vector.load %arg6[%c0_16, %c0_17] : memref<640x128xbf16, #tpu.memory_space<vmem>>, vector<640x128xbf16>
    %cst_18 = arith.constant dense<0.000000e+00> : vector<8x128xf32>
    %77 = tpu.matmul %75, %76, %cst_18 {dimension_numbers = #tpu.dot_dimension_numbers<[1], [0], [0], [1], [0, 0, 1, 1], [], []>} : vector<8x640xbf16>, vector<640x128xbf16>, vector<8x128xf32> -> vector<8x128xf32>
    %c0_19 = arith.constant 0 : index
    %c0_20 = arith.constant 0 : index
    %78 = vector.load %arg7[%c0_19, %c0_20] : memref<1x128xf32, #tpu.memory_space<vmem>>, vector<1x128xf32>
    %79 = vector.broadcast %78 : vector<1x128xf32> to vector<8x128xf32>
    %80 = arith.addf %77, %79 : vector<8x128xf32>
    %cst_21 = arith.constant 0.000000e+00 : f32
    %81 = vector.broadcast %cst_21 : f32 to vector<8x128xf32>
    %82 = arith.maximumf %80, %81 : vector<8x128xf32>
    %83 = arith.truncf %82 : vector<8x128xf32> to vector<8x128xbf16>
    %c0_22 = arith.constant 0 : index
    %c0_23 = arith.constant 0 : index
    %84 = vector.load %arg8[%c0_22, %c0_23] : memref<128x128xbf16, #tpu.memory_space<vmem>>, vector<128x128xbf16>
    %cst_24 = arith.constant dense<0.000000e+00> : vector<8x128xf32>
    %85 = tpu.matmul %83, %84, %cst_24 {dimension_numbers = #tpu.dot_dimension_numbers<[1], [0], [0], [1], [0, 0, 1, 1], [], []>} : vector<8x128xbf16>, vector<128x128xbf16>, vector<8x128xf32> -> vector<8x128xf32>
    %c0_25 = arith.constant 0 : index
    %c0_26 = arith.constant 0 : index
    %86 = vector.load %arg9[%c0_25, %c0_26] : memref<1x128xf32, #tpu.memory_space<vmem>>, vector<1x128xf32>
    %87 = vector.broadcast %86 : vector<1x128xf32> to vector<8x128xf32>
    %88 = arith.addf %85, %87 : vector<8x128xf32>
    %cst_27 = arith.constant 0.000000e+00 : f32
    %89 = vector.broadcast %cst_27 : f32 to vector<8x128xf32>
    %90 = arith.maximumf %88, %89 : vector<8x128xf32>
    %91 = arith.truncf %90 : vector<8x128xf32> to vector<8x128xbf16>
    %c0_28 = arith.constant 0 : index
    %c0_29 = arith.constant 0 : index
    %92 = vector.load %arg10[%c0_28, %c0_29] : memref<128x128xbf16, #tpu.memory_space<vmem>>, vector<128x128xbf16>
    %cst_30 = arith.constant dense<0.000000e+00> : vector<8x128xf32>
    %93 = tpu.matmul %91, %92, %cst_30 {dimension_numbers = #tpu.dot_dimension_numbers<[1], [0], [0], [1], [0, 0, 1, 1], [], []>} : vector<8x128xbf16>, vector<128x128xbf16>, vector<8x128xf32> -> vector<8x128xf32>
    %c0_31 = arith.constant 0 : index
    %c0_32 = arith.constant 0 : index
    %94 = vector.load %arg11[%c0_31, %c0_32] : memref<1x128xf32, #tpu.memory_space<vmem>>, vector<1x128xf32>
    %95 = vector.broadcast %94 : vector<1x128xf32> to vector<8x128xf32>
    %96 = arith.addf %93, %95 : vector<8x128xf32>
    %c0_33 = arith.constant 0 : index
    %c0_34 = arith.constant 0 : index
    %97 = vector.load %arg12[%c0_33, %c0_34] : memref<8x128xf32, #tpu.memory_space<vmem>>, vector<8x128xf32>
    tpu.vector_store %arg12[%c0_33, %c0_34], %96 {strides = array<i32>} : memref<8x128xf32, #tpu.memory_space<vmem>>, vector<8x128xf32>,
    return
  }
  func.func @transform_0(%arg0: i32) -> (i32, i32, i32) {
    %c0_i32 = arith.constant 0 : i32
    %c0_i32_0 = arith.constant 0 : i32
    %c0_i32_1 = arith.constant 0 : i32
    return %arg0, %c0_i32, %c0_i32_0 : i32, i32, i32
  }
  func.func @transform_1(%arg0: i32) -> (i32, i32) {
    %c0_i32 = arith.constant 0 : i32
    %c0_i32_0 = arith.constant 0 : i32
    %c0_i32_1 = arith.constant 0 : i32
    return %c0_i32, %c0_i32_0 : i32, i32
  }
  func.func @transform_2(%arg0: i32) -> (i32, i32) {
    %c0_i32 = arith.constant 0 : i32
    %c0_i32_0 = arith.constant 0 : i32
    %c0_i32_1 = arith.constant 0 : i32
    return %c0_i32, %c0_i32_0 : i32, i32
  }
  func.func @transform_3(%arg0: i32) -> (i32, i32) {
    %c0_i32 = arith.constant 0 : i32
    %c0_i32_0 = arith.constant 0 : i32
    %c0_i32_1 = arith.constant 0 : i32
    return %c0_i32, %c0_i32_0 : i32, i32
  }
  func.func @transform_4(%arg0: i32) -> (i32, i32) {
    %c0_i32 = arith.constant 0 : i32
    %c0_i32_0 = arith.constant 0 : i32
    %c0_i32_1 = arith.constant 0 : i32
    return %c0_i32, %c0_i32_0 : i32, i32
  }
  func.func @transform_5(%arg0: i32) -> (i32, i32) {
    %c0_i32 = arith.constant 0 : i32
    %c0_i32_0 = arith.constant 0 : i32
    %c0_i32_1 = arith.constant 0 : i32
    return %c0_i32, %c0_i32_0 : i32, i32
  }
  func.func @transform_6(%arg0: i32) -> (i32, i32) {
    %c0_i32 = arith.constant 0 : i32
    %c0_i32_0 = arith.constant 0 : i32
    %c0_i32_1 = arith.constant 0 : i32
    return %c0_i32, %c0_i32_0 : i32, i32
  }
  func.func @transform_7(%arg0: i32) -> (i32, i32) {
    %c0_i32 = arith.constant 0 : i32
    %c0_i32_0 = arith.constant 0 : i32
    %c0_i32_1 = arith.constant 0 : i32
    return %c0_i32, %c0_i32_0 : i32, i32
  }
  func.func @transform_8(%arg0: i32) -> (i32, i32) {
    %c0_i32 = arith.constant 0 : i32
    %c0_i32_0 = arith.constant 0 : i32
    %c0_i32_1 = arith.constant 0 : i32
    return %c0_i32, %c0_i32_0 : i32, i32
  }
  func.func @transform_9(%arg0: i32) -> (i32, i32) {
    %c0_i32 = arith.constant 0 : i32
    %c0_i32_0 = arith.constant 0 : i32
    %c0_i32_1 = arith.constant 0 : i32
    return %c0_i32, %c0_i32_0 : i32, i32
  }
  func.func @transform_10(%arg0: i32) -> (i32, i32) {
    %c0_i32 = arith.constant 0 : i32
    %c0_i32_0 = arith.constant 0 : i32
    %c0_i32_1 = arith.constant 0 : i32
    return %c0_i32, %c0_i32_0 : i32, i32
  }
  func.func @transform_11(%arg0: i32) -> (i32, i32) {
    %c0_i32 = arith.constant 0 : i32
    %c0_i32_0 = arith.constant 0 : i32
    return %arg0, %c0_i32 : i32, i32
  }
}

</mosaic_0001>

<bundles_post_ra>
// kernel: tpu_custom_call.1
= control target key start
LH: loop header
LB: loop body
LE: loop exit
PB: predicated region body
PF: predicated region fallthrough
CT: control target
= control target key end

     0   :  { %16 = vsyncpa [#allocation3], 0  ;;  %s5114_s0 = inlined_call_operand.hbm [shape: bf16[8,32,160], index: 0, kind: input, shape index: {}]   ;;  %s5115_s1 = inlined_call_operand.hbm [shape: bf16[160,256], index: 1, kind: input, shape index: {}]   ;;  %s5116_s2 = inlined_call_operand.vmem [shape: f32[1,128], index: 2, kind: input, shape index: {}]   ;;  %s5117_s3 = inlined_call_operand.hbm [shape: bf16[640,256], index: 3, kind: input, shape index: {}]   ;;  %s5118_s4 = inlined_call_operand.vmem [shape: f32[1,128], index: 4, kind: input, shape index: {}]   ;;  %s5119_s5 = inlined_call_operand.hbm [shape: bf16[640,128], index: 5, kind: input, shape index: {}]   ;;  %s5120_s6 = inlined_call_operand.vmem [shape: f32[1,128], index: 6, kind: input, shape index: {}]   ;;  %s5121_s7 = inlined_call_operand.hbm [shape: bf16[128,128], index: 7, kind: input, shape index: {}]   ;;  %s5122_s8 = inlined_call_operand.vmem [shape: f32[1,128], index: 8, kind: input, shape index: {}]   ;;  %s5123_s9 = inlined_call_operand.hbm [shape: bf16[128,128], index: 9, kind: input, shape index: {}]   ;;  %s5124_s10 = inlined_call_operand.vmem [shape: f32[1,128], index: 10, kind: input, shape index: {}]   ;;  %s5125_s11 = inlined_call_operand.hbm [shape: f32[8,128], index: 11, kind: output, shape index: {}]  }
   0x1   :  { %17 = vsyncpa [#allocation6], 0 }
   0x2   :  { %18 = vsyncpa [#allocation9], 0 }
   0x3   :  { %19 = vsyncpa [#allocation12], 0 }
   0x4   :  { %20 = vsyncpa [#allocation4], 0  ;;  %s38_s19 = sshll.u32 %s5115_s1, 4  ;;  %s4003_s20 = smov [#allocation5]   ;;  %s39_s19 = int_to_ptr.hbm [resolvable:$true] %s38_s19 }
   0x5   :  { %s40_s21 = sshll.u32 %s4003_s20, 4  ;;  %s68_s24 = sshll.u32 %s5119_s5, 4  ;;  %s41_s21 = int_to_ptr.vmem [resolvable:$true] %s40_s21  ;;  %s69_s24 = int_to_ptr.hbm [resolvable:$true] %s68_s24 }
   0x6   :  { %s4004_s25 = smov 128   ;;  %s4005_s26 = smov 8  }
   0x7   :  { %46 = dma.hbm_to_vmem [thread:$0]  %s39_s19, 2560, %s41_s21, [#allocation6], %s4004_s25, %s4004_s25, %s4005_s26  }
   0x8   :  { %s4006_s27 = smov [#allocation8]   ;;  %s4007_s29 = smov 64  }
   0x9   :  { %s70_s28 = sshll.u32 %s4006_s27, 4  ;;  %s4008_s30 = smov 4   ;;  %s71_s28 = int_to_ptr.vmem [resolvable:$true] %s70_s28 }
   0xa   :  { %76 = dma.hbm_to_vmem [thread:$0]  %s69_s24, 5120, %s71_s28, [#allocation9], %s4007_s29, %s4007_s29, %s4008_s30  }
   0xb   :  { %s25_s13 = sshll.u32 %s5114_s0, 4  ;;  %s4009_s14 = smov [#allocation2]   ;;  %s26_s13 = int_to_ptr.hbm [resolvable:$true] %s25_s13 }
   0xc   :  { %s27_s15 = sshll.u32 %s4009_s14, 4  ;;  %s53_s17 = sshll.u32 %s5117_s3, 4  ;;  %s28_s15 = int_to_ptr.vmem [resolvable:$true] %s27_s15  ;;  %s54_s17 = int_to_ptr.hbm [resolvable:$true] %s53_s17 }
   0xd   :  { %33 = dma.hbm_to_vmem [thread:$0]  %s26_s13, 4096, %s28_s15, [#allocation3], %s4004_s25, %s4004_s25, %s4005_s26  }
   0xe   :  { %s4010_s18 = smov [#allocation7]   ;;  %s83_s22 = sshll.u32 %s5121_s7, 4  ;;  %s84_s22 = int_to_ptr.hbm [resolvable:$true] %s83_s22 }
   0xf   :  { %s55_s19 = sshll.u32 %s4010_s18, 4  ;;  %s98_s24 = sshll.u32 %s5123_s9, 4  ;;  %s56_s19 = int_to_ptr.vmem [resolvable:$true] %s55_s19  ;;  %s99_s24 = int_to_ptr.hbm [resolvable:$true] %s98_s24 }
  0x10   :  { %61 = dma.hbm_to_vmem [thread:$0]  %s54_s17, 10240, %s56_s19, [#allocation6], %s4004_s25, %s4004_s25, %s4005_s26  }
  0x11   :  { %s4011_s27 = smov [#allocation10]   ;;  %s4012_s3 = smov [#allocation11]  }
  0x12   :  { %s85_s28 = sshll.u32 %s4011_s27, 4  ;;  %s100_s12 = sshll.u32 %s4012_s3, 4  ;;  %s86_s28 = int_to_ptr.vmem [resolvable:$true] %s85_s28  ;;  %s101_s12 = int_to_ptr.vmem [resolvable:$true] %s100_s12 }
  0x13   :  { %91 = dma.hbm_to_vmem [thread:$0]  %s84_s22, 1024, %s86_s28, [#allocation9], %s4007_s29, %s4007_s29, %s4008_s30  }
  0x14   :  { %106 = dma.hbm_to_vmem [thread:$0]  %s99_s24, 1024, %s101_s12, [#allocation12], %s4007_s29, %s4007_s29, %s4008_s30  }
  0x15   :  { %3993 = dma.done.wait [#allocation3], 4096  }
  0x16   :  { %3994 = vsyncadd [#allocation3], 4294963200 }
  0x17   :  { %3995 = dma.done.wait [#allocation6], 12800  }
  0x18   :  { %3996 = vsyncadd [#allocation6], 4294954496 }
  0x19   :  { %3997 = dma.done.wait [#allocation9], 6144  }
  0x1a   :  { %3998 = vsyncadd [#allocation9], 4294961152 }
  0x1b   :  { %3999 = dma.done.wait [#allocation12], 1024  }
  0x1c   :  { %4000 = vsyncadd [#allocation12], 4294966272  ;;  %v3021_v0 = vld [vmem:[#allocation5 + $0x70] sm:$0xf]  ;;  %v3666_v1 = vld [vmem:[#allocation5 + $0x74] sm:$0xf0] }
  0x1d   :  { %v3037_v2 = vld [vmem:[#allocation5 + $0x90] sm:$0xf]  ;;  %v3022_v3 = vor.u32 %v3666_v1, %v3021_v0  ;;  %v3670_v4 = vld [vmem:[#allocation5 + $0x94] sm:$0xf0]  ;;  %v3665_v5 = vld [vmem:[#allocation5 + $0x74] sm:$0xf] }
  0x1e   :  { %v3023_v6 = vld [vmem:[#allocation5 + $0x78] sm:$0xf0]  ;;  %v3038_v7 = vor.u32 %v3670_v4, %v3037_v2  ;;  %v3669_v9 = vld [vmem:[#allocation5 + $0x94] sm:$0xf]  ;;  %v3013_v11 = vld [vmem:[#allocation5 + $0x60] sm:$0xf] }
  0x1f   :  { %v3026_v8 = vor.u32 %v3665_v5, %v3023_v6  ;;  %v3039_v10 = vld [vmem:[#allocation5 + $0x98] sm:$0xf0]  ;;  %479 = vmatpush.bf16.msra.mxu0 %v3022_v3  ;;  %v3664_v13 = vld [vmem:[#allocation5 + $0x64] sm:$0xf0]  ;;  %v3029_v14 = vld [vmem:[#allocation5 + $0x80] sm:$0xf] }
  0x20   :  { %v3042_v12 = vor.u32 %v3669_v9, %v3039_v10  ;;  %v3668_v15 = vld [vmem:[#allocation5 + $0x84] sm:$0xf0]  ;;  %574 = vmatpush.bf16.msra.mxu1 %v3038_v7  ;;  %v3014_v16 = vor.u32 %v3664_v13, %v3013_v11  ;;  %v3663_v18 = vld [vmem:[#allocation5 + $0x64] sm:$0xf]  ;;  %v3015_v19 = vld [vmem:[#allocation5 + $0x68] sm:$0xf0] }
  0x21   :  { %657 = vmatpush.bf16.msra.mxu2 %v3026_v8  ;;  %v3030_v17 = vor.u32 %v3668_v15, %v3029_v14  ;;  %v3667_v20 = vld [vmem:[#allocation5 + $0x84] sm:$0xf]  ;;  %v3018_v21 = vor.u32 %v3663_v18, %v3015_v19  ;;  %v3031_v22 = vld [vmem:[#allocation5 + $0x88] sm:$0xf0]  ;;  %v3005_v26 = vld [vmem:[#allocation5 + $0x50] sm:$0xf] }
  0x22   :  { %752 = vmatpush.bf16.msra.mxu3 %v3042_v12  ;;  %v3619_v23 = vld [vmem:[#allocation2 + $0x4] sm:$0xf]  ;;  %v2839_v24 = vld [vmem:[#allocation2 + $0x8] sm:$0xf0]  ;;  %v3034_v25 = vor.u32 %v3667_v20, %v3031_v22  ;;  %v3662_v27 = vld [vmem:[#allocation5 + $0x54] sm:$0xf0] }
  0x23   :  { %v3661_v28 = vld [vmem:[#allocation5 + $0x54] sm:$0xf]  ;;  %480 = vmatpush.bf16.msra.mxu0 %v3014_v16  ;;  %v2842_v29 = vor.u32 %v3619_v23, %v2839_v24  ;;  %v3006_v30 = vor.u32 %v3662_v27, %v3005_v26  ;;  %v3007_v31 = vld [vmem:[#allocation5 + $0x58] sm:$0xf0]  ;;  %vm430_vm0 = vcmask 261120   ;;  %vm1066_vm1 = vcmask 1045504  }
  0x24   :  { %575 = vmatpush.bf16.msra.mxu1 %v3030_v17  ;;  %v3010_v32 = vor.u32 %v3661_v28, %v3007_v31  ;;  %v2997_v33 = vld [vmem:[#allocation5 + $0x40] sm:$0xf]  ;;  %v3660_v34 = vld [vmem:[#allocation5 + $0x44] sm:$0xf0]  ;;  %v3659_v35 = vld [vmem:[#allocation5 + $0x44] sm:$0xf] }
  0x25   :  { %658 = vmatpush.bf16.msra.mxu2 %v3018_v21  ;;  %v2999_v36 = vld [vmem:[#allocation5 + $0x48] sm:$0xf0]  ;;  %v2998_v37 = vor.u32 %v3660_v34, %v2997_v33  ;;  %v2989_v39 = vld [vmem:[#allocation5 + $0x30] sm:$0xf]  ;;  %v3658_v40 = vld [vmem:[#allocation5 + $0x34] sm:$0xf0] }
  0x26   :  { %753 = vmatpush.bf16.msra.mxu3 %v3034_v25  ;;  %v3002_v38 = vor.u32 %v3659_v35, %v2999_v36  ;;  %v3657_v41 = vld [vmem:[#allocation5 + $0x34] sm:$0xf]  ;;  %v2991_v42 = vld [vmem:[#allocation5 + $0x38] sm:$0xf0]  ;;  %v2990_v43 = vor.u32 %v3658_v40, %v2989_v39  ;;  %v2981_v44 = vld [vmem:[#allocation5 + $0x20] sm:$0xf] }
  0x27   :  { %3043 = vmatmul.msk.bf16.vlgmr.msra.gmra.mxu1 %vm430_vm0, %v2842_v29  ;;  %481 = vmatpush.bf16.msra.mxu0 %v3006_v30  ;;  %v3656_v45 = vld [vmem:[#allocation5 + $0x24] sm:$0xf0]  ;;  %v2994_v46 = vor.u32 %v3657_v41, %v2991_v42  ;;  %v3655_v47 = vld [vmem:[#allocation5 + $0x24] sm:$0xf]  ;;  %v2983_v48 = vld [vmem:[#allocation5 + $0x28] sm:$0xf0] }
  0x28   :  { %v2982_v49 = vor.u32 %v3656_v45, %v2981_v44  ;;  %v3621_v50 = vld [vmem:[#allocation2 + $0x14] sm:$0xf]  ;;  %v2986_v51 = vor.u32 %v3655_v47, %v2983_v48  ;;  %v2847_v52 = vld [vmem:[#allocation2 + $0x18] sm:$0xf0]  ;;  %v2973_v53 = vld [vmem:[#allocation5 + $0x10] sm:$0xf] }
  0x29   :  { %3059 = vmatmul.msk.bf16.vlgmr.msra.gmra.mxu3 %vm430_vm0, %v2842_v29  ;;  %659 = vmatpush.bf16.msra.mxu2 %v3010_v32  ;;  %v3654_v54 = vld [vmem:[#allocation5 + $0x14] sm:$0xf0]  ;;  %v3653_v55 = vld [vmem:[#allocation5 + $0x14] sm:$0xf]  ;;  %v2975_v56 = vld [vmem:[#allocation5 + $0x18] sm:$0xf0]  ;;  %v2850_v57 = vor.u32 %v3621_v50, %v2847_v52 }
  0x2a   :  { %v2974_v58 = vor.u32 %v3654_v54, %v2973_v53  ;;  %v2978_v59 = vor.u32 %v3653_v55, %v2975_v56  ;;  %v2965_v60 = vld [vmem:[#allocation5] sm:$0xf]  ;;  %v3652_v61 = vld [vmem:[#allocation5 + $0x4] sm:$0xf0]  ;;  %v3651_v62 = vld [vmem:[#allocation5 + $0x4] sm:$0xf] }
  0x2b   :  { %482 = vmatpush.bf16.msra.mxu0 %v2998_v37  ;;  %v2967_v63 = vld [vmem:[#allocation5 + $0x8] sm:$0xf0]  ;;  %v2966_v0 = vor.u32 %v3652_v61, %v2965_v60  ;;  %v2837_v1 = vld [vmem:[#allocation2] sm:$0xf]  ;;  %v3620_v2 = vld [vmem:[#allocation2 + $0x4] sm:$0xf0] }
  0x2c   :  { %v2970_v3 = vor.u32 %v3651_v62, %v2967_v63  ;;  %v2838_v4 = vor.u32 %v3620_v2, %v2837_v1  ;;  %v3623_v5 = vld [vmem:[#allocation2 + $0x24] sm:$0xf]  ;;  %v2855_v6 = vld [vmem:[#allocation2 + $0x28] sm:$0xf0]  ;;  %v2845_v8 = vld [vmem:[#allocation2 + $0x10] sm:$0xf] }
  0x2d   :  { %660 = vmatpush.bf16.msra.mxu2 %v3002_v38  ;;  %v2858_v7 = vor.u32 %v3623_v5, %v2855_v6  ;;  %v3622_v9 = vld [vmem:[#allocation2 + $0x14] sm:$0xf0]  ;;  %v3625_v11 = vld [vmem:[#allocation2 + $0x34] sm:$0xf]  ;;  %v2863_v12 = vld [vmem:[#allocation2 + $0x38] sm:$0xf0] }
  0x2e   :  { %v2846_v10 = vor.u32 %v3622_v9, %v2845_v8  ;;  %v2866_v13 = vor.u32 %v3625_v11, %v2863_v12  ;;  %v2853_v14 = vld [vmem:[#allocation2 + $0x20] sm:$0xf]  ;;  %v3624_v15 = vld [vmem:[#allocation2 + $0x24] sm:$0xf0]  ;;  %v3627_v17 = vld [vmem:[#allocation2 + $0x44] sm:$0xf] }
  0x2f   :  { %483 = vmatpush.bf16.msra.mxu0 %v2990_v43  ;;  %v2854_v16 = vor.u32 %v3624_v15, %v2853_v14  ;;  %v2871_v18 = vld [vmem:[#allocation2 + $0x48] sm:$0xf0]  ;;  %v2861_v20 = vld [vmem:[#allocation2 + $0x30] sm:$0xf]  ;;  %v3626_v21 = vld [vmem:[#allocation2 + $0x34] sm:$0xf0] }
  0x30   :  { %v2874_v19 = vor.u32 %v3627_v17, %v2871_v18  ;;  %v2862_v22 = vor.u32 %v3626_v21, %v2861_v20  ;;  %v3629_v23 = vld [vmem:[#allocation2 + $0x54] sm:$0xf]  ;;  %v2879_v24 = vld [vmem:[#allocation2 + $0x58] sm:$0xf0]  ;;  %v2869_v26 = vld [vmem:[#allocation2 + $0x40] sm:$0xf] }
  0x31   :  { %661 = vmatpush.bf16.msra.mxu2 %v2994_v46  ;;  %v2882_v25 = vor.u32 %v3629_v23, %v2879_v24  ;;  %v3628_v27 = vld [vmem:[#allocation2 + $0x44] sm:$0xf0]  ;;  %v3197_v28 = vld [vmem:[#allocation7 + $0xf0] sm:$0xf]  ;;  %v3702_v29 = vld [vmem:[#allocation7 + $0xf4] sm:$0xf0] }
  0x32   :  { %v3133_v30 = vld [vmem:[#allocation7 + $0x70] sm:$0xf]  ;;  %v4105_v31 = vor.u32 %v3702_v29, %v3197_v28  ;;  %v3686_v32 = vld [vmem:[#allocation7 + $0x74] sm:$0xf0]  ;;  %v2870_v35 = vor.u32 %v3628_v27, %v2869_v26  ;;  %v3631_v40 = vld [vmem:[#allocation2 + $0x64] sm:$0xf] }
  0x33   :  { %484 = vmatpush.bf16.msra.mxu0 %v2982_v49  ;;  %v3325_v33 = vld [vmem:[#allocation7 + $0x1f0] sm:$0xf]  ;;  %v3734_v34 = vld [vmem:[#allocation7 + $0x1f4] sm:$0xf0]  ;;  %v4107_v36 = vor.u32 %v3686_v32, %v3133_v30  ;;  %v2887_v41 = vld [vmem:[#allocation2 + $0x68] sm:$0xf0] }
  0x34   :  { %v4109_v37 = vor.u32 %v3734_v34, %v3325_v33  ;;  %1541 = vmatpush.bf16.msrb.mxu3 %v4105_v31  ;;  %v3261_v38 = vld [vmem:[#allocation7 + $0x170] sm:$0xf]  ;;  %v3718_v39 = vld [vmem:[#allocation7 + $0x174] sm:$0xf0]  ;;  %v2890_v43 = vor.u32 %v3631_v40, %v2887_v41  ;;  %v3633_v47 = vld [vmem:[#allocation2 + $0x74] sm:$0xf] }
  0x35   :  { %662 = vmatpush.bf16.msra.mxu2 %v2986_v51  ;;  %1512 = vmatpush.bf16.msrb.mxu1 %v4107_v36  ;;  %v4114_v42 = vor.u32 %v3718_v39, %v3261_v38  ;;  %v2877_v44 = vld [vmem:[#allocation2 + $0x50] sm:$0xf]  ;;  %v3630_v45 = vld [vmem:[#allocation2 + $0x54] sm:$0xf0]  ;;  %v2895_v48 = vld [vmem:[#allocation2 + $0x78] sm:$0xf0] }
  0x36   :  { %5185 = vst [vmem:[#allocation19_spill] sm:$0xff] %v4109_v37  ;;  %v2878_v46 = vor.u32 %v3630_v45, %v2877_v44  ;;  %v2898_v49 = vor.u32 %v3633_v47, %v2895_v48  ;;  %v2885_v50 = vld [vmem:[#allocation2 + $0x60] sm:$0xf]  ;;  %v3632_v51 = vld [vmem:[#allocation2 + $0x64] sm:$0xf0]  ;;  %vm1008_vm2 = vcmask 1046528  }
  0x37   :  { %3044 = vmatmul.msk.bf16.gmra.mxu1 %vm430_vm0, %v2850_v57  ;;  %485 = vmatpush.bf16.msra.mxu0 %v2974_v58  ;;  %5186 = vst [vmem:[#allocation20_spill] sm:$0xff] %v4114_v42  ;;  %v3189_v52 = vld [vmem:[#allocation7 + $0xe0] sm:$0xf]  ;;  %v3700_v53 = vld [vmem:[#allocation7 + $0xe4] sm:$0xf0]  ;;  %v2886_v55 = vor.u32 %v3632_v51, %v2885_v50  ;;  %vm2173_vm3 = vcmask 1041409  }
  0x38   :  { %v4121_v54 = vor.u32 %v3700_v53, %v3189_v52  ;;  %v3125_v56 = vld [vmem:[#allocation7 + $0x60] sm:$0xf]  ;;  %v3732_v60 = vld [vmem:[#allocation7 + $0x1e4] sm:$0xf0]  ;;  %v2903_v1 = vld [vmem:[#allocation2 + $0x88] sm:$0xf0] }
  0x39   :  { %3060 = vmatmul.msk.bf16.gmra.mxu3 %vm430_vm0, %v2850_v57  ;;  %663 = vmatpush.bf16.msra.mxu2 %v2978_v59  ;;  %v3684_v57 = vld [vmem:[#allocation7 + $0x64] sm:$0xf0]  ;;  %v3317_v58 = vld [vmem:[#allocation7 + $0x1e0] sm:$0xf]  ;;  %v2893_v5 = vld [vmem:[#allocation2 + $0x70] sm:$0xf] }
  0x3a   :  { %1542 = vmatpush.bf16.msrb.mxu3 %v4121_v54  ;;  %v4124_v59 = vor.u32 %v3684_v57, %v3125_v56  ;;  %v4126_v61 = vor.u32 %v3732_v60, %v3317_v58  ;;  %v3253_v62 = vld [vmem:[#allocation7 + $0x160] sm:$0xf]  ;;  %v3716_v63 = vld [vmem:[#allocation7 + $0x164] sm:$0xf0]  ;;  %v3634_v6 = vld [vmem:[#allocation2 + $0x74] sm:$0xf0] }
  0x3b   :  { %486 = vmatpush.bf16.msra.mxu0 %v2966_v0  ;;  %v3635_v0 = vld [vmem:[#allocation2 + $0x84] sm:$0xf]  ;;  %v4130_v2 = vor.u32 %v3716_v63, %v3253_v62  ;;  %v2911_v11 = vld [vmem:[#allocation2 + $0x98] sm:$0xf0]  ;;  %v2901_v15 = vld [vmem:[#allocation2 + $0x80] sm:$0xf] }
  0x3c   :  { %5187 = vst [vmem:[#allocation21_spill] sm:$0xff] %v4126_v61  ;;  %1513 = vmatpush.bf16.msrb.mxu1 %v4124_v59  ;;  %v3181_v17 = vld [vmem:[#allocation7 + $0xd0] sm:$0xf]  ;;  %v3698_v18 = vld [vmem:[#allocation7 + $0xd4] sm:$0xf0]  ;;  %vm2176_vm4 = vcmask 1042434  }
  0x3d   :  { %664 = vmatpush.bf16.msra.mxu2 %v2970_v3  ;;  %5188 = vst [vmem:[#allocation22_spill] sm:$0xff] %v4130_v2  ;;  %v2906_v3 = vor.u32 %v3635_v0, %v2903_v1  ;;  %v2919_v26 = vld [vmem:[#allocation2 + $0xa8] sm:$0xf0]  ;;  %v3682_v38 = vld [vmem:[#allocation7 + $0x54] sm:$0xf0]  ;;  %vm2179_vm5 = vcmask 1043459  }
  0x3e   :  { %487 = vmatmul.bf16.vlgmr.msra.gmra.mxu0 %v2838_v4  ;;  %v3309_v39 = vld [vmem:[#allocation7 + $0x1d0] sm:$0xf]  ;;  %v3714_v45 = vld [vmem:[#allocation7 + $0x154] sm:$0xf0]  ;;  %v3641_v62 = vld [vmem:[#allocation2 + $0xb4] sm:$0xf] }
  0x3f   :  { %1570 = vmatpush.bf16.msrb.mxu0 %v4114_v42  ;;  %v3245_v44 = vld [vmem:[#allocation7 + $0x150] sm:$0xf]  ;;  %v3638_v47 = vld [vmem:[#allocation2 + $0x94] sm:$0xf0]  ;;  %v2927_v63 = vld [vmem:[#allocation2 + $0xb8] sm:$0xf0] }
  0x40   :  { %665 = vmatmul.bf16.vlgmr.msra.gmra.mxu2 %v2838_v4  ;;  %vm2182_vm6 = vcmask 1044484   ;;  %vm2185_vm7 = vcmask 1045509   ;;  %vm2188_vm8 = vcmask 1046534   ;;  %vm2191_vm9 = vcmask 1047559   ;;  %s4014_s15 = smov [#allocation13]   ;;  %s2822_s18 = sshll.u32 %s5125_s11, 4  ;;  %s2823_s18 = int_to_ptr.hbm [resolvable:$true] %s2822_s18 }
  0x41   :  { %1599 = vmatpush.bf16.msrb.mxu2 %v4109_v37  ;;  %s2820_s16 = sshll.u32 %s4014_s15, 4  ;;  %s2821_s16 = int_to_ptr.vmem [resolvable:$true] %s2820_s16 }
  0x43   :  { %1571 = vmatpush.bf16.msrb.mxu0 %v4130_v2 }
  0x45   :  { %1600 = vmatpush.bf16.msrb.mxu2 %v4126_v61 }
  0x47   :  { %3045 = vmatmul.msk.bf16.gmra.mxu1 %vm430_vm0, %v2858_v7 }
  0x49   :  { %3061 = vmatmul.msk.bf16.gmra.mxu3 %vm430_vm0, %v2858_v7  ;;  %v2894_v7 = vor.u32 %v3634_v6, %v2893_v5  ;;  %v2930_v5 = vor.u32 %v3641_v62, %v2927_v63 }
  0x4e   :  { %492 = vmatmul.bf16.gmra.mxu0 %v2846_v10 }
  0x50   :  { %670 = vmatmul.bf16.gmra.mxu2 %v2846_v10  ;;  %v3637_v10 = vld [vmem:[#allocation2 + $0x94] sm:$0xf] }
  0x57   :  { %3046 = vmatmul.msk.bf16.gmra.mxu1 %vm430_vm0, %v2866_v13 }
  0x59   :  { %3062 = vmatmul.msk.bf16.gmra.mxu3 %vm430_vm0, %v2866_v13  ;;  %v2914_v13 = vor.u32 %v3637_v10, %v2911_v11  ;;  %v3640_v10 = vld [vmem:[#allocation2 + $0xa4] sm:$0xf0]  ;;  %v3173_v11 = vld [vmem:[#allocation7 + $0xc0] sm:$0xf] }
  0x5e   :  { %497 = vmatmul.bf16.gmra.mxu0 %v2854_v16 }
  0x60   :  { %675 = vmatmul.bf16.gmra.mxu2 %v2854_v16  ;;  %v3636_v16 = vld [vmem:[#allocation2 + $0x84] sm:$0xf0] }
  0x61   :  { %v2902_v20 = vor.u32 %v3636_v16, %v2901_v15 }
  0x67   :  { %3047 = vmatmul.msk.bf16.gmra.mxu1 %vm430_vm0, %v2874_v19 }
  0x69   :  { %3063 = vmatmul.msk.bf16.gmra.mxu3 %vm430_vm0, %v2874_v19  ;;  %v4137_v19 = vor.u32 %v3698_v18, %v3181_v17 }
  0x6b   :  { %1543 = vmatpush.bf16.msrb.mxu3 %v4137_v19 }
  0x6e   :  { %502 = vmatmul.bf16.gmra.mxu0 %v2862_v22 }
  0x70   :  { %680 = vmatmul.bf16.gmra.mxu2 %v2862_v22 }
  0x77   :  { %3048 = vmatmul.msk.bf16.gmra.mxu1 %vm430_vm0, %v2882_v25 }
  0x79   :  { %3064 = vmatmul.msk.bf16.gmra.mxu3 %vm430_vm0, %v2882_v25  ;;  %v3639_v25 = vld [vmem:[#allocation2 + $0xa4] sm:$0xf] }
  0x7a   :  { %v2922_v32 = vor.u32 %v3639_v25, %v2919_v26 }
  0x7e   :  { %507 = vmatmul.bf16.gmra.mxu0 %v2870_v35 }
  0x80   :  { %685 = vmatmul.bf16.gmra.mxu2 %v2870_v35  ;;  %v3117_v35 = vld [vmem:[#allocation7 + $0x50] sm:$0xf] }
  0x81   :  { %v4142_v41 = vor.u32 %v3682_v38, %v3117_v35  ;;  %v3301_v38 = vld [vmem:[#allocation7 + $0x1c0] sm:$0xf] }
  0x83   :  { %1514 = vmatpush.bf16.msrb.mxu1 %v4142_v41 }
  0x87   :  { %3049 = vmatmul.msk.bf16.gmra.mxu1 %vm430_vm0, %v2890_v43 }
  0x89   :  { %3065 = vmatmul.msk.bf16.gmra.mxu3 %vm430_vm0, %v2890_v43  ;;  %v3730_v43 = vld [vmem:[#allocation7 + $0x1d4] sm:$0xf0] }
  0x8a   :  { %v4145_v48 = vor.u32 %v3730_v43, %v3309_v39  ;;  %v3728_v39 = vld [vmem:[#allocation7 + $0x1c4] sm:$0xf0]  ;;  %v2925_v43 = vld [vmem:[#allocation2 + $0xb0] sm:$0xf] }
  0x8c   :  { %5189 = vst [vmem:[#allocation23_spill] sm:$0xff] %v4145_v48  ;;  %1601 = vmatpush.bf16.msrb.mxu2 %v4145_v48  ;;  %v3648_v48 = vld [vmem:[#allocation2 + $0xe4] sm:$0xf0] }
  0x8e   :  { %512 = vmatmul.bf16.gmra.mxu0 %v2878_v46 }
  0x90   :  { %690 = vmatmul.bf16.gmra.mxu2 %v2878_v46  ;;  %v2909_v46 = vld [vmem:[#allocation2 + $0x90] sm:$0xf] }
  0x91   :  { %v2910_v51 = vor.u32 %v3638_v47, %v2909_v46  ;;  %v3712_v46 = vld [vmem:[#allocation7 + $0x144] sm:$0xf0] }
  0x97   :  { %3050 = vmatmul.msk.bf16.gmra.mxu1 %vm430_vm0, %v2898_v49 }
  0x99   :  { %3066 = vmatmul.msk.bf16.gmra.mxu3 %vm430_vm0, %v2898_v49  ;;  %v4147_v49 = vor.u32 %v3714_v45, %v3245_v44  ;;  %v3642_v44 = vld [vmem:[#allocation2 + $0xb4] sm:$0xf0]  ;;  %v4180_v45 = vor.u32 %v3728_v39, %v3301_v38 }
  0x9b   :  { %5190 = vst [vmem:[#allocation24_spill] sm:$0xff] %v4147_v49  ;;  %1572 = vmatpush.bf16.msrb.mxu0 %v4147_v49  ;;  %1602 = vmatpush.bf16.msrb.mxu2 %v4180_v45 }
  0x9c   :  { %5191 = vst [vmem:[#allocation25_spill] sm:$0xff] %v4180_v45  ;;  %v2949_v45 = vld [vmem:[#allocation2 + $0xe0] sm:$0xf] }
  0x9e   :  { %517 = vmatmul.bf16.gmra.mxu0 %v2886_v55 }
  0xa0   :  { %695 = vmatmul.bf16.gmra.mxu2 %v2886_v55 }
  0xa4   :  { %v577_v4 = vpop.f32.mrf.mxu1 }
  0xa7   :  { %3051 = vmatmul.msk.bf16.gmra.mxu1 %vm430_vm0, %v2906_v3 }
  0xa9   :  { %3067 = vmatmul.msk.bf16.gmra.mxu3 %vm430_vm0, %v2906_v3 }
  0xac   :  { %v755_v8 = vpop.f32.mrf.mxu3  ;;  %v579_v9 = vpop.f32.mrf.mxu1 }
  0xae   :  { %522 = vmatmul.bf16.gmra.mxu0 %v2894_v7 }
  0xb0   :  { %700 = vmatmul.bf16.gmra.mxu2 %v2894_v7 }
  0xb4   :  { %v757_v12 = vpop.f32.mrf.mxu3  ;;  %v582_v14 = vpop.f32.mrf.mxu1 }
  0xb7   :  { %3052 = vmatmul.msk.bf16.gmra.mxu1 %vm430_vm0, %v2914_v13 }
  0xb9   :  { %3068 = vmatmul.msk.bf16.gmra.mxu3 %vm430_vm0, %v2914_v13 }
  0xbb   :  { %v488_v22 = vpop.f32.mrf.mxu0 }
  0xbc   :  { %v760_v21 = vpop.f32.mrf.mxu3  ;;  %v578_v23 = vadd.f32 %v577_v4, %v488_v22  ;;  %v584_v24 = vpop.f32.mrf.mxu1 }
  0xbe   :  { %527 = vmatmul.bf16.gmra.mxu0 %v2902_v20 }
  0xc0   :  { %705 = vmatmul.bf16.gmra.mxu2 %v2902_v20 }
  0xc3   :  { %v666_v27 = vpop.f32.mrf.mxu2  ;;  %v490_v30 = vpop.f32.mrf.mxu0 }
  0xc4   :  { %v756_v28 = vadd.f32 %v755_v8, %v666_v27  ;;  %v762_v29 = vpop.f32.mrf.mxu3  ;;  %v580_v33 = vadd.f32 %v579_v9, %v490_v30  ;;  %v4140_v34 = vpop.f32.mrf.mxu1  ;;  %v2917_v9 = vld [vmem:[#allocation2 + $0xa0] sm:$0xf] }
  0xc5   :  { %v2918_v15 = vor.u32 %v3640_v10, %v2917_v9  ;;  %v4175_v30 = vld [vmem:[%s5116_s2] ss:$0 sm:$0xff]  ;;  %v2943_v9 = vld [vmem:[#allocation2 + $0xd8] sm:$0xf0] }
  0xc6   :  { %v836_v40 = vmax.f32 %v578_v23, %v580_v33  ;;  %v3643_v23 = vld [vmem:[#allocation2 + $0xc4] sm:$0xf]  ;;  %v3680_v33 = vld [vmem:[#allocation7 + $0x44] sm:$0xf0] }
  0xc7   :  { %3053 = vmatmul.msk.bf16.gmra.mxu1 %vm430_vm0, %v2922_v32 }
  0xc9   :  { %3069 = vmatmul.msk.bf16.gmra.mxu3 %vm430_vm0, %v2922_v32  ;;  %v3109_v32 = vld [vmem:[#allocation7 + $0x40] sm:$0xf] }
  0xca   :  { %v4177_v35 = vor.u32 %v3680_v33, %v3109_v32  ;;  %v3678_v32 = vld [vmem:[#allocation7 + $0x34] sm:$0xf0] }
  0xcb   :  { %v668_v50 = vpop.f32.mrf.mxu2  ;;  %v493_v55 = vpop.f32.mrf.mxu0 }
  0xcc   :  { %v758_v52 = vadd.f32 %v757_v12, %v668_v50  ;;  %v4153_v53 = vpop.f32.mrf.mxu3  ;;  %v583_v56 = vadd.f32 %v582_v14, %v493_v55  ;;  %v589_v57 = vpop.f32.mrf.mxu1  ;;  %v3696_v12 = vld [vmem:[#allocation7 + $0xc4] sm:$0xf0]  ;;  %1515 = vmatpush.bf16.msrb.mxu1 %v4177_v35 }
  0xcd   :  { %v4159_v13 = vor.u32 %v3696_v12, %v3173_v11 }
  0xce   :  { %v837_v58 = vmax.f32 %v756_v28, %v758_v52  ;;  %532 = vmatmul.bf16.gmra.mxu0 %v2910_v51  ;;  %v2926_v52 = vor.u32 %v3642_v44, %v2925_v43 }
  0xcf   :  { %1544 = vmatpush.bf16.msrb.mxu3 %v4159_v13 }
  0xd0   :  { %v852_v60 = vmax.f32 %v836_v40, %v837_v58  ;;  %710 = vmatmul.bf16.gmra.mxu2 %v2910_v51  ;;  %v3237_v40 = vld [vmem:[#allocation7 + $0x140] sm:$0xf] }
  0xd1   :  { %v4184_v47 = vor.u32 %v3712_v46, %v3237_v40 }
  0xd2   :  { %v863_v55 = vadd.f32 %v4175_v30, %v852_v60 }
  0xd3   :  { %v671_v0 = vpop.f32.mrf.mxu2  ;;  %v495_v4 = vpop.f32.mrf.mxu0  ;;  %5192 = vst [vmem:[#allocation26_spill] sm:$0xff] %v4184_v47  ;;  %1573 = vmatpush.bf16.msrb.mxu0 %v4184_v47 }
  0xd4   :  { %v761_v1 = vadd.f32 %v760_v21, %v671_v0  ;;  %v767_v3 = vpop.f32.mrf.mxu3  ;;  %v585_v6 = vadd.f32 %v584_v24, %v495_v4  ;;  %v4155_v7 = vpop.f32.mrf.mxu1  ;;  %v2935_v24 = vld [vmem:[#allocation2 + $0xc8] sm:$0xf0] }
  0xd5   :  { %v2938_v28 = vor.u32 %v3643_v23, %v2935_v24  ;;  %v3694_v23 = vld [vmem:[#allocation7 + $0xb4] sm:$0xf0]  ;;  %v3101_v24 = vld [vmem:[#allocation7 + $0x30] sm:$0xf] }
  0xd6   :  { %v879_v8 = vmax.f32 %v583_v56, %v585_v6  ;;  %v4217_v39 = vor.u32 %v3678_v32, %v3101_v24  ;;  %v3141_v32 = vld [vmem:[#allocation7 + $0x80] sm:$0xf] }
  0xd7   :  { %3054 = vmatmul.msk.bf16.gmra.mxu1 %vm430_vm0, %v2930_v5 }
  0xd8   :  { %1516 = vmatpush.bf16.msrb.mxu1 %v4217_v39 }
  0xd9   :  { %3070 = vmatmul.msk.bf16.gmra.mxu3 %vm430_vm0, %v2930_v5  ;;  %v4195_v5 = vmax.f32 %v863_v55, 0.0  ;;  %v3157_v55 = vld [vmem:[#allocation7 + $0xa0] sm:$0xf] }
  0xdb   :  { %v673_v14 = vpop.f32.mrf.mxu2  ;;  %v498_v18 = vpop.f32.mrf.mxu0 }
  0xdc   :  { %v763_v16 = vadd.f32 %v762_v29, %v673_v14  ;;  %v4161_v17 = vpop.f32.mrf.mxu3  ;;  %v4164_v20 = vpop.f32.mrf.mxu1  ;;  %v588_v56 = vadd.f32 %v4140_v34, %v498_v18  ;;  %v5126_v14 = vmov 0.0  }
  0xde   :  { %v880_v21 = vmax.f32 %v761_v1, %v763_v16  ;;  %537 = vmatmul.bf16.gmra.mxu0 %v2918_v15 }
  0xe0   :  { %v4166_v22 = vmax.f32 %v879_v8, %v880_v21  ;;  %715 = vmatmul.bf16.gmra.mxu2 %v2918_v15  ;;  %v3645_v8 = vld [vmem:[#allocation2 + $0xd4] sm:$0xf]  ;;  %v4204_v15 = vrot.slane %v5126_v14, 2  ;;  %v3165_v21 = vld [vmem:[#allocation7 + $0xb0] sm:$0xf] }
  0xe1   :  { %v2946_v12 = vor.u32 %v3645_v8, %v2943_v9 }
  0xe2   :  { %v903_v44 = vadd.f32 %v4175_v30, %v4166_v22  ;;  %v3692_v22 = vld [vmem:[#allocation7 + $0xa4] sm:$0xf0] }
  0xe3   :  { %v676_v25 = vpop.f32.mrf.mxu2  ;;  %v500_v27 = vpop.f32.mrf.mxu0  ;;  %v4237_v8 = vor.u32 %v3692_v22, %v3157_v55 }
  0xe4   :  { %v4168_v26 = vpop.f32.mrf.mxu3  ;;  %v4170_v29 = vpop.f32.mrf.mxu1  ;;  %v590_v50 = vadd.f32 %v589_v57, %v500_v27  ;;  %v766_v58 = vadd.f32 %v4153_v53, %v676_v25  ;;  %v1067_v53 = vrot.slane %v4195_v5, 2  ;;  %v2933_v25 = vld [vmem:[#allocation2 + $0xc0] sm:$0xf]  ;;  %v3644_v27 = vld [vmem:[#allocation2 + $0xc4] sm:$0xf0] }
  0xe6   :  { %v838_v4 = vmax.f32 %v588_v56, %v590_v50  ;;  %v1069_v33 = vsel %vm1066_vm1, %v1067_v53, %v4204_v15  ;;  %v2934_v50 = vor.u32 %v3644_v27, %v2933_v25  ;;  %v3077_v25 = vld [vmem:[#allocation7] sm:$0xf]  ;;  %v3672_v27 = vld [vmem:[#allocation7 + $0x4] sm:$0xf0] }
  0xe7   :  { %3055 = vmatmul.msk.bf16.gmra.mxu1 %vm430_vm0, %v2938_v28 }
  0xe9   :  { %3071 = vmatmul.msk.bf16.gmra.mxu3 %vm430_vm0, %v2938_v28  ;;  %v4210_v28 = vor.u32 %v3694_v23, %v3165_v21 }
  0xeb   :  { %v678_v51 = vpop.f32.mrf.mxu2  ;;  %v503_v0 = vpop.f32.mrf.mxu0  ;;  %1545 = vmatpush.bf16.msrb.mxu3 %v4210_v28 }
  0xec   :  { %v768_v62 = vadd.f32 %v767_v3, %v678_v51  ;;  %v4191_v63 = vpop.f32.mrf.mxu3  ;;  %v4193_v1 = vpop.f32.mrf.mxu1  ;;  %v3093_v51 = vld [vmem:[#allocation7 + $0x20] sm:$0xf]  ;;  %v593_v56 = vadd.f32 %v4155_v7, %v503_v0  ;;  %v3085_v7 = vld [vmem:[#allocation7 + $0x10] sm:$0xf] }
  0xed   :  { %v3149_v0 = vld [vmem:[#allocation7 + $0x90] sm:$0xf] }
  0xee   :  { %v839_v57 = vmax.f32 %v766_v58, %v768_v62  ;;  %542 = vmatmul.bf16.gmra.mxu0 %v2926_v52 }
  0xef   :  { %1546 = vmatpush.bf16.msrb.mxu3 %v4237_v8 }
  0xf0   :  { %v853_v6 = vmax.f32 %v838_v4, %v839_v57  ;;  %720 = vmatmul.bf16.gmra.mxu2 %v2926_v52  ;;  %v3676_v52 = vld [vmem:[#allocation7 + $0x24] sm:$0xf0] }
  0xf1   :  { %v4233_v57 = vor.u32 %v3676_v52, %v3093_v51  ;;  %v3688_v51 = vld [vmem:[#allocation7 + $0x84] sm:$0xf0] }
  0xf2   :  { %v864_v60 = vadd.f32 %v4175_v30, %v853_v6  ;;  %v4263_v55 = vor.u32 %v3688_v51, %v3141_v32  ;;  %v2959_v51 = vld [vmem:[#allocation2 + $0xf8] sm:$0xf0] }
  0xf3   :  { %v681_v34 = vpop.f32.mrf.mxu2  ;;  %v505_v11 = vpop.f32.mrf.mxu0  ;;  %1517 = vmatpush.bf16.msrb.mxu1 %v4233_v57 }
  0xf4   :  { %v4199_v3 = vmax.f32 %v864_v60, 0.0  ;;  %v4201_v10 = vpop.f32.mrf.mxu3  ;;  %v4206_v16 = vpop.f32.mrf.mxu1  ;;  %v595_v43 = vadd.f32 %v4164_v20, %v505_v11  ;;  %v771_v58 = vadd.f32 %v4161_v17, %v681_v34  ;;  %v3674_v17 = vld [vmem:[#allocation7 + $0x14] sm:$0xf0] }
  0xf5   :  { %v4243_v53 = vor.u32 %v3674_v17, %v3085_v7  ;;  %v3690_v11 = vld [vmem:[#allocation7 + $0x94] sm:$0xf0]  ;;  %v2941_v7 = vld [vmem:[#allocation2 + $0xd0] sm:$0xf] }
  0xf6   :  { %v1070_v18 = vrot.slane %v4199_v3, 2  ;;  %v881_v9 = vmax.f32 %v593_v56, %v595_v43  ;;  %v4245_v21 = vor.u32 %v3690_v11, %v3149_v0  ;;  %v3646_v17 = vld [vmem:[#allocation2 + $0xd4] sm:$0xf0] }
  0xf7   :  { %3056 = vmatmul.msk.bf16.gmra.mxu1 %vm430_vm0, %v2946_v12 }
  0xf8   :  { %v1071_v38 = vsel %vm1066_vm1, %v1070_v18, %v4204_v15  ;;  %v2951_v18 = vld [vmem:[#allocation2 + $0xe8] sm:$0xf0]  ;;  %1518 = vmatpush.bf16.msrb.mxu1 %v4243_v53  ;;  %1547 = vmatpush.bf16.msrb.mxu3 %v4245_v21 }
  0xf9   :  { %3072 = vmatmul.msk.bf16.gmra.mxu3 %vm430_vm0, %v2946_v12  ;;  %v4219_v40 = vpack.c.bf16 %v1071_v38, %v1069_v33  ;;  %v3647_v12 = vld [vmem:[#allocation2 + $0xe4] sm:$0xf] }
  0xfb   :  { %v683_v46 = vpop.f32.mrf.mxu2  ;;  %v4231_v20 = vpop.f32.mrf.mxu0 }
  0xfc   :  { %v773_v62 = vadd.f32 %v4168_v26, %v683_v46  ;;  %v4229_v4 = vpop.f32.mrf.mxu3  ;;  %v4235_v6 = vpop.f32.mrf.mxu1  ;;  %v4240_v26 = vmax.f32 %v903_v44, 0.0  ;;  %v2954_v46 = vor.u32 %v3647_v12, %v2951_v18  ;;  %1548 = vmatpush.bf16.msrb.mxu3 %v4263_v55 }
  0xfe   :  { %v882_v60 = vmax.f32 %v771_v58, %v773_v62  ;;  %547 = vmatmul.bf16.gmra.mxu0 %v2934_v50  ;;  %v1802_v33 = vrot.slane %v4240_v26, 2  ;;  %v3293_v58 = vld [vmem:[#allocation7 + $0x1b0] sm:$0xf]  ;;  %v3726_v62 = vld [vmem:[#allocation7 + $0x1b4] sm:$0xf0] }
  0xff   :  { %v4266_v22 = vor.u32 %v3726_v62, %v3293_v58  ;;  %v3708_v58 = vld [vmem:[#allocation7 + $0x124] sm:$0xf0]  ;;  %v3285_v62 = vld [vmem:[#allocation7 + $0x1a0] sm:$0xf] }
 0x100   :  { %v896_v34 = vmax.f32 %v881_v9, %v882_v60  ;;  %725 = vmatmul.bf16.gmra.mxu2 %v2934_v50  ;;  %v4259_v50 = vor.u32 %v3672_v27, %v3077_v25  ;;  %v3229_v9 = vld [vmem:[#allocation7 + $0x130] sm:$0xf]  ;;  %v3710_v60 = vld [vmem:[#allocation7 + $0x134] sm:$0xf0] }
 0x101   :  { %5193 = vst [vmem:[#allocation27_spill] sm:$0xff] %v4266_v22  ;;  %v4270_v0 = vor.u32 %v3710_v60, %v3229_v9  ;;  %1603 = vmatpush.bf16.msrb.mxu2 %v4266_v22  ;;  %v3277_v22 = vld [vmem:[#allocation7 + $0x190] sm:$0xf] }
 0x102   :  { %v904_v23 = vadd.f32 %v4175_v30, %v896_v34  ;;  %1519 = vmatpush.bf16.msrb.mxu1 %v4259_v50  ;;  %v1803_v34 = vsel %vm1066_vm1, %v1802_v33, %v4204_v15  ;;  %v3649_v33 = vld [vmem:[#allocation2 + $0xf4] sm:$0xf] }
 0x103   :  { %v4248_v24 = vpop.f32.mrf.mxu2  ;;  %v4256_v44 = vpop.f32.mrf.mxu0  ;;  %5194 = vst [vmem:[#allocation28_spill] sm:$0xff] %v4270_v0  ;;  %1574 = vmatpush.bf16.msrb.mxu0 %v4270_v0 }
 0x104   :  { %v4252_v38 = vmax.f32 %v904_v23, 0.0  ;;  %v4254_v43 = vpop.f32.mrf.mxu3  ;;  %v4261_v52 = vpop.f32.mrf.mxu1  ;;  %v2942_v23 = vor.u32 %v3646_v17, %v2941_v7  ;;  %v3724_v7 = vld [vmem:[#allocation7 + $0x1a4] sm:$0xf0] }
 0x105   :  { %v4294_v14 = vor.u32 %v3724_v7, %v3285_v62  ;;  %v3205_v62 = vld [vmem:[#allocation7 + $0x100] sm:$0xf]  ;;  %v3704_v7 = vld [vmem:[#allocation7 + $0x104] sm:$0xf0] }
 0x106   :  { %v1804_v56 = vrot.slane %v4252_v38, 2  ;;  %v4308_v47 = vor.u32 %v3704_v7, %v3205_v62  ;;  %v598_v62 = vadd.f32 %v4170_v29, %v4231_v20 }
 0x107   :  { %3057 = vmatmul.msk.bf16.gmra.mxu1 %vm430_vm0, %v2954_v46  ;;  %5197 = vst [vmem:[#allocation31_spill] sm:$0xff] %v4294_v14  ;;  %1604 = vmatpush.bf16.msrb.mxu2 %v4294_v14  ;;  %v3269_v14 = vld [vmem:[#allocation7 + $0x180] sm:$0xf] }
 0x108   :  { %v1805_v11 = vsel %vm1066_vm1, %v1804_v56, %v4204_v15  ;;  %5200 = vst [vmem:[#allocation34_spill] sm:$0xff] %v4308_v47 }
 0x109   :  { %3073 = vmatmul.msk.bf16.gmra.mxu3 %vm430_vm0, %v2954_v46  ;;  %v4279_v12 = vpack.c.bf16 %v1805_v11, %v1803_v34  ;;  %v3221_v46 = vld [vmem:[#allocation7 + $0x120] sm:$0xf]  ;;  %v2962_v34 = vor.u32 %v3649_v33, %v2959_v51  ;;  %v3722_v33 = vld [vmem:[#allocation7 + $0x194] sm:$0xf0] }
 0x10a   :  { %v4290_v11 = vor.u32 %v3708_v58, %v3221_v46  ;;  %v4302_v51 = vor.u32 %v3722_v33, %v3277_v22  ;;  %v2950_v58 = vor.u32 %v3648_v48, %v2949_v45  ;;  %v776_v45 = vadd.f32 %v4191_v63, %v4248_v24 }
 0x10b   :  { %5195 = vst [vmem:[#allocation29_spill] sm:$0xff] %v4279_v12  ;;  %v688_v18 = vpop.f32.mrf.mxu2  ;;  %v4284_v27 = vpop.f32.mrf.mxu0  ;;  %v3706_v12 = vld [vmem:[#allocation7 + $0x114] sm:$0xf0]  ;;  %v600_v22 = vadd.f32 %v4193_v1, %v4256_v44  ;;  %v4331_v63 = vpack.c.bf16 %v4252_v38, %v4240_v26  ;;  %v2957_v1 = vld [vmem:[#allocation2 + $0xf0] sm:$0xf] }
 0x10c   :  { %v4282_v25 = vpop.f32.mrf.mxu3  ;;  %v609_v32 = vpop.f32.mrf.mxu1  ;;  %5196 = vst [vmem:[#allocation30_spill] sm:$0xff] %v4290_v11  ;;  %1575 = vmatpush.bf16.msrb.mxu0 %v4290_v11  ;;  %1605 = vmatpush.bf16.msrb.mxu2 %v4302_v51  ;;  %v778_v48 = vadd.f32 %v4201_v10, %v688_v18  ;;  %v4327_v10 = vpack.c.bf16 %v4199_v3, %v4195_v5  ;;  %v3650_v44 = vld [vmem:[#allocation2 + $0xf4] sm:$0xf0] }
 0x10d   :  { %5199 = vst [vmem:[#allocation33_spill] sm:$0xff] %v4302_v51  ;;  %v2958_v18 = vor.u32 %v3650_v44, %v2957_v1 }
 0x10e   :  { %552 = vmatmul.bf16.gmra.mxu0 %v2942_v23  ;;  %5202 = vst [vmem:[#allocation36_spill] sm:$0xff] %v4327_v10 }
 0x110   :  { %730 = vmatmul.bf16.gmra.mxu2 %v2942_v23  ;;  %v3213_v23 = vld [vmem:[#allocation7 + $0x110] sm:$0xf] }
 0x111   :  { %v4299_v0 = vor.u32 %v3706_v12, %v3213_v23  ;;  %v3720_v12 = vld [vmem:[#allocation7 + $0x184] sm:$0xf0] }
 0x113   :  { %v4286_v56 = vpop.f32.mrf.mxu2  ;;  %v4288_v60 = vpop.f32.mrf.mxu0  ;;  %5198 = vst [vmem:[#allocation32_spill] sm:$0xff] %v4299_v0  ;;  %1576 = vmatpush.bf16.msrb.mxu0 %v4299_v0 }
 0x114   :  { %v787_v9 = vpop.f32.mrf.mxu3  ;;  %v4292_v17 = vpop.f32.mrf.mxu1 }
 0x117   :  { %3058 = vmatmul.msk.bf16.gmra.mxu1 %vm430_vm0, %v2962_v34  ;;  %1577 = vmatpush.bf16.msrb.mxu0 %v4308_v47  ;;  %v840_v47 = vmax.f32 %v598_v62, %v600_v22 }
 0x119   :  { %3074 = vmatmul.msk.bf16.gmra.mxu3 %vm430_vm0, %v2962_v34  ;;  %v4312_v34 = vor.u32 %v3720_v12, %v3269_v14  ;;  %v841_v14 = vmax.f32 %v776_v45, %v778_v48 }
 0x11b   :  { %v693_v46 = vpop.f32.mrf.mxu2  ;;  %v518_v61 = vpop.f32.mrf.mxu0  ;;  %5201 = vst [vmem:[#allocation35_spill] sm:$0xff] %v4312_v34  ;;  %1606 = vmatpush.bf16.msrb.mxu2 %v4312_v34  ;;  %v854_v24 = vmax.f32 %v840_v47, %v841_v14 }
 0x11c   :  { %v4306_v11 = vpop.f32.mrf.mxu3  ;;  %v4310_v23 = vpop.f32.mrf.mxu1  ;;  %v608_v48 = vadd.f32 %v4261_v52, %v518_v61  ;;  %v781_v61 = vadd.f32 %v4229_v4, %v4286_v56  ;;  %v605_v52 = vadd.f32 %v4235_v6, %v4288_v60  ;;  %v1012_v4 = vrot.slane %v4199_v3, 1 }
 0x11d   :  { %v1009_v60 = vrot.slane %v4195_v5, 1 }
 0x11e   :  { %557 = vmatmul.bf16.gmra.mxu0 %v2950_v58 }
 0x120   :  { %735 = vmatmul.bf16.gmra.mxu2 %v2950_v58  ;;  %v865_v58 = vadd.f32 %v4175_v30, %v854_v24  ;;  %v603_v24 = vadd.f32 %v4206_v16, %v4284_v27 }
 0x122   :  { %v4342_v37 = vmax.f32 %v865_v58, 0.0  ;;  %v883_v56 = vmax.f32 %v603_v24, %v605_v52 }
 0x123   :  { %v696_v33 = vpop.f32.mrf.mxu2  ;;  %v520_v12 = vpop.f32.mrf.mxu0 }
 0x124   :  { %v792_v7 = vpop.f32.mrf.mxu3  ;;  %v4323_v51 = vpop.f32.mrf.mxu1  ;;  %v610_v29 = vadd.f32 %v609_v32, %v520_v12  ;;  %v786_v45 = vadd.f32 %v4282_v25, %v696_v33  ;;  %v783_v32 = vadd.f32 %v4254_v43, %v693_v46  ;;  %v1072_v33 = vrot.slane %v4342_v37, 2 }
 0x126   :  { %v842_v14 = vmax.f32 %v608_v48, %v610_v29  ;;  %v884_v1 = vmax.f32 %v781_v61, %v783_v32  ;;  %v1073_v58 = vsel %vm1066_vm1, %v1072_v33, %v4204_v15  ;;  %v1042_v48 = vrot.slane %v4240_v26, 1 }
 0x127   :  { %1520 = vmatmul.bf16.vlgmr.msrb.gmra.mxu1 %v4327_v10  ;;  %v3095_v10 = vld [vmem:[#allocation7 + $0x28] sm:$0xf0] }
 0x128   :  { %v897_v27 = vmax.f32 %v883_v56, %v884_v1 }
 0x129   :  { %1549 = vmatmul.bf16.vlgmr.msrb.gmra.mxu3 %v4331_v63 }
 0x12b   :  { %v698_v20 = vpop.f32.mrf.mxu2  ;;  %v523_v34 = vpop.f32.mrf.mxu0 }
 0x12c   :  { %v788_v22 = vadd.f32 %v787_v9, %v698_v20  ;;  %v4338_v62 = vpop.f32.mrf.mxu3  ;;  %v4340_v47 = vpop.f32.mrf.mxu1  ;;  %v1044_v20 = vrot.slane %v4252_v38, 1  ;;  %v613_v61 = vadd.f32 %v4292_v17, %v523_v34 }
 0x12e   :  { %v843_v0 = vmax.f32 %v786_v45, %v788_v22  ;;  %562 = vmatmul.bf16.gmra.mxu0 %v2958_v18 }
 0x130   :  { %v855_v12 = vmax.f32 %v842_v14, %v843_v0  ;;  %740 = vmatmul.bf16.gmra.mxu2 %v2958_v18  ;;  %v5204_v18 = vmov 0.0  }
 0x131   :  { %v4364_v16 = vrot.slane %v5204_v18, 1 }
 0x132   :  { %v866_v25 = vadd.f32 %v4175_v30, %v855_v12  ;;  %v905_v12 = vadd.f32 %v4175_v30, %v897_v27 }
 0x133   :  { %v701_v9 = vpop.f32.mrf.mxu2  ;;  %v525_v43 = vpop.f32.mrf.mxu0  ;;  %v1013_v38 = vsel %vm1008_vm2, %v1012_v4, %v4364_v16  ;;  %v1011_v14 = vsel %vm1008_vm2, %v1009_v60, %v4364_v16  ;;  %v1045_v32 = vsel %vm1008_vm2, %v1044_v20, %v4364_v16  ;;  %v1043_v1 = vsel %vm1008_vm2, %v1042_v48, %v4364_v16 }
 0x134   :  { %v874_v44 = vmax.f32 %v866_v25, 0.0  ;;  %v4353_v29 = vpop.f32.mrf.mxu3  ;;  %v4355_v0 = vpop.f32.mrf.mxu1  ;;  %v615_v5 = vadd.f32 %v4310_v23, %v525_v43  ;;  %v791_v26 = vadd.f32 %v4306_v11, %v701_v9  ;;  %v4388_v24 = vpack.c.bf16 %v1013_v38, %v1011_v14 }
 0x135   :  { %v4392_v56 = vpack.c.bf16 %v1045_v32, %v1043_v1  ;;  %v913_v17 = vmax.f32 %v905_v12, 0.0 }
 0x136   :  { %v1074_v46 = vrot.slane %v874_v44, 2  ;;  %v4359_v6 = vpack.c.bf16 %v874_v44, %v4342_v37  ;;  %5205 = vst [vmem:[#allocation38_spill] sm:$0xff] %v4388_v24  ;;  %v885_v43 = vmax.f32 %v613_v61, %v615_v5  ;;  %v1016_v27 = vrot.slane %v874_v44, 1 }
 0x137   :  { %5206 = vst [vmem:[#allocation39_spill] sm:$0xff] %v4392_v56  ;;  %v1806_v20 = vrot.slane %v913_v17, 2  ;;  %v1014_v5 = vrot.slane %v4342_v37, 1  ;;  %v1046_v14 = vrot.slane %v913_v17, 1 }
 0x138   :  { %5203 = vst [vmem:[#allocation37_spill] sm:$0xff] %v4359_v6  ;;  %1525 = vmatmul.bf16.gmra.mxu1 %v4359_v6  ;;  %v1075_v3 = vsel %vm1066_vm1, %v1074_v46, %v4204_v15  ;;  %v1017_v44 = vsel %vm1008_vm2, %v1016_v27, %v4364_v16 }
 0x139   :  { %v4372_v45 = vpack.c.bf16 %v1075_v3, %v1073_v58  ;;  %v1807_v38 = vsel %vm1066_vm1, %v1806_v20, %v4204_v15 }
 0x13b   :  { %v703_v22 = vpop.f32.mrf.mxu2  ;;  %v528_v23 = vpop.f32.mrf.mxu0 }
 0x13c   :  { %v793_v52 = vadd.f32 %v792_v7, %v703_v22  ;;  %v4384_v25 = vpop.f32.mrf.mxu3  ;;  %v4386_v33 = vpop.f32.mrf.mxu1 }
 0x13e   :  { %v886_v4 = vmax.f32 %v791_v26, %v793_v52  ;;  %1578 = vmatmul.bf16.vlgmr.msrb.gmra.mxu0 %v4388_v24  ;;  %v1015_v52 = vsel %vm1008_vm2, %v1014_v5, %v4364_v16 }
 0x140   :  { %v898_v34 = vmax.f32 %v885_v43, %v886_v4  ;;  %1607 = vmatmul.bf16.vlgmr.msrb.gmra.mxu2 %v4392_v56  ;;  %v4413_v43 = vpack.c.bf16 %v1017_v44, %v1015_v52  ;;  %v1047_v4 = vsel %vm1008_vm2, %v1046_v14, %v4364_v16  ;;  %v618_v44 = vadd.f32 %v4323_v51, %v528_v23 }
 0x142   :  { %v906_v11 = vadd.f32 %v4175_v30, %v898_v34  ;;  %5209 = vst [vmem:[#allocation42_spill] sm:$0xff] %v4413_v43 }
 0x143   :  { %v706_v7 = vpop.f32.mrf.mxu2  ;;  %v530_v60 = vpop.f32.mrf.mxu0 }
 0x144   :  { %v914_v9 = vmax.f32 %v906_v11, 0.0  ;;  %v802_v46 = vpop.f32.mrf.mxu3  ;;  %v627_v18 = vpop.f32.mrf.mxu1  ;;  %v620_v14 = vadd.f32 %v4340_v47, %v530_v60 }
 0x146   :  { %v4397_v58 = vpack.c.bf16 %v914_v9, %v913_v17  ;;  %v1808_v3 = vrot.slane %v914_v9, 2  ;;  %v1048_v48 = vrot.slane %v914_v9, 1 }
 0x148   :  { %5207 = vst [vmem:[#allocation40_spill] sm:$0xff] %v4397_v58  ;;  %1554 = vmatmul.bf16.gmra.mxu3 %v4397_v58  ;;  %v1809_v22 = vsel %vm1066_vm1, %v1808_v3, %v4204_v15  ;;  %v1049_v61 = vsel %vm1008_vm2, %v1048_v48, %v4364_v16  ;;  %v3349_v58 = vld [vmem:[#allocation7 + $0x220] sm:$0xf] }
 0x149   :  { %v4405_v32 = vpack.c.bf16 %v1809_v22, %v1807_v38  ;;  %v4417_v17 = vpack.c.bf16 %v1049_v61, %v1047_v4  ;;  %v796_v22 = vadd.f32 %v4338_v62, %v706_v7 }
 0x14b   :  { %5208 = vst [vmem:[#allocation41_spill] sm:$0xff] %v4405_v32  ;;  %v708_v12 = vpop.f32.mrf.mxu2  ;;  %v533_v37 = vpop.f32.mrf.mxu0 }
 0x14c   :  { %v805_v26 = vpop.f32.mrf.mxu3  ;;  %v629_v1 = vpop.f32.mrf.mxu1  ;;  %5210 = vst [vmem:[#allocation43_spill] sm:$0xff] %v4417_v17  ;;  %v798_v38 = vadd.f32 %v4353_v29, %v708_v12 }
 0x14e   :  { %1583 = vmatmul.bf16.gmra.mxu0 %v4413_v43  ;;  %v845_v61 = vmax.f32 %v796_v22, %v798_v38 }
 0x150   :  { %1612 = vmatmul.bf16.gmra.mxu2 %v4417_v17  ;;  %v844_v17 = vmax.f32 %v618_v44, %v620_v14 }
 0x152   :  { %v856_v49 = vmax.f32 %v844_v17, %v845_v61 }
 0x153   :  { %v711_v34 = vpop.f32.mrf.mxu2  ;;  %v535_v9 = vpop.f32.mrf.mxu0 }
 0x154   :  { %v807_v11 = vpop.f32.mrf.mxu3  ;;  %v632_v20 = vpop.f32.mrf.mxu1  ;;  %v867_v43 = vadd.f32 %v4175_v30, %v856_v49  ;;  %v801_v14 = vadd.f32 %v4384_v25, %v711_v34 }
 0x156   :  { %v875_v60 = vmax.f32 %v867_v43, 0.0 }
 0x158   :  { %v1076_v17 = vrot.slane %v875_v60, 2 }
 0x15a   :  { %v1077_v61 = vsel %vm1066_vm1, %v1076_v17, %v4204_v15 }
 0x15b   :  { %v713_v27 = vpop.f32.mrf.mxu2  ;;  %v538_v48 = vpop.f32.mrf.mxu0 }
 0x15c   :  { %v810_v3 = vpop.f32.mrf.mxu3  ;;  %v634_v5 = vpop.f32.mrf.mxu1  ;;  %v628_v42 = vadd.f32 %v627_v18, %v538_v48  ;;  %v803_v38 = vadd.f32 %v802_v46, %v713_v27  ;;  %v623_v18 = vadd.f32 %v4355_v0, %v533_v37  ;;  %v3135_v0 = vld [vmem:[#allocation7 + $0x78] sm:$0xf0] }
 0x163   :  { %v716_v52 = vpop.f32.mrf.mxu2  ;;  %v540_v32 = vpop.f32.mrf.mxu0 }
 0x164   :  { %v812_v4 = vpop.f32.mrf.mxu3  ;;  %v4425_v56 = vpop.f32.mrf.mxu1  ;;  %v630_v2 = vadd.f32 %v629_v1, %v540_v32  ;;  %v806_v29 = vadd.f32 %v805_v26, %v716_v52  ;;  %v625_v32 = vadd.f32 %v4386_v33, %v535_v9  ;;  %v1018_v1 = vrot.slane %v875_v60, 1  ;;  %v3685_v9 = vld [vmem:[#allocation7 + $0x74] sm:$0xf] }
 0x165   :  { %v4447_v44 = vor.u32 %v3685_v9, %v3135_v0 }
 0x166   :  { %v846_v51 = vmax.f32 %v628_v42, %v630_v2  ;;  %v887_v2 = vmax.f32 %v623_v18, %v625_v32  ;;  %v1019_v34 = vsel %vm1008_vm2, %v1018_v1, %v4364_v16 }
 0x167   :  { %5212 = vst [vmem:[#allocation45_spill] sm:$0xff] %v4447_v44  ;;  %1657 = vmatpush.bf16.msra.mxu3 %v4447_v44  ;;  %v3693_v44 = vld [vmem:[#allocation7 + $0xb4] sm:$0xf] }
 0x16b   :  { %v718_v6 = vpop.f32.mrf.mxu2  ;;  %v543_v47 = vpop.f32.mrf.mxu0 }
 0x16c   :  { %v808_v12 = vadd.f32 %v807_v11, %v718_v6  ;;  %v4428_v62 = vpop.f32.mrf.mxu3  ;;  %v4430_v7 = vpop.f32.mrf.mxu1  ;;  %v888_v6 = vmax.f32 %v801_v14, %v803_v38  ;;  %v633_v38 = vadd.f32 %v632_v20, %v543_v47 }
 0x16e   :  { %v847_v23 = vmax.f32 %v806_v29, %v808_v12  ;;  %v899_v33 = vmax.f32 %v887_v2, %v888_v6 }
 0x170   :  { %v857_v22 = vmax.f32 %v846_v51, %v847_v23  ;;  %v907_v23 = vadd.f32 %v4175_v30, %v899_v33  ;;  %v3389_v33 = vld [vmem:[#allocation7 + $0x270] sm:$0xf] }
 0x172   :  { %v868_v49 = vadd.f32 %v4175_v30, %v857_v22  ;;  %v915_v17 = vmax.f32 %v907_v23, 0.0 }
 0x173   :  { %v721_v26 = vpop.f32.mrf.mxu2  ;;  %v545_v42 = vpop.f32.mrf.mxu0 }
 0x174   :  { %v876_v11 = vmax.f32 %v868_v49, 0.0  ;;  %v4436_v48 = vpop.f32.mrf.mxu3  ;;  %v4438_v43 = vpop.f32.mrf.mxu1  ;;  %v635_v51 = vadd.f32 %v634_v5, %v545_v42  ;;  %v811_v22 = vadd.f32 %v810_v3, %v721_v26  ;;  %v1050_v42 = vrot.slane %v915_v17, 1 }
 0x175   :  { %v1810_v3 = vrot.slane %v915_v17, 2 }
 0x176   :  { %v1020_v46 = vrot.slane %v876_v11, 1  ;;  %v1078_v27 = vrot.slane %v876_v11, 2  ;;  %v4440_v25 = vpack.c.bf16 %v876_v11, %v875_v60  ;;  %v889_v18 = vmax.f32 %v633_v38, %v635_v51  ;;  %v3701_v38 = vld [vmem:[#allocation7 + $0xf4] sm:$0xf] }
 0x178   :  { %5211 = vst [vmem:[#allocation44_spill] sm:$0xff] %v4440_v25  ;;  %1530 = vmatmul.bf16.gmra.mxu1 %v4440_v25  ;;  %v1021_v37 = vsel %vm1008_vm2, %v1020_v46, %v4364_v16  ;;  %v1079_v52 = vsel %vm1066_vm1, %v1078_v27, %v4204_v15  ;;  %v3239_v25 = vld [vmem:[#allocation7 + $0x148] sm:$0xf0] }
 0x179   :  { %v4453_v29 = vpack.c.bf16 %v1021_v37, %v1019_v34  ;;  %v4455_v12 = vpack.c.bf16 %v1079_v52, %v1077_v61  ;;  %v3750_v34 = vld [vmem:[#allocation7 + $0x274] sm:$0xf0]  ;;  %v3717_v37 = vld [vmem:[#allocation7 + $0x174] sm:$0xf]  ;;  %v3263_v61 = vld [vmem:[#allocation7 + $0x178] sm:$0xf0] }
 0x17a   :  { %v4479_v0 = vor.u32 %v3750_v34, %v3389_v33  ;;  %v3683_v52 = vld [vmem:[#allocation7 + $0x64] sm:$0xf]  ;;  %v4484_v23 = vor.u32 %v3717_v37, %v3263_v61  ;;  %v3681_v34 = vld [vmem:[#allocation7 + $0x54] sm:$0xf] }
 0x17b   :  { %5213 = vst [vmem:[#allocation46_spill] sm:$0xff] %v4453_v29  ;;  %v723_v60 = vpop.f32.mrf.mxu2  ;;  %1588 = vmatmul.bf16.gmra.mxu0 %v4453_v29  ;;  %v4462_v49 = vpop.f32.mrf.mxu0 }
 0x17c   :  { %5214 = vst [vmem:[#allocation47_spill] sm:$0xff] %v4455_v12  ;;  %v813_v14 = vadd.f32 %v812_v4, %v723_v60  ;;  %v4460_v32 = vpop.f32.mrf.mxu3  ;;  %v4464_v1 = vpop.f32.mrf.mxu1  ;;  %v3127_v60 = vld [vmem:[#allocation7 + $0x68] sm:$0xf0]  ;;  %1628 = vmatpush.bf16.msra.mxu1 %v4479_v0  ;;  %1715 = vmatpush.bf16.msra.mxu2 %v4484_v23  ;;  %v3103_v12 = vld [vmem:[#allocation7 + $0x38] sm:$0xf0] }
 0x17d   :  { %5216 = vst [vmem:[#allocation49_spill] sm:$0xff] %v4484_v23 }
 0x17e   :  { %v890_v6 = vmax.f32 %v811_v22, %v813_v14  ;;  %v3199_v22 = vld [vmem:[#allocation7 + $0xf8] sm:$0xf0]  ;;  %v1811_v14 = vsel %vm1066_vm1, %v1810_v3, %v4204_v15  ;;  %v3255_v3 = vld [vmem:[#allocation7 + $0x168] sm:$0xf0] }
 0x180   :  { %v900_v5 = vmax.f32 %v889_v18, %v890_v6 }
 0x182   :  { %v908_v11 = vadd.f32 %v4175_v30, %v900_v5  ;;  %v1051_v30 = vsel %vm1008_vm2, %v1050_v42, %v4364_v16  ;;  %v4495_v5 = vor.u32 %v3701_v38, %v3199_v22  ;;  %v3748_v42 = vld [vmem:[#allocation7 + $0x264] sm:$0xf0] }
 0x183   :  { %v4467_v2 = vpop.f32.mrf.mxu2  ;;  %v4471_v20 = vpop.f32.mrf.mxu0 }
 0x184   :  { %v916_v46 = vmax.f32 %v908_v11, 0.0  ;;  %v4469_v27 = vpop.f32.mrf.mxu3  ;;  %v4473_v4 = vpop.f32.mrf.mxu1  ;;  %5219 = vst [vmem:[#allocation52_spill] sm:$0xff] %v4495_v5  ;;  %v3381_v11 = vld [vmem:[#allocation7 + $0x260] sm:$0xf]  ;;  %1686 = vmatpush.bf16.msra.mxu0 %v4495_v5  ;;  %v3711_v5 = vld [vmem:[#allocation7 + $0x144] sm:$0xf] }
 0x185   :  { %v4500_v33 = vor.u32 %v3748_v42, %v3381_v11  ;;  %v3746_v11 = vld [vmem:[#allocation7 + $0x254] sm:$0xf0] }
 0x186   :  { %v1052_v47 = vrot.slane %v916_v46, 1  ;;  %v4475_v26 = vpack.c.bf16 %v916_v46, %v915_v17  ;;  %v1812_v9 = vrot.slane %v916_v46, 2  ;;  %v4493_v17 = vor.u32 %v3683_v52, %v3127_v60  ;;  %v3715_v46 = vld [vmem:[#allocation7 + $0x164] sm:$0xf] }
 0x187   :  { %v4506_v37 = vor.u32 %v3715_v46, %v3255_v3  ;;  %v3699_v52 = vld [vmem:[#allocation7 + $0xe4] sm:$0xf]  ;;  %1629 = vmatpush.bf16.msra.mxu1 %v4500_v33  ;;  %v3697_v46 = vld [vmem:[#allocation7 + $0xd4] sm:$0xf]  ;;  %v3183_v3 = vld [vmem:[#allocation7 + $0xd8] sm:$0xf0] }
 0x188   :  { %5215 = vst [vmem:[#allocation48_spill] sm:$0xff] %v4475_v26  ;;  %1559 = vmatmul.bf16.gmra.mxu3 %v4475_v26  ;;  %v1053_v51 = vsel %vm1008_vm2, %v1052_v47, %v4364_v16  ;;  %v1813_v18 = vsel %vm1066_vm1, %v1812_v9, %v4204_v15  ;;  %v3119_v9 = vld [vmem:[#allocation7 + $0x58] sm:$0xf0]  ;;  %v3677_v26 = vld [vmem:[#allocation7 + $0x34] sm:$0xf] }
 0x189   :  { %v4490_v6 = vpack.c.bf16 %v1053_v51, %v1051_v30  ;;  %5218 = vst [vmem:[#allocation51_spill] sm:$0xff] %v4493_v17  ;;  %v4497_v47 = vpack.c.bf16 %v1813_v18, %v1811_v14  ;;  %1658 = vmatpush.bf16.msra.mxu3 %v4493_v17  ;;  %v4508_v61 = vor.u32 %v3681_v34, %v3119_v9  ;;  %v3191_v51 = vld [vmem:[#allocation7 + $0xe8] sm:$0xf0]  ;;  %v3373_v18 = vld [vmem:[#allocation7 + $0x250] sm:$0xf] }
 0x18a   :  { %5221 = vst [vmem:[#allocation54_spill] sm:$0xff] %v4506_v37  ;;  %v4515_v22 = vor.u32 %v3699_v52, %v3191_v51  ;;  %1716 = vmatpush.bf16.msra.mxu2 %v4506_v37  ;;  %v4523_v42 = vor.u32 %v3746_v11, %v3373_v18  ;;  %v4528_v9 = vor.u32 %v3697_v46, %v3183_v3  ;;  %v3365_v52 = vld [vmem:[#allocation7 + $0x240] sm:$0xf]  ;;  %v3744_v51 = vld [vmem:[#allocation7 + $0x244] sm:$0xf0] }
 0x18b   :  { %5217 = vst [vmem:[#allocation50_spill] sm:$0xff] %v4490_v6  ;;  %v4502_v30 = vpop.f32.mrf.mxu2  ;;  %1617 = vmatmul.bf16.gmra.mxu2 %v4490_v6  ;;  %v4512_v38 = vpop.f32.mrf.mxu0  ;;  %v4534_v37 = vor.u32 %v3744_v51, %v3365_v52  ;;  %v3713_v18 = vld [vmem:[#allocation7 + $0x154] sm:$0xf]  ;;  %v3247_v11 = vld [vmem:[#allocation7 + $0x158] sm:$0xf0]  ;;  %v4545_v52 = vor.u32 %v3711_v5, %v3239_v25  ;;  %v4548_v17 = vor.u32 %v3677_v26, %v3103_v12 }
 0x18c   :  { %5220 = vst [vmem:[#allocation53_spill] sm:$0xff] %v4497_v47  ;;  %v4510_v60 = vpop.f32.mrf.mxu3  ;;  %v4517_v14 = vpop.f32.mrf.mxu1  ;;  %1687 = vmatpush.bf16.msra.mxu0 %v4515_v22  ;;  %1630 = vmatpush.bf16.msra.mxu1 %v4523_v42  ;;  %v3679_v46 = vld [vmem:[#allocation7 + $0x44] sm:$0xf]  ;;  %v3111_v3 = vld [vmem:[#allocation7 + $0x48] sm:$0xf0] }
 0x18d   :  { %5222 = vst [vmem:[#allocation55_spill] sm:$0xff] %v4508_v61  ;;  %1659 = vmatpush.bf16.msra.mxu3 %v4508_v61  ;;  %v4542_v29 = vor.u32 %v3679_v46, %v3111_v3  ;;  %v3695_v51 = vld [vmem:[#allocation7 + $0xc4] sm:$0xf]  ;;  %v3357_v61 = vld [vmem:[#allocation7 + $0x230] sm:$0xf] }
 0x18e   :  { %5223 = vst [vmem:[#allocation56_spill] sm:$0xff] %v4515_v22  ;;  %v4540_v22 = vor.u32 %v3713_v18, %v3247_v11  ;;  %v3742_v11 = vld [vmem:[#allocation7 + $0x234] sm:$0xf0]  ;;  %v3167_v46 = vld [vmem:[#allocation7 + $0xb8] sm:$0xf0] }
 0x18f   :  { %5224 = vst [vmem:[#allocation57_spill] sm:$0xff] %v4528_v9  ;;  %v4554_v24 = vor.u32 %v3742_v11, %v3357_v61  ;;  %v3691_v26 = vld [vmem:[#allocation7 + $0xa4] sm:$0xf]  ;;  %v3159_v61 = vld [vmem:[#allocation7 + $0xa8] sm:$0xf0]  ;;  %v818_v11 = vadd.f32 %v4436_v48, %v4502_v30 }
 0x190   :  { %5225 = vst [vmem:[#allocation58_spill] sm:$0xff] %v4534_v37  ;;  %1688 = vmatpush.bf16.msra.mxu0 %v4528_v9  ;;  %1631 = vmatpush.bf16.msra.mxu1 %v4534_v37  ;;  %v3175_v9 = vld [vmem:[#allocation7 + $0xc8] sm:$0xf0]  ;;  %v4559_v37 = vor.u32 %v3693_v44, %v3167_v46  ;;  %v3333_v48 = vld [vmem:[#allocation7 + $0x200] sm:$0xf] }
 0x191   :  { %5226 = vst [vmem:[#allocation59_spill] sm:$0xff] %v4540_v22  ;;  %1717 = vmatpush.bf16.msra.mxu2 %v4540_v22  ;;  %1660 = vmatpush.bf16.msra.mxu3 %v4542_v29  ;;  %v4550_v18 = vor.u32 %v3695_v51, %v3175_v9  ;;  %v3740_v22 = vld [vmem:[#allocation7 + $0x224] sm:$0xf0]  ;;  %v3341_v9 = vld [vmem:[#allocation7 + $0x210] sm:$0xf] }
 0x192   :  { %5227 = vst [vmem:[#allocation60_spill] sm:$0xff] %v4542_v29  ;;  %v4563_v12 = vor.u32 %v3740_v22, %v3349_v58  ;;  %v3738_v51 = vld [vmem:[#allocation7 + $0x214] sm:$0xf0]  ;;  %v816_v58 = vadd.f32 %v4428_v62, %v4467_v2  ;;  %v640_v22 = vadd.f32 %v4430_v7, %v4471_v20  ;;  %v3736_v30 = vld [vmem:[#allocation7 + $0x204] sm:$0xf0] }
 0x193   :  { %v4526_v34 = vpop.f32.mrf.mxu2  ;;  %v4532_v6 = vpop.f32.mrf.mxu0  ;;  %5228 = vst [vmem:[#allocation61_spill] sm:$0xff] %v4545_v52  ;;  %v4574_v46 = vor.u32 %v3738_v51, %v3341_v9  ;;  %v4588_v62 = vor.u32 %v3736_v30, %v3333_v48  ;;  %v3709_v2 = vld [vmem:[#allocation7 + $0x134] sm:$0xf]  ;;  %v3231_v20 = vld [vmem:[#allocation7 + $0x138] sm:$0xf0] }
 0x194   :  { %v4530_v47 = vpop.f32.mrf.mxu3  ;;  %v4538_v23 = vpop.f32.mrf.mxu1  ;;  %5229 = vst [vmem:[#allocation62_spill] sm:$0xff] %v4548_v17  ;;  %1689 = vmatpush.bf16.msra.mxu0 %v4550_v18  ;;  %1632 = vmatpush.bf16.msra.mxu1 %v4554_v24  ;;  %v4590_v51 = vor.u32 %v3709_v2, %v3231_v20  ;;  %v3143_v30 = vld [vmem:[#allocation7 + $0x88] sm:$0xf0]  ;;  %v4608_v2 = vld [vmem:[%s5116_s2] ss:$0 sm:$0xff] }
 0x195   :  { %5230 = vst [vmem:[#allocation63_spill] sm:$0xff] %v4550_v18  ;;  %1718 = vmatpush.bf16.msra.mxu2 %v4545_v52  ;;  %1661 = vmatpush.bf16.msra.mxu3 %v4548_v17  ;;  %v4569_v18 = vor.u32 %v3691_v26, %v3159_v61  ;;  %v3689_v52 = vld [vmem:[#allocation7 + $0x94] sm:$0xf]  ;;  %v3151_v17 = vld [vmem:[#allocation7 + $0x98] sm:$0xf0]  ;;  %v638_v26 = vadd.f32 %v4425_v56, %v4462_v49 }
 0x196   :  { %5231 = vst [vmem:[#allocation64_spill] sm:$0xff] %v4554_v24  ;;  %v849_v61 = vmax.f32 %v816_v58, %v818_v11  ;;  %v4585_v9 = vor.u32 %v3689_v52, %v3151_v17  ;;  %v3675_v24 = vld [vmem:[#allocation7 + $0x24] sm:$0xf]  ;;  %v3223_v58 = vld [vmem:[#allocation7 + $0x128] sm:$0xf0] }
 0x197   :  { %5232 = vst [vmem:[#allocation65_spill] sm:$0xff] %v4559_v37  ;;  %v848_v7 = vmax.f32 %v638_v26, %v640_v22  ;;  %v3707_v56 = vld [vmem:[#allocation7 + $0x124] sm:$0xf]  ;;  %v4592_v11 = vor.u32 %v3675_v24, %v3095_v10  ;;  %v3673_v17 = vld [vmem:[#allocation7 + $0x14] sm:$0xf] }
 0x198   :  { %5233 = vst [vmem:[#allocation66_spill] sm:$0xff] %v4563_v12  ;;  %1690 = vmatpush.bf16.msra.mxu0 %v4559_v37  ;;  %1633 = vmatpush.bf16.msra.mxu1 %v4563_v12  ;;  %v3087_v52 = vld [vmem:[#allocation7 + $0x18] sm:$0xf0]  ;;  %v4596_v48 = vor.u32 %v3707_v56, %v3223_v58  ;;  %v3687_v22 = vld [vmem:[#allocation7 + $0x84] sm:$0xf] }
 0x199   :  { %5234 = vst [vmem:[#allocation67_spill] sm:$0xff] %v4585_v9  ;;  %v858_v49 = vmax.f32 %v848_v7, %v849_v61  ;;  %1719 = vmatpush.bf16.msra.mxu2 %v4590_v51  ;;  %1662 = vmatpush.bf16.msra.mxu3 %v4592_v11  ;;  %v4601_v61 = vor.u32 %v3673_v17, %v3087_v52  ;;  %v3705_v52 = vld [vmem:[#allocation7 + $0x114] sm:$0xf] }
 0x19a   :  { %5235 = vst [vmem:[#allocation68_spill] sm:$0xff] %v4590_v51  ;;  %v4603_v10 = vor.u32 %v3687_v22, %v3143_v30  ;;  %v3215_v22 = vld [vmem:[#allocation7 + $0x118] sm:$0xf0] }
 0x19b   :  { %v4552_v3 = vpop.f32.mrf.mxu2  ;;  %v558_v5 = vpop.f32.mrf.mxu0  ;;  %v869_v20 = vadd.f32 %v4608_v2, %v858_v49  ;;  %v4616_v51 = vor.u32 %v3705_v52, %v3215_v22  ;;  %v3749_v52 = vld [vmem:[#allocation7 + $0x274] sm:$0xf]  ;;  %v3391_v22 = vld [vmem:[#allocation7 + $0x278] sm:$0xf0] }
 0x19c   :  { %v4556_v25 = vpop.f32.mrf.mxu3  ;;  %v4571_v44 = vpop.f32.mrf.mxu1  ;;  %1691 = vmatpush.bf16.msra.mxu0 %v4569_v18  ;;  %1634 = vmatpush.bf16.msra.mxu1 %v4574_v46  ;;  %v648_v56 = vadd.f32 %v4473_v4, %v558_v5  ;;  %v3079_v4 = vld [vmem:[#allocation7 + $0x8] sm:$0xf0] }
 0x19d   :  { %1720 = vmatpush.bf16.msra.mxu2 %v4596_v48  ;;  %1663 = vmatpush.bf16.msra.mxu3 %v4601_v61  ;;  %v4624_v5 = vmax.f32 %v869_v20, 0.0 }
 0x1a0   :  { %1692 = vmatpush.bf16.msra.mxu0 %v4585_v9  ;;  %1635 = vmatpush.bf16.msra.mxu1 %v4588_v62 }
 0x1a1   :  { %1721 = vmatpush.bf16.msra.mxu2 %v4616_v51 }
 0x1a3   :  { %v736_v29 = vpop.f32.mrf.mxu2  ;;  %v560_v12 = vpop.f32.mrf.mxu0 }
 0x1a4   :  { %v4582_v37 = vpop.f32.mrf.mxu3  ;;  %v650_v26 = vadd.f32 %v4517_v14, %v560_v12  ;;  %v1521_v24 = vpop.f32.mrf.mxu1  ;;  %v826_v58 = vadd.f32 %v4510_v60, %v736_v29  ;;  %1693 = vmatpush.bf16.msra.mxu0 %v4603_v10  ;;  %v3671_v29 = vld [vmem:[#allocation7 + $0x4] sm:$0xf] }
 0x1a5   :  { %v4622_v60 = vor.u32 %v3671_v29, %v3079_v4 }
 0x1a6   :  { %v850_v49 = vmax.f32 %v648_v56, %v650_v26 }
 0x1a7   :  { %1664 = vmatpush.bf16.msra.mxu3 %v4622_v60 }
 0x1a8   :  { %1830 = vmatpush.bf16.msrb.mxu0 %v4107_v36  ;;  %v645_v36 = vadd.f32 %v4464_v1, %v4532_v6  ;;  %v3207_v1 = vld [vmem:[#allocation7 + $0x108] sm:$0xf0] }
 0x1ab   :  { %v738_v7 = vpop.f32.mrf.mxu2  ;;  %v563_v17 = vpop.f32.mrf.mxu0 }
 0x1ac   :  { %v828_v14 = vadd.f32 %v4530_v47, %v738_v7  ;;  %v1550_v12 = vpop.f32.mrf.mxu3  ;;  %v823_v47 = vadd.f32 %v4469_v27, %v4552_v3  ;;  %v821_v7 = vadd.f32 %v4460_v32, %v4526_v34  ;;  %1831 = vmatpush.bf16.msrb.mxu0 %v4124_v59  ;;  %v643_v27 = vadd.f32 %v4438_v43, %v4512_v38  ;;  %v3703_v34 = vld [vmem:[#allocation7 + $0x104] sm:$0xf] }
 0x1ad   :  { %v1551_v30 = vadd.f32 %v1550_v12, %v1521_v24 }
 0x1ae   :  { %v851_v9 = vmax.f32 %v826_v58, %v828_v14  ;;  %v892_v3 = vmax.f32 %v821_v7, %v823_v47  ;;  %v891_v6 = vmax.f32 %v643_v27, %v645_v36  ;;  %v4639_v58 = vor.u32 %v3703_v34, %v3207_v1  ;;  %v3327_v27 = vld [vmem:[#allocation7 + $0x1f8] sm:$0xf0]  ;;  %v3319_v34 = vld [vmem:[#allocation7 + $0x1e8] sm:$0xf0] }
 0x1b0   :  { %v859_v24 = vmax.f32 %v850_v49, %v851_v9  ;;  %v1022_v9 = vrot.slane %v4624_v5, 1  ;;  %1832 = vmatpush.bf16.msrb.mxu0 %v4142_v41  ;;  %v901_v43 = vmax.f32 %v891_v6, %v892_v3  ;;  %1722 = vmatpush.bf16.msra.mxu2 %v4639_v58  ;;  %v4656_v49 = vor.u32 %v3749_v52, %v3391_v22  ;;  %v3747_v3 = vld [vmem:[#allocation7 + $0x264] sm:$0xf] }
 0x1b2   :  { %v870_v26 = vadd.f32 %v4608_v2, %v859_v24  ;;  %v1023_v38 = vsel %vm1008_vm2, %v1022_v9, %v4364_v16  ;;  %v909_v4 = vadd.f32 %v4608_v2, %v901_v43  ;;  %1773 = vmatpush.bf16.msrb.mxu3 %v4656_v49  ;;  %v653_v24 = vadd.f32 %v4538_v23, %v563_v17  ;;  %v3383_v9 = vld [vmem:[#allocation7 + $0x268] sm:$0xf0] }
 0x1b3   :  { %v741_v20 = vpop.f32.mrf.mxu2  ;;  %v565_v32 = vpop.f32.mrf.mxu0  ;;  %v4670_v17 = vor.u32 %v3747_v3, %v3383_v9  ;;  %v3311_v3 = vld [vmem:[#allocation7 + $0x1d8] sm:$0xf0] }
 0x1b4   :  { %v4637_v56 = vmax.f32 %v870_v26, 0.0  ;;  %1859 = vmatpush.bf16.msrb.mxu2 %v4105_v31  ;;  %1833 = vmatpush.bf16.msrb.mxu0 %v4177_v35  ;;  %v655_v29 = vadd.f32 %v4571_v44, %v565_v32  ;;  %v831_v7 = vadd.f32 %v4556_v25, %v741_v20  ;;  %v3733_v26 = vld [vmem:[#allocation7 + $0x1f4] sm:$0xf]  ;;  %v3731_v32 = vld [vmem:[#allocation7 + $0x1e4] sm:$0xf]  ;;  %v917_v25 = vmax.f32 %v909_v4, 0.0  ;;  %v4675_v20 = vpop.f32.mrf.mxu1  ;;  %v4681_v6 = vpop.f32.mrf.mxu3 }
 0x1b5   :  { %v4667_v44 = vor.u32 %v3733_v26, %v3327_v27  ;;  %v3745_v4 = vld [vmem:[#allocation7 + $0x254] sm:$0xf] }
 0x1b6   :  { %v1024_v59 = vrot.slane %v4637_v56, 1  ;;  %v4645_v14 = vpack.c.bf16 %v4637_v56, %v4624_v5  ;;  %v893_v1 = vmax.f32 %v653_v24, %v655_v29  ;;  %1774 = vmatpush.bf16.msrb.mxu3 %v4670_v17  ;;  %v1814_v52 = vrot.slane %v917_v25, 2  ;;  %v3729_v27 = vld [vmem:[#allocation7 + $0x1d4] sm:$0xf] }
 0x1b7   :  { %1744 = vmatpush.bf16.msrb.mxu1 %v4667_v44 }
 0x1b8   :  { %1535 = vmatmul.bf16.gmra.mxu1 %v4645_v14  ;;  %v1025_v12 = vsel %vm1008_vm2, %v1024_v59, %v4364_v16  ;;  %1860 = vmatpush.bf16.msrb.mxu2 %v4121_v54 }
 0x1b9   :  { %v4654_v41 = vpack.c.bf16 %v1025_v12, %v1023_v38  ;;  %1834 = vmatpush.bf16.msrb.mxu0 %v4217_v39 }
 0x1bb   :  { %v743_v47 = vpop.f32.mrf.mxu2  ;;  %1593 = vmatmul.bf16.gmra.mxu0 %v4654_v41  ;;  %v1579_v36 = vpop.f32.mrf.mxu0 }
 0x1bc   :  { %v833_v31 = vadd.f32 %v4582_v37, %v743_v47  ;;  %v1580_v35 = vadd.f32 %v1579_v36, %v1551_v30  ;;  %v4673_v37 = vor.u32 %v3731_v32, %v3319_v34  ;;  %1861 = vmatpush.bf16.msrb.mxu2 %v4137_v19  ;;  %v1054_v30 = vrot.slane %v917_v25, 1  ;;  %v3375_v47 = vld [vmem:[#allocation7 + $0x258] sm:$0xf0]  ;;  %v1526_v36 = vpop.f32.mrf.mxu1  ;;  %v3727_v34 = vld [vmem:[#allocation7 + $0x1c4] sm:$0xf] }
 0x1bd   :  { %1835 = vmatpush.bf16.msrb.mxu0 %v4233_v57 }
 0x1be   :  { %v894_v23 = vmax.f32 %v831_v7, %v833_v31  ;;  %1745 = vmatpush.bf16.msrb.mxu1 %v4673_v37  ;;  %v1055_v22 = vsel %vm1008_vm2, %v1054_v30, %v4364_v16  ;;  %v4704_v7 = vor.u32 %v3745_v4, %v3375_v47  ;;  %v5240_v4 = vld [vmem:[#allocation45_spill] sm:$0xff]  ;;  %v5241_v47 = vld [vmem:[#allocation64_spill] sm:$0xff] }
 0x1c0   :  { %v902_v54 = vmax.f32 %v893_v1, %v894_v23  ;;  %1862 = vmatpush.bf16.msrb.mxu2 %v4159_v13  ;;  %v1815_v13 = vsel %vm1066_vm1, %v1814_v52, %v4204_v15  ;;  %1775 = vmatpush.bf16.msrb.mxu3 %v4704_v7  ;;  %v3303_v1 = vld [vmem:[#allocation7 + $0x1c8] sm:$0xf0]  ;;  %v3359_v52 = vld [vmem:[#allocation7 + $0x238] sm:$0xf0] }
 0x1c1   :  { %1836 = vmatpush.bf16.msrb.mxu0 %v4243_v53 }
 0x1c2   :  { %v910_v39 = vadd.f32 %v4608_v2, %v902_v54  ;;  %v4722_v54 = vor.u32 %v3727_v34, %v3303_v1  ;;  %v5244_v1 = vld [vmem:[#allocation55_spill] sm:$0xff] }
 0x1c3   :  { %v1608_v59 = vpop.f32.mrf.mxu2  ;;  %v4686_v12 = vpop.f32.mrf.mxu0 }
 0x1c4   :  { %v918_v43 = vmax.f32 %v910_v39, 0.0  ;;  %v4684_v38 = vadd.f32 %v1608_v59, %v1580_v35  ;;  %1863 = vmatpush.bf16.msrb.mxu2 %v4210_v28  ;;  %v3743_v35 = vld [vmem:[#allocation7 + $0x244] sm:$0xf]  ;;  %v4715_v28 = vor.u32 %v3729_v27, %v3311_v3  ;;  %v5236_v59 = vld [vmem:[#allocation36_spill] sm:$0xff] }
 0x1c5   :  { %1837 = vmatpush.bf16.msrb.mxu0 %v4259_v50  ;;  %v3367_v50 = vld [vmem:[#allocation7 + $0x248] sm:$0xf0]  ;;  %v3719_v3 = vld [vmem:[#allocation7 + $0x184] sm:$0xf] }
 0x1c6   :  { %v1056_v19 = vrot.slane %v918_v43, 1  ;;  %v4690_v57 = vpack.c.bf16 %v918_v43, %v917_v25  ;;  %v1816_v2 = vrot.slane %v918_v43, 2  ;;  %v4718_v23 = vor.u32 %v3743_v35, %v3367_v50  ;;  %1746 = vmatpush.bf16.msrb.mxu1 %v4715_v28  ;;  %v3741_v43 = vld [vmem:[#allocation7 + $0x234] sm:$0xf]  ;;  %v5242_v35 = vld [vmem:[#allocation51_spill] sm:$0xff]  ;;  %v5243_v50 = vld [vmem:[#allocation66_spill] sm:$0xff] }
 0x1c8   :  { %1564 = vmatmul.bf16.gmra.mxu3 %v4690_v57  ;;  %1636 = vmatmul.bf16.vlgmr.msra.gmra.mxu1 %v4219_v40  ;;  %v1057_v29 = vsel %vm1008_vm2, %v1056_v19, %v4364_v16  ;;  %v1817_v53 = vsel %vm1066_vm1, %v1816_v2, %v4204_v15  ;;  %v5237_v19 = vld [vmem:[#allocation58_spill] sm:$0xff]  ;;  %v5238_v2 = vld [vmem:[#allocation40_spill] sm:$0xff] }
 0x1c9   :  { %v4702_v24 = vpack.c.bf16 %v1057_v29, %v1055_v22  ;;  %v4708_v31 = vpack.c.bf16 %v1817_v53, %v1815_v13  ;;  %1864 = vmatpush.bf16.msrb.mxu2 %v4237_v8  ;;  %1776 = vmatpush.bf16.msrb.mxu3 %v4718_v23  ;;  %v3725_v8 = vld [vmem:[#allocation7 + $0x1b4] sm:$0xf]  ;;  %v3287_v22 = vld [vmem:[#allocation7 + $0x1a8] sm:$0xf0]  ;;  %v3279_v53 = vld [vmem:[#allocation7 + $0x198] sm:$0xf0] }
 0x1ca   :  { %1747 = vmatpush.bf16.msrb.mxu1 %v4722_v54  ;;  %v3721_v13 = vld [vmem:[#allocation7 + $0x194] sm:$0xf] }
 0x1cb   :  { %v1555_v16 = vpop.f32.mrf.mxu3  ;;  %v4710_v26 = vpop.f32.mrf.mxu2  ;;  %1622 = vmatmul.bf16.gmra.mxu2 %v4702_v24  ;;  %1694 = vmatmul.bf16.vlgmr.msra.gmra.mxu0 %v4331_v63  ;;  %v4748_v27 = vor.u32 %v3721_v13, %v3279_v53  ;;  %v3335_v13 = vld [vmem:[#allocation7 + $0x208] sm:$0xf0]  ;;  %v5253_v53 = vld [vmem:[#allocation24_spill] sm:$0xff] }
 0x1cc   :  { %v1556_v9 = vadd.f32 %v1555_v16, %v1526_v36  ;;  %v1584_v32 = vpop.f32.mrf.mxu0  ;;  %1946 = vmatpush.bf16.msra.mxu0 %v4479_v0  ;;  %v3295_v0 = vld [vmem:[#allocation7 + $0x1b8] sm:$0xf0]  ;;  %v3739_v36 = vld [vmem:[#allocation7 + $0x224] sm:$0xf]  ;;  %v3351_v16 = vld [vmem:[#allocation7 + $0x228] sm:$0xf0] }
 0x1cd   :  { %1865 = vmatpush.bf16.msrb.mxu2 %v4245_v21  ;;  %v4736_v21 = vor.u32 %v3741_v43, %v3359_v52  ;;  %v5248_v52 = vld [vmem:[#allocation60_spill] sm:$0xff] }
 0x1ce   :  { %v1585_v25 = vadd.f32 %v1584_v32, %v1556_v9  ;;  %v4751_v9 = vor.u32 %v3739_v36, %v3351_v16  ;;  %v3271_v32 = vld [vmem:[#allocation7 + $0x188] sm:$0xf0]  ;;  %v1080_v36 = vrot.slane %v4624_v5, 2  ;;  %v5256_v5 = vld [vmem:[#allocation44_spill] sm:$0xff] }
 0x1cf   :  { %1777 = vmatpush.bf16.msrb.mxu3 %v4736_v21  ;;  %v4755_v34 = vor.u32 %v3719_v3, %v3271_v32  ;;  %v5254_v3 = vld [vmem:[#allocation19_spill] sm:$0xff] }
 0x1d0   :  { %1947 = vmatpush.bf16.msra.mxu0 %v4500_v33  ;;  %v4734_v33 = vor.u32 %v3725_v8, %v3295_v0  ;;  %v5247_v8 = vld [vmem:[#allocation37_spill] sm:$0xff]  ;;  %v3737_v0 = vld [vmem:[#allocation7 + $0x214] sm:$0xf] }
 0x1d1   :  { %1866 = vmatpush.bf16.msrb.mxu2 %v4263_v55  ;;  %v3723_v55 = vld [vmem:[#allocation7 + $0x1a4] sm:$0xf] }
 0x1d2   :  { %1748 = vmatpush.bf16.msrb.mxu1 %v4734_v33  ;;  %v4743_v29 = vor.u32 %v3723_v55, %v3287_v22  ;;  %v5250_v55 = vld [vmem:[#allocation42_spill] sm:$0xff] }
 0x1d3   :  { %v1613_v39 = vpop.f32.mrf.mxu2  ;;  %1778 = vmatpush.bf16.msrb.mxu3 %v4751_v9  ;;  %v5252_v22 = vld [vmem:[#allocation62_spill] sm:$0xff] }
 0x1d4   :  { %v4728_v30 = vadd.f32 %v1613_v39, %v1585_v25  ;;  %1948 = vmatpush.bf16.msra.mxu0 %v4523_v42  ;;  %v5239_v42 = vld [vmem:[#allocation38_spill] sm:$0xff]  ;;  %v5245_v25 = vld [vmem:[#allocation20_spill] sm:$0xff]  ;;  %v5246_v39 = vld [vmem:[#allocation47_spill] sm:$0xff] }
 0x1d6   :  { %1749 = vmatpush.bf16.msrb.mxu1 %v4743_v29 }
 0x1d8   :  { %1641 = vmatmul.bf16.gmra.mxu1 %v4372_v45  ;;  %1665 = vmatmul.bf16.vlgmr.msra.gmra.mxu3 %v5236_v59  ;;  %v3343_v59 = vld [vmem:[#allocation7 + $0x218] sm:$0xf0] }
 0x1d9   :  { %1949 = vmatpush.bf16.msra.mxu0 %v5237_v19  ;;  %v4764_v43 = vor.u32 %v3737_v0, %v3343_v59  ;;  %v5249_v19 = vld [vmem:[#allocation48_spill] sm:$0xff]  ;;  %v4800_v0 = vpop.f32.mrf.mxu1  ;;  %v4802_v59 = vpop.f32.mrf.mxu3 }
 0x1da   :  { %1750 = vmatpush.bf16.msrb.mxu1 %v4748_v27 }
 0x1db   :  { %1699 = vmatmul.bf16.gmra.mxu0 %v5238_v2  ;;  %1723 = vmatmul.bf16.vlgmr.msra.gmra.mxu2 %v5239_v42 }
 0x1dc   :  { %1975 = vmatpush.bf16.msra.mxu2 %v5240_v4  ;;  %1779 = vmatpush.bf16.msrb.mxu3 %v4764_v43  ;;  %v1082_v4 = vrot.slane %v4637_v56, 2  ;;  %v1081_v56 = vsel %vm1066_vm1, %v1080_v36, %v4204_v15 }
 0x1dd   :  { %1950 = vmatpush.bf16.msra.mxu0 %v5241_v47  ;;  %v3735_v47 = vld [vmem:[#allocation7 + $0x204] sm:$0xf] }
 0x1de   :  { %1751 = vmatpush.bf16.msrb.mxu1 %v4755_v34  ;;  %v4776_v16 = vor.u32 %v3735_v47, %v3335_v13  ;;  %v5267_v47 = vld [vmem:[#allocation31_spill] sm:$0xff]  ;;  %v5268_v13 = vld [vmem:[#allocation52_spill] sm:$0xff] }
 0x1e0   :  { %1976 = vmatpush.bf16.msra.mxu2 %v5242_v35  ;;  %1780 = vmatpush.bf16.msrb.mxu3 %v4776_v16  ;;  %v5255_v35 = vld [vmem:[#allocation26_spill] sm:$0xff] }
 0x1e1   :  { %1951 = vmatpush.bf16.msra.mxu0 %v5243_v50  ;;  %v5258_v50 = vld [vmem:[#allocation28_spill] sm:$0xff] }
 0x1e2   :  { %1888 = vmatpush.bf16.msra.mxu1 %v5245_v25  ;;  %v5260_v25 = vld [vmem:[#allocation23_spill] sm:$0xff] }
 0x1e4   :  { %1977 = vmatpush.bf16.msra.mxu2 %v5244_v1  ;;  %1917 = vmatpush.bf16.msra.mxu3 %v5254_v3  ;;  %v5259_v1 = vld [vmem:[#allocation46_spill] sm:$0xff] }
 0x1e5   :  { %1952 = vmatpush.bf16.msra.mxu0 %v4574_v46  ;;  %v5251_v46 = vld [vmem:[#allocation22_spill] sm:$0xff] }
 0x1e6   :  { %1889 = vmatpush.bf16.msra.mxu1 %v5251_v46  ;;  %v5264_v46 = vld [vmem:[#allocation27_spill] sm:$0xff] }
 0x1e8   :  { %1646 = vmatmul.bf16.gmra.mxu1 %v5246_v39  ;;  %1670 = vmatmul.bf16.gmra.mxu3 %v5247_v8  ;;  %v5263_v8 = vld [vmem:[#allocation32_spill] sm:$0xff] }
 0x1e9   :  { %1978 = vmatpush.bf16.msra.mxu2 %v5248_v52  ;;  %1953 = vmatpush.bf16.msra.mxu0 %v4588_v62  ;;  %v1083_v62 = vsel %vm1066_vm1, %v1082_v4, %v4204_v15  ;;  %v5261_v15 = vld [vmem:[#allocation30_spill] sm:$0xff]  ;;  %v4804_v52 = vpop.f32.mrf.mxu0  ;;  %v5266_v4 = vld [vmem:[#allocation39_spill] sm:$0xff] }
 0x1ea   :  { %1890 = vmatpush.bf16.msra.mxu1 %v5253_v53  ;;  %v4787_v32 = vpack.c.bf16 %v1083_v62, %v1081_v56  ;;  %v5270_v56 = vld [vmem:[#allocation56_spill] sm:$0xff] }
 0x1eb   :  { %1704 = vmatmul.bf16.gmra.mxu0 %v5249_v19  ;;  %1728 = vmatmul.bf16.gmra.mxu2 %v5250_v55 }
 0x1ed   :  { %1979 = vmatpush.bf16.msra.mxu2 %v5252_v22  ;;  %v4808_v22 = vpop.f32.mrf.mxu2 }
 0x1ee   :  { %1891 = vmatpush.bf16.msra.mxu1 %v5255_v35  ;;  %v5269_v35 = vld [vmem:[#allocation33_spill] sm:$0xff] }
 0x1f1   :  { %1980 = vmatpush.bf16.msra.mxu2 %v4592_v11  ;;  %v5257_v11 = vld [vmem:[#allocation21_spill] sm:$0xff] }
 0x1f2   :  { %1918 = vmatpush.bf16.msra.mxu3 %v5257_v11  ;;  %1892 = vmatpush.bf16.msra.mxu1 %v5258_v50  ;;  %v5271_v50 = vld [vmem:[#allocation35_spill] sm:$0xff] }
 0x1f5   :  { %1981 = vmatpush.bf16.msra.mxu2 %v4601_v61  ;;  %v5262_v61 = vld [vmem:[#allocation25_spill] sm:$0xff]  ;;  %v1531_v53 = vpop.f32.mrf.mxu1 }
 0x1f6   :  { %1919 = vmatpush.bf16.msra.mxu3 %v5260_v25  ;;  %1893 = vmatpush.bf16.msra.mxu1 %v5261_v15  ;;  %v5272_v25 = vld [vmem:[#allocation57_spill] sm:$0xff]  ;;  %v5273_v15 = vld [vmem:[#allocation63_spill] sm:$0xff] }
 0x1f8   :  { %1651 = vmatmul.bf16.gmra.mxu1 %v4787_v32  ;;  %1675 = vmatmul.bf16.gmra.mxu3 %v5256_v5  ;;  %v1589_v3 = vpop.f32.mrf.mxu0 }
 0x1f9   :  { %1982 = vmatpush.bf16.msra.mxu2 %v4622_v60  ;;  %v5265_v60 = vld [vmem:[#allocation34_spill] sm:$0xff] }
 0x1fa   :  { %1920 = vmatpush.bf16.msra.mxu3 %v5262_v61  ;;  %1894 = vmatpush.bf16.msra.mxu1 %v5263_v8  ;;  %v5275_v61 = vld [vmem:[#allocation49_spill] sm:$0xff] }
 0x1fb   :  { %1709 = vmatmul.bf16.gmra.mxu0 %v4690_v57  ;;  %1733 = vmatmul.bf16.gmra.mxu2 %v5259_v1  ;;  %v5276_v8 = vld [vmem:[#allocation65_spill] sm:$0xff] }
 0x1fe   :  { %1921 = vmatpush.bf16.msra.mxu3 %v5264_v46  ;;  %1895 = vmatpush.bf16.msra.mxu1 %v5265_v60  ;;  %v5280_v46 = vld [vmem:[#allocation61_spill] sm:$0xff] }
 0x202   :  { %1922 = vmatpush.bf16.msra.mxu3 %v5267_v47 }
 0x206   :  { %1923 = vmatpush.bf16.msra.mxu3 %v5269_v35 }
 0x208   :  { %1680 = vmatmul.bf16.gmra.mxu3 %v4645_v14  ;;  %1752 = vmatmul.bf16.vlgmr.msrb.gmra.mxu1 %v5266_v4 }
 0x209   :  { %2004 = vmatpush.bf16.msrb.mxu1 %v5268_v13 }
 0x20a   :  { %1924 = vmatpush.bf16.msra.mxu3 %v5271_v50 }
 0x20b   :  { %v1560_v36 = vpop.f32.mrf.mxu3  ;;  %1738 = vmatmul.bf16.gmra.mxu2 %v4654_v41  ;;  %1838 = vmatmul.bf16.vlgmr.msrb.gmra.mxu0 %v4331_v63 }
 0x20c   :  { %v1561_v62 = vadd.f32 %v1560_v36, %v1531_v53  ;;  %2062 = vmatpush.bf16.msrb.mxu0 %v4667_v44  ;;  %v5274_v44 = vld [vmem:[#allocation43_spill] sm:$0xff] }
 0x20d   :  { %2005 = vmatpush.bf16.msrb.mxu1 %v5270_v56 }
 0x20e   :  { %v1590_v14 = vadd.f32 %v1589_v3, %v1561_v62  ;;  %v1618_v5 = vpop.f32.mrf.mxu2 }
 0x210   :  { %v4819_v11 = vadd.f32 %v1618_v5, %v1590_v14  ;;  %2063 = vmatpush.bf16.msrb.mxu0 %v4673_v37  ;;  %v5277_v37 = vld [vmem:[#allocation54_spill] sm:$0xff] }
 0x211   :  { %2006 = vmatpush.bf16.msrb.mxu1 %v5272_v25  ;;  %v5284_v25 = vld [vmem:[#allocation41_spill] sm:$0xff] }
 0x214   :  { %2064 = vmatpush.bf16.msrb.mxu0 %v4715_v28  ;;  %v5278_v28 = vld [vmem:[#allocation59_spill] sm:$0xff] }
 0x215   :  { %2007 = vmatpush.bf16.msrb.mxu1 %v5273_v15 }
 0x218   :  { %1757 = vmatmul.bf16.gmra.mxu1 %v5274_v44  ;;  %1781 = vmatmul.bf16.vlgmr.msrb.gmra.mxu3 %v4219_v40 }
 0x219   :  { %2033 = vmatpush.bf16.msrb.mxu3 %v5275_v61  ;;  %2065 = vmatpush.bf16.msrb.mxu0 %v4722_v54  ;;  %v5279_v54 = vld [vmem:[#allocation67_spill] sm:$0xff] }
 0x21a   :  { %2008 = vmatpush.bf16.msrb.mxu1 %v5276_v8 }
 0x21b   :  { %1843 = vmatmul.bf16.gmra.mxu0 %v5238_v2  ;;  %1867 = vmatmul.bf16.vlgmr.msrb.gmra.mxu2 %v5239_v42 }
 0x21c   :  { %2091 = vmatpush.bf16.msrb.mxu2 %v4656_v49  ;;  %v5281_v49 = vld [vmem:[#allocation50_spill] sm:$0xff] }
 0x21d   :  { %2034 = vmatpush.bf16.msrb.mxu3 %v5277_v37  ;;  %2066 = vmatpush.bf16.msrb.mxu0 %v4734_v33 }
 0x21e   :  { %2009 = vmatpush.bf16.msrb.mxu1 %v4569_v18  ;;  %v5282_v18 = vld [vmem:[#allocation68_spill] sm:$0xff] }
 0x220   :  { %2092 = vmatpush.bf16.msrb.mxu2 %v4670_v17  ;;  %v4852_v17 = vpop.f32.mrf.mxu1 }
 0x221   :  { %2035 = vmatpush.bf16.msrb.mxu3 %v5278_v28  ;;  %2067 = vmatpush.bf16.msrb.mxu0 %v4743_v29  ;;  %v4869_v29 = vpop.f32.mrf.mxu2 }
 0x222   :  { %2010 = vmatpush.bf16.msrb.mxu1 %v5279_v54 }
 0x224   :  { %2093 = vmatpush.bf16.msrb.mxu2 %v4704_v7 }
 0x225   :  { %2036 = vmatpush.bf16.msrb.mxu3 %v5280_v46  ;;  %2068 = vmatpush.bf16.msrb.mxu0 %v4748_v27 }
 0x226   :  { %2011 = vmatpush.bf16.msrb.mxu1 %v4603_v10  ;;  %v4856_v10 = vpop.f32.mrf.mxu0 }
 0x228   :  { %1762 = vmatmul.bf16.gmra.mxu1 %v5281_v49  ;;  %1786 = vmatmul.bf16.gmra.mxu3 %v4372_v45 }
 0x229   :  { %2094 = vmatpush.bf16.msrb.mxu2 %v4718_v23  ;;  %2037 = vmatpush.bf16.msrb.mxu3 %v5282_v18 }
 0x22a   :  { %2069 = vmatpush.bf16.msrb.mxu0 %v4755_v34  ;;  %v5283_v34 = vld [vmem:[#allocation29_spill] sm:$0xff] }
 0x22b   :  { %1848 = vmatmul.bf16.gmra.mxu0 %v5249_v19  ;;  %1872 = vmatmul.bf16.gmra.mxu2 %v5250_v55 }
 0x22d   :  { %2095 = vmatpush.bf16.msrb.mxu2 %v4736_v21  ;;  %2038 = vmatpush.bf16.msrb.mxu3 %v4596_v48  ;;  %v4867_v21 = vpop.f32.mrf.mxu3 }
 0x231   :  { %2096 = vmatpush.bf16.msrb.mxu2 %v4751_v9  ;;  %2039 = vmatpush.bf16.msrb.mxu3 %v4616_v51 }
 0x235   :  { %v1536_v7 = vpop.f32.mrf.mxu1  ;;  %2097 = vmatpush.bf16.msrb.mxu2 %v4764_v43  ;;  %2040 = vmatpush.bf16.msrb.mxu3 %v4639_v58 }
 0x238   :  { %v1594_v23 = vpop.f32.mrf.mxu0  ;;  %1767 = vmatmul.bf16.gmra.mxu1 %v4702_v24  ;;  %1791 = vmatmul.bf16.gmra.mxu3 %v5246_v39 }
 0x239   :  { %2098 = vmatpush.bf16.msrb.mxu2 %v4776_v16 }
 0x23b   :  { %1853 = vmatmul.bf16.gmra.mxu0 %v4690_v57  ;;  %1877 = vmatmul.bf16.gmra.mxu2 %v5259_v1 }
 0x23d   :  { %v1538_v48 = vpop.f32.mrf.mxu1 }
 0x240   :  { %v1596_v33 = vpop.f32.mrf.mxu0 }
 0x245   :  { %v1637_v51 = vpop.f32.mrf.mxu1 }
 0x246   :  { %v4872_v58 = vadd.f32 %v1637_v51, %v4684_v38 }
 0x248   :  { %v1695_v27 = vpop.f32.mrf.mxu0  ;;  %1796 = vmatmul.bf16.gmra.mxu3 %v4787_v32  ;;  %1896 = vmatmul.bf16.vlgmr.msra.gmra.mxu1 %v5266_v4 }
 0x24b   :  { %v1565_v9 = vpop.f32.mrf.mxu3  ;;  %1882 = vmatmul.bf16.gmra.mxu2 %v4654_v41  ;;  %1954 = vmatmul.bf16.vlgmr.msra.gmra.mxu0 %v5283_v34 }
 0x24c   :  { %v1566_v43 = vadd.f32 %v1565_v9, %v1536_v7 }
 0x24d   :  { %v4878_v16 = vpop.f32.mrf.mxu1 }
 0x24e   :  { %v1595_v60 = vadd.f32 %v1594_v23, %v1566_v43  ;;  %v1623_v47 = vpop.f32.mrf.mxu2 }
 0x250   :  { %v1624_v13 = vadd.f32 %v1623_v47, %v1595_v60  ;;  %v1697_v53 = vpop.f32.mrf.mxu0 }
 0x253   :  { %v1567_v36 = vpop.f32.mrf.mxu3 }
 0x254   :  { %v1568_v38 = vadd.f32 %v1567_v36, %v1538_v48 }
 0x255   :  { %v1642_v62 = vpop.f32.mrf.mxu1 }
 0x256   :  { %v4881_v3 = vadd.f32 %v1642_v62, %v4728_v30  ;;  %v1597_v35 = vadd.f32 %v1596_v33, %v1568_v38  ;;  %v1625_v56 = vpop.f32.mrf.mxu2  ;;  %v5285_v33 = vld [vmem:[#allocation53_spill] sm:$0xff] }
 0x258   :  { %v1626_v14 = vadd.f32 %v1625_v56, %v1597_v35  ;;  %v1700_v5 = vpop.f32.mrf.mxu0  ;;  %1901 = vmatmul.bf16.gmra.mxu1 %v5274_v44  ;;  %1925 = vmatmul.bf16.vlgmr.msra.gmra.mxu3 %v4219_v40 }
 0x25b   :  { %v1666_v50 = vpop.f32.mrf.mxu3  ;;  %1959 = vmatmul.bf16.gmra.mxu0 %v5284_v25  ;;  %1983 = vmatmul.bf16.vlgmr.msra.gmra.mxu2 %v4331_v63 }
 0x25c   :  { %v1696_v15 = vadd.f32 %v1695_v27, %v1666_v50 }
 0x25d   :  { %v4887_v61 = vpop.f32.mrf.mxu1 }
 0x25e   :  { %v1724_v8 = vpop.f32.mrf.mxu2 }
 0x25f   :  { %v1725_v37 = vadd.f32 %v1724_v8, %v1696_v15 }
 0x260   :  { %v1702_v30 = vpop.f32.mrf.mxu0 }
 0x263   :  { %v1668_v28 = vpop.f32.mrf.mxu3 }
 0x264   :  { %v1698_v54 = vadd.f32 %v1697_v53, %v1668_v28 }
 0x265   :  { %v1647_v46 = vpop.f32.mrf.mxu1 }
 0x266   :  { %v4890_v18 = vadd.f32 %v1647_v46, %v4819_v11  ;;  %v1726_v7 = vpop.f32.mrf.mxu2 }
 0x267   :  { %v4892_v23 = vadd.f32 %v1726_v7, %v1698_v54 }
 0x268   :  { %v1705_v48 = vpop.f32.mrf.mxu0  ;;  %1906 = vmatmul.bf16.gmra.mxu1 %v5281_v49  ;;  %1930 = vmatmul.bf16.gmra.mxu3 %v4372_v45 }
 0x26b   :  { %v1671_v63 = vpop.f32.mrf.mxu3  ;;  %1964 = vmatmul.bf16.gmra.mxu0 %v5285_v33  ;;  %1988 = vmatmul.bf16.gmra.mxu2 %v5238_v2 }
 0x26c   :  { %v1701_v51 = vadd.f32 %v1700_v5, %v1671_v63 }
 0x26d   :  { %v4898_v27 = vpop.f32.mrf.mxu1 }
 0x26e   :  { %v1729_v9 = vpop.f32.mrf.mxu2 }
 0x26f   :  { %v1730_v43 = vadd.f32 %v1729_v9, %v1701_v51 }
 0x270   :  { %v1707_v11 = vpop.f32.mrf.mxu0 }
 0x273   :  { %v1673_v60 = vpop.f32.mrf.mxu3 }
 0x274   :  { %v1703_v47 = vadd.f32 %v1702_v30, %v1673_v60 }
 0x275   :  { %v1652_v53 = vpop.f32.mrf.mxu1 }
 0x276   :  { %v4900_v36 = vadd.f32 %v1652_v53, %v1624_v13  ;;  %v1731_v38 = vpop.f32.mrf.mxu2 }
 0x277   :  { %v4902_v62 = vadd.f32 %v1731_v38, %v1703_v47 }
 0x278   :  { %v1710_v35 = vpop.f32.mrf.mxu0  ;;  %1911 = vmatmul.bf16.gmra.mxu1 %v4702_v24  ;;  %1935 = vmatmul.bf16.gmra.mxu3 %v5246_v39 }
 0x27b   :  { %v1676_v2 = vpop.f32.mrf.mxu3  ;;  %1969 = vmatmul.bf16.gmra.mxu0 %v4708_v31  ;;  %1993 = vmatmul.bf16.gmra.mxu2 %v5249_v19 }
 0x27c   :  { %v1706_v56 = vadd.f32 %v1705_v48, %v1676_v2 }
 0x27d   :  { %v1654_v5 = vpop.f32.mrf.mxu1 }
 0x27e   :  { %v4908_v50 = vadd.f32 %v1654_v5, %v1626_v14  ;;  %v1734_v15 = vpop.f32.mrf.mxu2 }
 0x27f   :  { %v1735_v13 = vadd.f32 %v1734_v15, %v1706_v56 }
 0x280   :  { %v1712_v8 = vpop.f32.mrf.mxu0 }
 0x283   :  { %v1678_v30 = vpop.f32.mrf.mxu3 }
 0x284   :  { %v1708_v28 = vadd.f32 %v1707_v11, %v1678_v30 }
 0x285   :  { %v1753_v54 = vpop.f32.mrf.mxu1 }
 0x286   :  { %v1754_v46 = vadd.f32 %v1753_v54, %v1725_v37  ;;  %v1736_v7 = vpop.f32.mrf.mxu2 }
 0x287   :  { %v1737_v63 = vadd.f32 %v1736_v7, %v1708_v28 }
 0x288   :  { %v1839_v51 = vpop.f32.mrf.mxu0  ;;  %1940 = vmatmul.bf16.gmra.mxu3 %v4787_v32  ;;  %2012 = vmatmul.bf16.vlgmr.msrb.gmra.mxu1 %v5239_v42 }
 0x28b   :  { %v1681_v9 = vpop.f32.mrf.mxu3  ;;  %1998 = vmatmul.bf16.gmra.mxu2 %v4690_v57  ;;  %2070 = vmatmul.bf16.vlgmr.msrb.gmra.mxu0 %v4219_v40 }
 0x28c   :  { %v1711_v19 = vadd.f32 %v1710_v35, %v1681_v9 }
 0x28d   :  { %v4914_v14 = vpop.f32.mrf.mxu1 }
 0x28e   :  { %v1739_v48 = vpop.f32.mrf.mxu2 }
 0x28f   :  { %v1740_v60 = vadd.f32 %v1739_v48, %v1711_v19 }
 0x290   :  { %v4916_v11 = vpop.f32.mrf.mxu0 }
 0x293   :  { %v1683_v37 = vpop.f32.mrf.mxu3 }
 0x294   :  { %v1713_v47 = vadd.f32 %v1712_v8, %v1683_v37 }
 0x295   :  { %v1758_v53 = vpop.f32.mrf.mxu1 }
 0x296   :  { %v1759_v38 = vadd.f32 %v1758_v53, %v1730_v43  ;;  %v1741_v2 = vpop.f32.mrf.mxu2 }
 0x297   :  { %v1742_v56 = vadd.f32 %v1741_v2, %v1713_v47 }
 0x298   :  { %v1844_v5 = vpop.f32.mrf.mxu0  ;;  %2017 = vmatmul.bf16.gmra.mxu1 %v5250_v55  ;;  %2041 = vmatmul.bf16.vlgmr.msrb.gmra.mxu3 %v5266_v4 }
 0x29b   :  { %v1782_v57 = vpop.f32.mrf.mxu3  ;;  %2075 = vmatmul.bf16.gmra.mxu0 %v4372_v45  ;;  %2099 = vmatmul.bf16.vlgmr.msrb.gmra.mxu2 %v5283_v34 }
 0x29c   :  { %v4922_v40 = vadd.f32 %v1782_v57, %v1754_v46 }
 0x29d   :  { %v4924_v42 = vpop.f32.mrf.mxu1 }
 0x29e   :  { %v1868_v35 = vpop.f32.mrf.mxu2 }
 0x29f   :  { %v1869_v15 = vadd.f32 %v1868_v35, %v1839_v51 }
 0x2a0   :  { %v1846_v8 = vpop.f32.mrf.mxu0 }
 0x2a3   :  { %v4926_v43 = vpop.f32.mrf.mxu3 }
 0x2a5   :  { %v1763_v30 = vpop.f32.mrf.mxu1 }
 0x2a6   :  { %v1764_v28 = vadd.f32 %v1763_v30, %v1735_v13  ;;  %v1870_v54 = vpop.f32.mrf.mxu2 }
 0x2a8   :  { %v1849_v55 = vpop.f32.mrf.mxu0  ;;  %2022 = vmatmul.bf16.gmra.mxu1 %v5259_v1  ;;  %2046 = vmatmul.bf16.gmra.mxu3 %v5274_v44 }
 0x2ab   :  { %v1787_v45 = vpop.f32.mrf.mxu3  ;;  %2080 = vmatmul.bf16.gmra.mxu0 %v5246_v39  ;;  %2104 = vmatmul.bf16.gmra.mxu2 %v5284_v25 }
 0x2ac   :  { %v4932_v4 = vadd.f32 %v1787_v45, %v1759_v38 }
 0x2ad   :  { %v1765_v34 = vpop.f32.mrf.mxu1 }
 0x2ae   :  { %v1766_v46 = vadd.f32 %v1765_v34, %v1737_v63  ;;  %v1873_v7 = vpop.f32.mrf.mxu2 }
 0x2af   :  { %v1874_v51 = vadd.f32 %v1873_v7, %v1844_v5 }
 0x2b0   :  { %v1851_v9 = vpop.f32.mrf.mxu0 }
 0x2b3   :  { %v4934_v19 = vpop.f32.mrf.mxu3 }
 0x2b5   :  { %v1768_v13 = vpop.f32.mrf.mxu1 }
 0x2b6   :  { %v1769_v48 = vadd.f32 %v1768_v13, %v1740_v60  ;;  %v1875_v37 = vpop.f32.mrf.mxu2 }
 0x2b8   :  { %v1854_v1 = vpop.f32.mrf.mxu0  ;;  %2027 = vmatmul.bf16.gmra.mxu1 %v4654_v41  ;;  %2051 = vmatmul.bf16.gmra.mxu3 %v5281_v49 }
 0x2bb   :  { %v1792_v39 = vpop.f32.mrf.mxu3  ;;  %2085 = vmatmul.bf16.gmra.mxu0 %v4787_v32  ;;  %2109 = vmatmul.bf16.gmra.mxu2 %v5285_v33 }
 0x2bc   :  { %v4940_v44 = vadd.f32 %v1792_v39, %v1764_v28 }
 0x2bd   :  { %v1770_v25 = vpop.f32.mrf.mxu1 }
 0x2be   :  { %v1771_v63 = vadd.f32 %v1770_v25, %v1742_v56  ;;  %v1878_v47 = vpop.f32.mrf.mxu2  ;;  %v1876_v25 = vadd.f32 %v1875_v37, %v1846_v8 }
 0x2bf   :  { %v1879_v53 = vadd.f32 %v1878_v47, %v1849_v55 }
 0x2c0   :  { %v1856_v38 = vpop.f32.mrf.mxu0 }
 0x2c3   :  { %v1794_v2 = vpop.f32.mrf.mxu3 }
 0x2c4   :  { %v4942_v60 = vadd.f32 %v1794_v2, %v1766_v46 }
 0x2c5   :  { %v1897_v5 = vpop.f32.mrf.mxu1 }
 0x2c6   :  { %v1898_v57 = vadd.f32 %v1897_v5, %v1869_v15  ;;  %v1880_v41 = vpop.f32.mrf.mxu2 }
 0x2c7   :  { %v1881_v35 = vadd.f32 %v1880_v41, %v1851_v9 }
 0x2c8   :  { %v1955_v49 = vpop.f32.mrf.mxu0  ;;  %2056 = vmatmul.bf16.gmra.mxu3 %v4702_v24 }
 0x2cb   :  { %v1797_v32 = vpop.f32.mrf.mxu3  ;;  %2114 = vmatmul.bf16.gmra.mxu2 %v4708_v31 }
 0x2cc   :  { %v4946_v33 = vadd.f32 %v1797_v32, %v1769_v48 }
 0x2cd   :  { %v1899_v30 = vpop.f32.mrf.mxu1 }
 0x2ce   :  { %v1883_v56 = vpop.f32.mrf.mxu2 }
 0x2cf   :  { %v1884_v28 = vadd.f32 %v1883_v56, %v1854_v1  ;;  %v1553_v1 = vadd.f32 %v4681_v6, %v4675_v20 }
 0x2d0   :  { %v1957_v55 = vpop.f32.mrf.mxu0 }
 0x2d3   :  { %v1799_v45 = vpop.f32.mrf.mxu3 }
 0x2d4   :  { %v4948_v34 = vadd.f32 %v1799_v45, %v1771_v63  ;;  %v1871_v63 = vadd.f32 %v1870_v54, %v4916_v11 }
 0x2d5   :  { %v1902_v46 = vpop.f32.mrf.mxu1 }
 0x2d6   :  { %v1903_v7 = vadd.f32 %v1902_v46, %v1874_v51  ;;  %v1885_v15 = vpop.f32.mrf.mxu2  ;;  %v1900_v41 = vadd.f32 %v1899_v30, %v1871_v63 }
 0x2d7   :  { %v1886_v13 = vadd.f32 %v1885_v15, %v1856_v38  ;;  %v1582_v38 = vadd.f32 %v4686_v12, %v1553_v1 }
 0x2d8   :  { %v1960_v9 = vpop.f32.mrf.mxu0 }
 0x2d9   :  { %v1611_v37 = vadd.f32 %v4710_v26, %v1582_v38  ;;  %v1558_v26 = vadd.f32 %v4802_v59, %v4800_v0 }
 0x2db   :  { %v1926_v39 = vpop.f32.mrf.mxu3  ;;  %v4962_v32 = vadd.f32 %v4878_v16, %v1611_v37 }
 0x2dc   :  { %v1927_v24 = vadd.f32 %v1926_v39, %v1898_v57  ;;  %v1587_v39 = vadd.f32 %v4804_v52, %v1558_v26  ;;  %v1563_v52 = vadd.f32 %v4867_v21, %v4852_v17 }
 0x2dd   :  { %v1904_v47 = vpop.f32.mrf.mxu1 }
 0x2de   :  { %v4950_v2 = vadd.f32 %v1955_v49, %v1927_v24  ;;  %v1905_v31 = vadd.f32 %v1904_v47, %v1876_v25  ;;  %v4952_v48 = vpop.f32.mrf.mxu2  ;;  %v1616_v24 = vadd.f32 %v4808_v22, %v1587_v39 }
 0x2e0   :  { %v2120_v51 = vmax.f32 %v4872_v58, %v4950_v2  ;;  %v1962_v5 = vpop.f32.mrf.mxu0  ;;  %v4981_v1 = vadd.f32 %v4887_v61, %v1616_v24  ;;  %v3755_v58 = vld [vmem:[#allocation8 + $0x20] sm:$0xff] }
 0x2e3   :  { %v1928_v8 = vpop.f32.mrf.mxu3 }
 0x2e4   :  { %v1929_v57 = vadd.f32 %v1928_v8, %v1900_v41 }
 0x2e5   :  { %v1907_v49 = vpop.f32.mrf.mxu1 }
 0x2e6   :  { %v4964_v56 = vadd.f32 %v1957_v55, %v1929_v57  ;;  %v1908_v20 = vadd.f32 %v1907_v49, %v1879_v53  ;;  %v4966_v6 = vpop.f32.mrf.mxu2 }
 0x2e8   :  { %v2122_v11 = vmax.f32 %v4962_v32, %v4964_v56  ;;  %v1965_v54 = vpop.f32.mrf.mxu0 }
 0x2eb   :  { %v1931_v45 = vpop.f32.mrf.mxu3 }
 0x2ec   :  { %v1932_v12 = vadd.f32 %v1931_v45, %v1903_v7 }
 0x2ed   :  { %v1909_v30 = vpop.f32.mrf.mxu1 }
 0x2ee   :  { %v4972_v46 = vadd.f32 %v1960_v9, %v1932_v12  ;;  %v1910_v15 = vadd.f32 %v1909_v30, %v1881_v35  ;;  %v4974_v16 = vpop.f32.mrf.mxu2 }
 0x2f0   :  { %v2124_v53 = vmax.f32 %v4881_v3, %v4972_v46  ;;  %v1967_v55 = vpop.f32.mrf.mxu0  ;;  %v1761_v3 = vadd.f32 %v4924_v42, %v4902_v62 }
 0x2f3   :  { %v1933_v25 = vpop.f32.mrf.mxu3 }
 0x2f4   :  { %v1934_v47 = vadd.f32 %v1933_v25, %v1905_v31 }
 0x2f5   :  { %v1912_v7 = vpop.f32.mrf.mxu1 }
 0x2f6   :  { %v4983_v0 = vadd.f32 %v1962_v5, %v1934_v47  ;;  %v1913_v59 = vadd.f32 %v1912_v7, %v1884_v28  ;;  %v4985_v35 = vpop.f32.mrf.mxu2  ;;  %v1592_v5 = vadd.f32 %v4856_v10, %v1563_v52  ;;  %v3758_v47 = vld [vmem:[#allocation8 + $0x38] sm:$0xff] }
 0x2f7   :  { %v3766_v7 = vld [vmem:[#allocation8 + $0x78] sm:$0xff]  ;;  %2583 = vmatpush.bf16.msra.mxu1 %v3758_v47 }
 0x2f8   :  { %v2126_v9 = vmax.f32 %v4981_v1, %v4983_v0  ;;  %v1970_v63 = vpop.f32.mrf.mxu0  ;;  %v1621_v57 = vadd.f32 %v4869_v29, %v1592_v5  ;;  %2596 = vmatpush.bf16.msra.mxu3 %v3766_v7  ;;  %v3765_v5 = vld [vmem:[#allocation8 + $0x70] sm:$0xff] }
 0x2fa   :  { %v5000_v12 = vadd.f32 %v4898_v27, %v1621_v57 }
 0x2fb   :  { %v1936_v38 = vpop.f32.mrf.mxu3 }
 0x2fc   :  { %v1937_v41 = vadd.f32 %v1936_v38, %v1908_v20  ;;  %2597 = vmatpush.bf16.msra.mxu3 %v3765_v5 }
 0x2fd   :  { %v1914_v22 = vpop.f32.mrf.mxu1 }
 0x2fe   :  { %v4991_v31 = vadd.f32 %v1965_v54, %v1937_v41  ;;  %v1915_v8 = vadd.f32 %v1914_v22, %v1886_v13  ;;  %v4993_v61 = vpop.f32.mrf.mxu2  ;;  %v3757_v41 = vld [vmem:[#allocation8 + $0x30] sm:$0xff]  ;;  %v3782_v22 = vld [vmem:[#allocation8 + $0xf8] sm:$0xff] }
 0x2ff   :  { %2584 = vmatpush.bf16.msra.mxu1 %v3757_v41  ;;  %2622 = vmatpush.bf16.msra.mxu2 %v3782_v22  ;;  %v3773_v41 = vld [vmem:[#allocation8 + $0xb0] sm:$0xff] }
 0x300   :  { %v2128_v28 = vmax.f32 %v4890_v18, %v4991_v31  ;;  %v1972_v45 = vpop.f32.mrf.mxu0 }
 0x303   :  { %v1938_v37 = vpop.f32.mrf.mxu3 }
 0x304   :  { %v1939_v49 = vadd.f32 %v1938_v37, %v1910_v15 }
 0x305   :  { %v2013_v20 = vpop.f32.mrf.mxu1 }
 0x306   :  { %v5002_v17 = vadd.f32 %v1967_v55, %v1939_v49  ;;  %v5004_v21 = vpop.f32.mrf.mxu2  ;;  %v2014_v38 = vadd.f32 %v2013_v20, %v4952_v48  ;;  %v3756_v20 = vld [vmem:[#allocation8 + $0x28] sm:$0xff] }
 0x307   :  { %2585 = vmatpush.bf16.msra.mxu1 %v3756_v20 }
 0x308   :  { %v2130_v13 = vmax.f32 %v5000_v12, %v5002_v17  ;;  %v2071_v29 = vpop.f32.mrf.mxu0 }
 0x30b   :  { %v1941_v10 = vpop.f32.mrf.mxu3  ;;  %2586 = vmatpush.bf16.msra.mxu1 %v3755_v58 }
 0x30c   :  { %v1942_v54 = vadd.f32 %v1941_v10, %v1913_v59 }
 0x30d   :  { %v2015_v27 = vpop.f32.mrf.mxu1 }
 0x30e   :  { %v5008_v30 = vadd.f32 %v1970_v63, %v1942_v54  ;;  %v5010_v26 = vpop.f32.mrf.mxu2  ;;  %v2016_v54 = vadd.f32 %v2015_v27, %v4966_v6 }
 0x310   :  { %v2132_v15 = vmax.f32 %v4900_v36, %v5008_v30  ;;  %v2073_v63 = vpop.f32.mrf.mxu0  ;;  %v3798_v36 = vld [vmem:[#allocation10 + $0x38] sm:$0xff] }
 0x313   :  { %v1943_v39 = vpop.f32.mrf.mxu3 }
 0x314   :  { %v1944_v55 = vadd.f32 %v1943_v39, %v1915_v8  ;;  %v3774_v8 = vld [vmem:[#allocation8 + $0xb8] sm:$0xff] }
 0x315   :  { %v2018_v57 = vpop.f32.mrf.mxu1  ;;  %2609 = vmatpush.bf16.msra.mxu0 %v3774_v8  ;;  %v3780_v8 = vld [vmem:[#allocation8 + $0xe8] sm:$0xff] }
 0x316   :  { %v5014_v25 = vadd.f32 %v1972_v45, %v1944_v55  ;;  %v5016_v24 = vpop.f32.mrf.mxu2 }
 0x318   :  { %v2134_v59 = vmax.f32 %v4908_v50, %v5014_v25  ;;  %v2076_v55 = vpop.f32.mrf.mxu0 }
 0x319   :  { %2610 = vmatpush.bf16.msra.mxu0 %v3773_v41 }
 0x31b   :  { %v2042_v52 = vpop.f32.mrf.mxu3 }
 0x31c   :  { %v2043_v37 = vadd.f32 %v2042_v52, %v2014_v38  ;;  %v3781_v38 = vld [vmem:[#allocation8 + $0xf0] sm:$0xff]  ;;  %v3764_v52 = vld [vmem:[#allocation8 + $0x68] sm:$0xff] }
 0x31d   :  { %2623 = vmatpush.bf16.msra.mxu2 %v3781_v38  ;;  %2598 = vmatpush.bf16.msra.mxu3 %v3764_v52  ;;  %v2020_v22 = vpop.f32.mrf.mxu1 }
 0x31e   :  { %v2072_v49 = vadd.f32 %v2071_v29, %v2043_v37  ;;  %v2100_v45 = vpop.f32.mrf.mxu2  ;;  %v5029_v29 = vld [vmem:[%s5118_s4] ss:$0 sm:$0xff]  ;;  %v2019_v37 = vadd.f32 %v2018_v57, %v4974_v16  ;;  %v3753_v57 = vld [vmem:[#allocation8 + $0x10] sm:$0xff]  ;;  %v2021_v41 = vadd.f32 %v2020_v22, %v4985_v35  ;;  %v3762_v35 = vld [vmem:[#allocation8 + $0x58] sm:$0xff] }
 0x31f   :  { %v3771_v22 = vld [vmem:[#allocation8 + $0xa0] sm:$0xff] }
 0x320   :  { %v2101_v10 = vadd.f32 %v2100_v45, %v2072_v49  ;;  %v3763_v49 = vld [vmem:[#allocation8 + $0x60] sm:$0xff] }
 0x321   :  { %2624 = vmatpush.bf16.msra.mxu2 %v3780_v8  ;;  %2599 = vmatpush.bf16.msra.mxu3 %v3763_v49  ;;  %v3779_v49 = vld [vmem:[#allocation8 + $0xe0] sm:$0xff] }
 0x322   :  { %v2121_v39 = vmax.f32 %v4922_v40, %v2101_v10  ;;  %v1756_v40 = vadd.f32 %v4914_v14, %v4892_v23  ;;  %v3772_v10 = vld [vmem:[#allocation8 + $0xa8] sm:$0xff]  ;;  %v2078_v14 = vpop.f32.mrf.mxu0 }
 0x323   :  { %v2044_v48 = vpop.f32.mrf.mxu3  ;;  %2611 = vmatpush.bf16.msra.mxu0 %v3772_v10 }
 0x324   :  { %v2136_v47 = vmax.f32 %v2120_v51, %v2121_v39  ;;  %v2045_v7 = vadd.f32 %v2044_v48, %v2016_v54  ;;  %v1785_v51 = vadd.f32 %v4926_v43, %v1756_v40  ;;  %v3754_v54 = vld [vmem:[#allocation8 + $0x18] sm:$0xff] }
 0x325   :  { %2587 = vmatpush.bf16.msra.mxu1 %v3754_v54  ;;  %v2023_v38 = vpop.f32.mrf.mxu1  ;;  %2625 = vmatpush.bf16.msra.mxu2 %v3779_v49 }
 0x326   :  { %v2074_v6 = vadd.f32 %v2073_v63, %v2045_v7  ;;  %v2102_v27 = vpop.f32.mrf.mxu2  ;;  %v2148_v5 = vadd.f32 %v5029_v29, %v2136_v47  ;;  %2600 = vmatpush.bf16.msra.mxu3 %v3762_v35 }
 0x327   :  { %2612 = vmatpush.bf16.msra.mxu0 %v3771_v22  ;;  %v3760_v22 = vld [vmem:[#allocation8 + $0x48] sm:$0xff] }
 0x328   :  { %v2103_v2 = vadd.f32 %v2102_v27, %v2074_v6  ;;  %v2156_v23 = vmax.f32 %v2148_v5, 0.0 }
 0x329   :  { %2588 = vmatpush.bf16.msra.mxu1 %v3753_v57  ;;  %v3770_v57 = vld [vmem:[#allocation8 + $0x98] sm:$0xff] }
 0x32a   :  { %v2123_v63 = vmax.f32 %v1785_v51, %v2103_v2  ;;  %v2194_v7 = vrot.slane %v2156_v23, 1  ;;  %v2209_v6 = vrot.slane %v2156_v23, 2  ;;  %v2224_v27 = vrot.slane %v2156_v23, 3  ;;  %v3752_v2 = vld [vmem:[#allocation8 + $0x8] sm:$0xff]  ;;  %v2081_v46 = vpop.f32.mrf.mxu0 }
 0x32b   :  { %v2047_v45 = vpop.f32.mrf.mxu3  ;;  %v2239_v51 = vrot.slane %v2156_v23, 4  ;;  %2613 = vmatpush.bf16.msra.mxu0 %v3770_v57 }
 0x32c   :  { %v2048_v39 = vadd.f32 %v2047_v45, %v2019_v37  ;;  %v2137_v43 = vmax.f32 %v2122_v11, %v2123_v63 }
 0x32d   :  { %2589 = vmatpush.bf16.msra.mxu1 %v3752_v2 }
 0x32e   :  { %v2077_v48 = vadd.f32 %v2076_v55, %v2048_v39  ;;  %v2105_v20 = vpop.f32.mrf.mxu2  ;;  %v2149_v16 = vadd.f32 %v5029_v29, %v2137_v43 }
 0x330   :  { %v2106_v47 = vadd.f32 %v2105_v20, %v2077_v48  ;;  %v2157_v52 = vmax.f32 %v2149_v16, 0.0  ;;  %v3778_v20 = vld [vmem:[#allocation8 + $0xd8] sm:$0xff]  ;;  %v3761_v16 = vld [vmem:[#allocation8 + $0x50] sm:$0xff] }
 0x331   :  { %2626 = vmatpush.bf16.msra.mxu2 %v3778_v20  ;;  %2601 = vmatpush.bf16.msra.mxu3 %v3761_v16 }
 0x332   :  { %v2125_v32 = vmax.f32 %v4932_v4, %v2106_v47  ;;  %v2172_v56 = vrot.slane %v2157_v52, 7  ;;  %v2195_v11 = vsel %vm2173_vm3, %v2157_v52, %v2194_v7  ;;  %v2210_v55 = vrot.slane %v2157_v52, 1 }
 0x333   :  { %v2225_v40 = vrot.slane %v2157_v52, 2  ;;  %v2049_v58 = vpop.f32.mrf.mxu3  ;;  %v2240_v5 = vrot.slane %v2157_v52, 3  ;;  %v1790_v47 = vadd.f32 %v4934_v19, %v1761_v3  ;;  %v2024_v7 = vadd.f32 %v2023_v38, %v4993_v61  ;;  %v3777_v19 = vld [vmem:[#allocation8 + $0xd0] sm:$0xff] }
 0x334   :  { %v2138_v37 = vmax.f32 %v2124_v53, %v2125_v32  ;;  %v2050_v8 = vadd.f32 %v2049_v58, %v2021_v41  ;;  %v2174_v63 = vsel %vm2173_vm3, %v2172_v56, %v2156_v23  ;;  %v2211_v4 = vsel %vm2173_vm3, %v2210_v55, %v2209_v6  ;;  %v3751_v53 = vld [vmem:[#allocation8] sm:$0xff]  ;;  %v2025_v6 = vpop.f32.mrf.mxu1  ;;  %v3769_v61 = vld [vmem:[#allocation8 + $0x90] sm:$0xff] }
 0x335   :  { %v2226_v45 = vsel %vm2173_vm3, %v2225_v40, %v2224_v27  ;;  %v2241_v10 = vsel %vm2173_vm3, %v2240_v5, %v2239_v51  ;;  %2590 = vmatpush.bf16.msra.mxu1 %v3751_v53  ;;  %v3789_v38 = vld [vmem:[#allocation8 + $0x130] sm:$0xff]  ;;  %2627 = vmatpush.bf16.msra.mxu2 %v3777_v19  ;;  %v2026_v1 = vadd.f32 %v2025_v6, %v5004_v21 }
 0x336   :  { %v2150_v54 = vadd.f32 %v5029_v29, %v2138_v37  ;;  %v2079_v39 = vadd.f32 %v2078_v14, %v2050_v8  ;;  %v2107_v43 = vpop.f32.mrf.mxu2  ;;  %v3790_v14 = vld [vmem:[#allocation8 + $0x138] sm:$0xff]  ;;  %2614 = vmatpush.bf16.msra.mxu0 %v3769_v61  ;;  %2602 = vmatpush.bf16.msra.mxu3 %v3760_v22 }
 0x338   :  { %v2158_v23 = vmax.f32 %v2150_v54, 0.0  ;;  %v2108_v48 = vadd.f32 %v2107_v43, %v2079_v39  ;;  %v3788_v54 = vld [vmem:[#allocation8 + $0x128] sm:$0xff] }
 0x339   :  { %2635 = vmatpush.bf16.msrb.mxu1 %v3790_v14 }
 0x33a   :  { %v2175_v52 = vrot.slane %v2158_v23, 6  ;;  %v2196_v41 = vrot.slane %v2158_v23, 7  ;;  %v2212_v62 = vsel %vm2176_vm4, %v2158_v23, %v2211_v4  ;;  %v2227_v42 = vrot.slane %v2158_v23, 1  ;;  %v3776_v4 = vld [vmem:[#allocation8 + $0xc8] sm:$0xff] }
 0x33b   :  { %v2242_v27 = vrot.slane %v2158_v23, 2  ;;  %v2127_v32 = vmax.f32 %v1790_v47, %v2108_v48  ;;  %v2052_v56 = vpop.f32.mrf.mxu3  ;;  %2628 = vmatpush.bf16.msra.mxu2 %v3776_v4  ;;  %v3767_v23 = vld [vmem:[#allocation8 + $0x80] sm:$0xff]  ;;  %v3784_v4 = vld [vmem:[#allocation8 + $0x108] sm:$0xff] }
 0x33c   :  { %v2228_v55 = vsel %vm2176_vm4, %v2227_v42, %v2226_v45  ;;  %v2053_v40 = vadd.f32 %v2052_v56, %v2024_v7  ;;  %v2177_v58 = vsel %vm2176_vm4, %v2175_v52, %v2174_v63  ;;  %v2197_v2 = vsel %vm2176_vm4, %v2196_v41, %v2195_v11  ;;  %v3768_v63 = vld [vmem:[#allocation8 + $0x88] sm:$0xff]  ;;  %v2083_v45 = vpop.f32.mrf.mxu0  ;;  %v2028_v16 = vpop.f32.mrf.mxu1 }
 0x33d   :  { %v2139_v51 = vmax.f32 %v2126_v9, %v2127_v32  ;;  %v2243_v5 = vsel %vm2176_vm4, %v2242_v27, %v2241_v10  ;;  %2636 = vmatpush.bf16.msrb.mxu1 %v3789_v38  ;;  %v3759_v9 = vld [vmem:[#allocation8 + $0x40] sm:$0xff]  ;;  %2615 = vmatpush.bf16.msra.mxu0 %v3768_v63  ;;  %v2029_v6 = vadd.f32 %v2028_v16, %v5010_v26 }
 0x33e   :  { %v2082_v37 = vadd.f32 %v2081_v46, %v2053_v40  ;;  %v2110_v8 = vpop.f32.mrf.mxu2  ;;  %v3775_v10 = vld [vmem:[#allocation8 + $0xc0] sm:$0xff]  ;;  %2603 = vmatpush.bf16.msra.mxu3 %v3759_v9 }
 0x33f   :  { %v2151_v49 = vadd.f32 %v5029_v29, %v2139_v51  ;;  %2629 = vmatpush.bf16.msra.mxu2 %v3775_v10 }
 0x340   :  { %v2111_v35 = vadd.f32 %v2110_v8, %v2082_v37 }
 0x341   :  { %v2159_v11 = vmax.f32 %v2151_v49, 0.0  ;;  %2637 = vmatpush.bf16.msrb.mxu1 %v3788_v54  ;;  %2616 = vmatpush.bf16.msra.mxu0 %v3767_v23 }
 0x342   :  { %v2129_v0 = vmax.f32 %v4940_v44, %v2111_v35  ;;  %v3787_v44 = vld [vmem:[#allocation8 + $0x120] sm:$0xff]  ;;  %2718 = vmatpush.bf16.msrb.mxu3 %v3798_v36 }
 0x343   :  { %v2178_v39 = vrot.slane %v2159_v11, 5  ;;  %v2198_v43 = vrot.slane %v2159_v11, 6  ;;  %v2213_v3 = vrot.slane %v2159_v11, 7  ;;  %v2229_v46 = vsel %vm2179_vm5, %v2159_v11, %v2228_v55  ;;  %v2054_v53 = vpop.f32.mrf.mxu3  ;;  %v3799_v36 = vld [vmem:[#allocation11] sm:$0xff] }
 0x344   :  { %v2244_v48 = vrot.slane %v2159_v11, 1  ;;  %v2140_v20 = vmax.f32 %v2128_v28, %v2129_v0  ;;  %v2055_v21 = vadd.f32 %v2054_v53, %v2026_v1  ;;  %v3786_v28 = vld [vmem:[#allocation8 + $0x118] sm:$0xff]  ;;  %v2086_v55 = vpop.f32.mrf.mxu0  ;;  %v2030_v49 = vpop.f32.mrf.mxu1 }
 0x345   :  { %v2180_v57 = vsel %vm2179_vm5, %v2178_v39, %v2177_v58  ;;  %v2199_v47 = vsel %vm2179_vm5, %v2198_v43, %v2197_v2  ;;  %v2214_v7 = vsel %vm2179_vm5, %v2213_v3, %v2212_v62  ;;  %2638 = vmatpush.bf16.msrb.mxu1 %v3787_v44  ;;  %v3783_v39 = vld [vmem:[#allocation8 + $0x100] sm:$0xff] }
 0x346   :  { %v2152_v14 = vadd.f32 %v5029_v29, %v2140_v20  ;;  %v2084_v52 = vadd.f32 %v2083_v45, %v2055_v21  ;;  %v2112_v41 = vpop.f32.mrf.mxu2  ;;  %v2245_v42 = vsel %vm2179_vm5, %v2244_v48, %v2243_v5  ;;  %v3785_v5 = vld [vmem:[#allocation8 + $0x110] sm:$0xff]  ;;  %v2031_v45 = vadd.f32 %v2030_v49, %v5016_v24  ;;  %v3806_v49 = vld [vmem:[#allocation11 + $0x38] sm:$0xff] }
 0x347   :  { %v3797_v21 = vld [vmem:[#allocation10 + $0x30] sm:$0xff]  ;;  %2801 = vmatpush.bf16.msrb.mxu0 %v3806_v49 }
 0x348   :  { %v2160_v18 = vmax.f32 %v2152_v14, 0.0  ;;  %v2113_v31 = vadd.f32 %v2112_v41, %v2084_v52  ;;  %2719 = vmatpush.bf16.msrb.mxu3 %v3797_v21 }
 0x349   :  { %2639 = vmatpush.bf16.msrb.mxu1 %v3786_v28 }
 0x34a   :  { %v2181_v27 = vrot.slane %v2160_v18, 4  ;;  %v2200_v32 = vrot.slane %v2160_v18, 5  ;;  %v2215_v56 = vrot.slane %v2160_v18, 6  ;;  %v2230_v62 = vrot.slane %v2160_v18, 7 }
 0x34b   :  { %v2131_v40 = vmax.f32 %v4942_v60, %v2113_v31  ;;  %v2057_v19 = vpop.f32.mrf.mxu3  ;;  %v2246_v61 = vsel %vm2182_vm6, %v2160_v18, %v2245_v42 }
 0x34c   :  { %v2058_v38 = vadd.f32 %v2057_v19, %v2029_v6  ;;  %v2183_v58 = vsel %vm2182_vm6, %v2181_v27, %v2180_v57  ;;  %v2201_v2 = vsel %vm2182_vm6, %v2200_v32, %v2199_v47  ;;  %v2216_v51 = vsel %vm2182_vm6, %v2215_v56, %v2214_v7  ;;  %v2088_v43 = vpop.f32.mrf.mxu0 }
 0x34d   :  { %v2141_v26 = vmax.f32 %v2130_v13, %v2131_v40  ;;  %v2231_v37 = vsel %vm2182_vm6, %v2230_v62, %v2229_v46  ;;  %2640 = vmatpush.bf16.msrb.mxu1 %v3785_v5  ;;  %v3795_v5 = vld [vmem:[#allocation10 + $0x20] sm:$0xff] }
 0x34e   :  { %v2087_v8 = vadd.f32 %v2086_v55, %v2058_v38  ;;  %v2115_v60 = vpop.f32.mrf.mxu2 }
 0x34f   :  { %v2153_v35 = vadd.f32 %v5029_v29, %v2141_v26  ;;  %v3794_v26 = vld [vmem:[#allocation10 + $0x18] sm:$0xff] }
 0x350   :  { %v2116_v22 = vadd.f32 %v2115_v60, %v2087_v8  ;;  %v3792_v8 = vld [vmem:[#allocation10 + $0x8] sm:$0xff]  ;;  %v3791_v60 = vld [vmem:[#allocation10] sm:$0xff] }
 0x351   :  { %v2161_v63 = vmax.f32 %v2153_v35, 0.0  ;;  %2641 = vmatpush.bf16.msrb.mxu1 %v3784_v4  ;;  %v3805_v35 = vld [vmem:[#allocation11 + $0x30] sm:$0xff] }
 0x352   :  { %v2133_v11 = vmax.f32 %v4946_v33, %v2116_v22  ;;  %2802 = vmatpush.bf16.msrb.mxu0 %v3805_v35  ;;  %v3804_v22 = vld [vmem:[#allocation11 + $0x28] sm:$0xff] }
 0x353   :  { %v2184_v54 = vrot.slane %v2161_v63, 3  ;;  %v2202_v1 = vrot.slane %v2161_v63, 4  ;;  %v2217_v12 = vrot.slane %v2161_v63, 5  ;;  %v2232_v17 = vrot.slane %v2161_v63, 6  ;;  %v2059_v13 = vpop.f32.mrf.mxu3 }
 0x354   :  { %v2247_v0 = vrot.slane %v2161_v63, 7  ;;  %v2142_v9 = vmax.f32 %v2132_v15, %v2133_v11  ;;  %v2060_v10 = vadd.f32 %v2059_v13, %v2031_v45  ;;  %v3821_v63 = vld [vmem:[%s5120_s6] ss:$0 sm:$0xff] }
 0x355   :  { %v2186_v3 = vsel %vm2185_vm7, %v2184_v54, %v2183_v58  ;;  %v2203_v24 = vsel %vm2185_vm7, %v2202_v1, %v2201_v2  ;;  %v2218_v33 = vsel %vm2185_vm7, %v2217_v12, %v2216_v51  ;;  %v2233_v46 = vsel %vm2185_vm7, %v2232_v17, %v2231_v37  ;;  %2642 = vmatpush.bf16.msrb.mxu1 %v3783_v39  ;;  %v3796_v51 = vld [vmem:[#allocation10 + $0x28] sm:$0xff]  ;;  %v3793_v37 = vld [vmem:[#allocation10 + $0x10] sm:$0xff]  ;;  %v3803_v11 = vld [vmem:[#allocation11 + $0x20] sm:$0xff] }
 0x356   :  { %v2154_v53 = vadd.f32 %v5029_v29, %v2142_v9  ;;  %v2089_v23 = vadd.f32 %v2088_v43, %v2060_v10  ;;  %v2117_v48 = vpop.f32.mrf.mxu2  ;;  %v2248_v20 = vsel %vm2185_vm7, %v2247_v0, %v2246_v61  ;;  %2720 = vmatpush.bf16.msrb.mxu3 %v3796_v51  ;;  %2803 = vmatpush.bf16.msrb.mxu0 %v3804_v22  ;;  %v3802_v12 = vld [vmem:[#allocation11 + $0x18] sm:$0xff]  ;;  %v3801_v10 = vld [vmem:[#allocation11 + $0x10] sm:$0xff] }
 0x358   :  { %v2162_v30 = vmax.f32 %v2154_v53, 0.0  ;;  %v2118_v15 = vadd.f32 %v2117_v48, %v2089_v23 }
 0x35a   :  { %v2135_v44 = vmax.f32 %v4948_v34, %v2118_v15  ;;  %v2187_v16 = vrot.slane %v2162_v30, 2  ;;  %v2204_v57 = vrot.slane %v2162_v30, 3  ;;  %v2219_v47 = vrot.slane %v2162_v30, 4  ;;  %2721 = vmatpush.bf16.msrb.mxu3 %v3795_v5  ;;  %2804 = vmatpush.bf16.msrb.mxu0 %v3803_v11 }
 0x35b   :  { %v2234_v7 = vrot.slane %v2162_v30, 5  ;;  %v2249_v14 = vrot.slane %v2162_v30, 6  ;;  %v3822_v30 = vld [vmem:[%s5122_s8] ss:$0 sm:$0xff] }
 0x35c   :  { %v2143_v52 = vmax.f32 %v2134_v59, %v2135_v44  ;;  %v2189_v41 = vsel %vm2188_vm8, %v2187_v16, %v2186_v3  ;;  %v2205_v42 = vsel %vm2188_vm8, %v2204_v57, %v2203_v24  ;;  %v2220_v18 = vsel %vm2188_vm8, %v2219_v47, %v2218_v33  ;;  %v3823_v47 = vld [vmem:[%s5124_s10] ss:$0 sm:$0xff] }
 0x35d   :  { %v2235_v31 = vsel %vm2188_vm8, %v2234_v7, %v2233_v46  ;;  %v2250_v28 = vsel %vm2188_vm8, %v2249_v14, %v2248_v20  ;;  %v3800_v20 = vld [vmem:[#allocation11 + $0x8] sm:$0xff] }
 0x35e   :  { %v2155_v6 = vadd.f32 %v5029_v29, %v2143_v52  ;;  %2722 = vmatpush.bf16.msrb.mxu3 %v3794_v26  ;;  %2805 = vmatpush.bf16.msrb.mxu0 %v3802_v12 }
 0x360   :  { %v2163_v27 = vmax.f32 %v2155_v6, 0.0 }
 0x362   :  { %v2190_v34 = vrot.slane %v2163_v27, 1  ;;  %v2206_v32 = vrot.slane %v2163_v27, 2  ;;  %v2221_v56 = vrot.slane %v2163_v27, 3  ;;  %v2236_v62 = vrot.slane %v2163_v27, 4  ;;  %2723 = vmatpush.bf16.msrb.mxu3 %v3793_v37  ;;  %2806 = vmatpush.bf16.msrb.mxu0 %v3801_v10 }
 0x363   :  { %v2251_v55 = vrot.slane %v2163_v27, 5 }
 0x364   :  { %v2192_v40 = vsel %vm2191_vm9, %v2190_v34, %v2189_v41  ;;  %v2207_v19 = vsel %vm2191_vm9, %v2206_v32, %v2205_v42  ;;  %v2222_v61 = vsel %vm2191_vm9, %v2221_v56, %v2220_v18  ;;  %v2237_v50 = vsel %vm2191_vm9, %v2236_v62, %v2235_v31 }
 0x365   :  { %v2254_v25 = vpack.c.bf16 %v2192_v40, %v2192_v40  ;;  %v2255_v59 = vpack.c.bf16 %v2207_v19, %v2207_v19  ;;  %v2256_v38 = vpack.c.bf16 %v2222_v61, %v2222_v61  ;;  %v2257_v58 = vpack.c.bf16 %v2237_v50, %v2237_v50 }
 0x366   :  { %v2252_v2 = vsel %vm2191_vm9, %v2251_v55, %v2250_v28  ;;  %2724 = vmatpush.bf16.msrb.mxu3 %v3792_v8  ;;  %2807 = vmatpush.bf16.msrb.mxu0 %v3800_v20 }
 0x367   :  { %2591 = vmatmul.bf16.vlgmr.msra.gmra.mxu1 %v2254_v25  ;;  %2604 = vmatmul.bf16.vlgmr.msra.gmra.mxu3 %v2255_v59  ;;  %v2258_v29 = vpack.c.bf16 %v2252_v2, %v2252_v2 }
 0x368   :  { %2617 = vmatmul.bf16.vlgmr.msra.gmra.mxu0 %v2256_v38  ;;  %2630 = vmatmul.bf16.vlgmr.msra.gmra.mxu2 %v2257_v58 }
 0x36a   :  { %2725 = vmatpush.bf16.msrb.mxu3 %v3791_v60  ;;  %2808 = vmatpush.bf16.msrb.mxu0 %v3799_v36 }
 0x377   :  { %2643 = vmatmul.bf16.vlgmr.msrb.gmra.mxu1 %v2258_v29 }
 0x3e4   :  { %v2592_v4 = vpop.f32.mrf.mxu1 }
 0x3e5   :  { %v2618_v45 = vpop.f32.mrf.mxu0  ;;  %v2593_v54 = vadd.f32 %v3821_v63, %v2592_v4 }
 0x3ea   :  { %v2605_v1 = vpop.f32.mrf.mxu3 }
 0x3eb   :  { %v2606_v17 = vadd.f32 %v2605_v1, %v2593_v54  ;;  %v2631_v13 = vpop.f32.mrf.mxu2 }
 0x3ec   :  { %v2594_v0 = vpop.f32.mrf.mxu1 }
 0x3ed   :  { %v2620_v9 = vpop.f32.mrf.mxu0  ;;  %v2619_v39 = vadd.f32 %v2618_v45, %v2606_v17 }
 0x3ef   :  { %v2632_v3 = vadd.f32 %v2631_v13, %v2619_v39 }
 0x3f2   :  { %v2607_v43 = vpop.f32.mrf.mxu3 }
 0x3f3   :  { %v2633_v24 = vpop.f32.mrf.mxu2 }
 0x3f4   :  { %v2644_v33 = vpop.f32.mrf.mxu1 }
 0x3f5   :  { %v2645_v46 = vadd.f32 %v2644_v33, %v2632_v3 }
 0x3f7   :  { %v2648_v53 = vmax.f32 %v2645_v46, 0.0 }
 0x3f9   :  { %v2649_v23 = vpack.c.bf16 %v2648_v53, %v2648_v53 }
 0x3fb   :  { %2726 = vmatmul.bf16.vlgmr.msrb.gmra.mxu3 %v2649_v23 }
 0x3fc   :  { %v2646_v48 = vpop.f32.mrf.mxu1 }
 0x47e   :  { %v2727_v15 = vpop.f32.mrf.mxu3 }
 0x47f   :  { %v2728_v21 = vadd.f32 %v3822_v30, %v2727_v15 }
 0x481   :  { %v2731_v44 = vmax.f32 %v2728_v21, 0.0 }
 0x483   :  { %v2732_v16 = vpack.c.bf16 %v2731_v44, %v2731_v44 }
 0x485   :  { %2809 = vmatmul.bf16.vlgmr.msrb.gmra.mxu0 %v2732_v16 }
 0x486   :  { %v2729_v57 = vpop.f32.mrf.mxu3 }
 0x502   :  { %v2810_v7 = vpop.f32.mrf.mxu0 }
 0x503   :  { %v2811_v14 = vadd.f32 %v3823_v47, %v2810_v7 }
 0x505   :  { %2814 = vst [vmem:[#allocation13] sm:$0xff] %v2811_v14 }
 0x506   :  { %2825 = dma.vmem_to_hbm [thread:$0]  %s2821_s16, 128, %s2823_s18, [#allocation4]  }
 0x50a   :  { %v2812_v52 = vpop.f32.mrf.mxu0 }
 0x50b   :  { %4001 = dma.done.wait [#allocation4], 128  }
 0x50c   :  { %4002 = vsyncadd [#allocation4], 4294967168 }
 0x50d   :  { %2830 = vsyncpa [#allocation3], 1 }
 0x50e   :  { %2831 = vsyncpa [#allocation6], 1 }
 0x50f   :  { %2832 = vsyncpa [#allocation9], 1 }
 0x510   :  { %2833 = vsyncpa [#allocation12], 1 }
 0x511   :  { %2834 = vsyncpa [#allocation4], 1 }

</bundles_post_ra>
